<compile_context>
chip_gen: v7x
topology: tpu7x:2x2x1
jax: 0.10.0
libtpu: 0.0.40
codegen_flags: <defaults>
</compile_context>

<pallas_src>
import jax
import jax.numpy as jnp
from jax.experimental import pallas as pl
from jax.experimental.pallas import tpu as pltpu

# ----------------------------- model config (small, CI-sized) ---------------
VOCAB = 50
N_POS = 16
D = 32                    # n_embd
N_LAYER = 2
N_HEAD = 4
HEAD_DIM = D // N_HEAD    # 8
D_FF = 4 * D              # 128
NUM_LABELS = 1
LN_EPS = 1e-5
OUT_LANES = 128           # lane-dense output slab width (logit in lane 0, prob in lane 1)


# ----------------------------- fused kernel ----------------------------------
def _layernorm(x, g, b):
    mu = jnp.mean(x, axis=-1, keepdims=True)
    var = jnp.mean((x - mu) ** 2, axis=-1, keepdims=True)
    return (x - mu) * jax.lax.rsqrt(var + LN_EPS) * g + b


def _gelu_new(y):
    # GPT-2 "gelu_new" (tanh approximation)
    return 0.5 * y * (1.0 + jnp.tanh(0.7978845608028654 * (y + 0.044715 * y * y * y)))


def gpt2_fused_kernel(
    idx_ref,                  # SMEM (B,) int32 : clamped last-non-padded index per seq
    h_ref,                    # (B*T, D) f32    : token + position embeddings
    add_mask_ref,             # (B, T)   f32    : additive padding mask (0 / -1e9)
    ln1_g_ref, ln1_b_ref,     # (L, 1, D)
    w_qkv_ref, b_qkv_ref,     # (L, D, 3D), (L, 1, 3D)
    w_proj_ref, b_proj_ref,   # (L, D, D),  (L, 1, D)
    ln2_g_ref, ln2_b_ref,     # (L, 1, D)
    w_fc_ref, b_fc_ref,       # (L, D, D_FF), (L, 1, D_FF)
    w_mlp_ref, b_mlp_ref,     # (L, D_FF, D), (L, 1, D)
    lnf_g_ref, lnf_b_ref,     # (1, D)
    cls_w_ref, cls_b_ref,     # (1, D), (1, 1)
    out_ref,                  # (B, OUT_LANES) f32 : lane 0 = logit, lane 1 = prob
):
    B, T = add_mask_ref.shape
    H, hd = N_HEAD, HEAD_DIM
    scale = 1.0 / jnp.sqrt(jnp.float32(hd))

    h = h_ref[...]                              # (B*T, D) — stays in VMEM/vregs
    add_mask = add_mask_ref[...]                # (B, T)

    # Causal mask, built once (hoisted out of the per-layer loop).
    row = jax.lax.broadcasted_iota(jnp.int32, (T, T), 0)
    col = jax.lax.broadcasted_iota(jnp.int32, (T, T), 1)
    causal = col <= row
    neg_big = jnp.float32(-1e9)

    for li in range(N_LAYER):
        # ---------------- attention sub-block (pre-LN) ----------------
        x = _layernorm(h, ln1_g_ref[li], ln1_b_ref[li])
        qkv = jnp.dot(x, w_qkv_ref[li],
                      preferred_element_type=jnp.float32) + b_qkv_ref[li]   # (B*T, 3D)
        # Static lane slices — zero-cost VMEM views (no HBM relayout).
        q = qkv[:, 0 * D:1 * D]
        k = qkv[:, 1 * D:2 * D]
        v = qkv[:, 2 * D:3 * D]

        w_proj_l = w_proj_ref[li]                                           # (D, D)
        batch_rows = []
        for b in range(B):
            am = add_mask[b:b + 1, :]                    # (1, T) additive key mask
            r0, r1 = b * T, (b + 1) * T
            acc = None
            for hh in range(H):
                c0, c1 = hh * hd, (hh + 1) * hd
                qbh = q[r0:r1, c0:c1]                    # (T, hd)
                kbh = k[r0:r1, c0:c1]
                vbh = v[r0:r1, c0:c1]
                s = jax.lax.dot_general(
                    qbh, kbh, (((1,), (1,)), ((), ())),
                    preferred_element_type=jnp.float32) * scale             # (T, T)
                s = jnp.where(causal, s, neg_big) + am
                s = s - jnp.max(s, axis=-1, keepdims=True)
                p = jnp.exp(s)
                p = p * pl.reciprocal(jnp.sum(p, axis=-1, keepdims=True),
                                      approx=False)
                o_h = jnp.dot(p, vbh, preferred_element_type=jnp.float32)   # (T, hd)
                # Head merge fused into the output projection: no lane concat.
                contrib = jnp.dot(o_h, w_proj_l[c0:c1, :],
                                  preferred_element_type=jnp.float32)       # (T, D)
                acc = contrib if acc is None else acc + contrib
            batch_rows.append(acc)
        attn = jnp.concatenate(batch_rows, axis=0) + b_proj_ref[li]          # (B*T, D)
        h = h + attn                                                         # residual

        # ---------------- MLP sub-block (pre-LN) ----------------
        x = _layernorm(h, ln2_g_ref[li], ln2_b_ref[li])
        x = jnp.dot(x, w_fc_ref[li],
                    preferred_element_type=jnp.float32) + b_fc_ref[li]       # (B*T, D_FF)
        x = _gelu_new(x)
        x = jnp.dot(x, w_mlp_ref[li],
                    preferred_element_type=jnp.float32) + b_mlp_ref[li]      # (B*T, D)
        h = h + x                                                            # residual

    # Final layernorm.
    h = _layernorm(h, lnf_g_ref[...], lnf_b_ref[...])                        # (B*T, D)

    # Last-non-padded-token gather: one-hot row select + sublane reduce (VPU/XLU).
    rowid = jax.lax.broadcasted_iota(jnp.int32, (B * T, 1), 0)
    feats = []
    for b in range(B):
        target = b * T + idx_ref[b]                      # SMEM scalar read
        sel = (rowid == target).astype(jnp.float32)      # (B*T, 1)
        feats.append(jnp.sum(h * sel, axis=0, keepdims=True))   # (1, D)
    features = jnp.concatenate(feats, axis=0)            # (B, D)

    # Classifier: (D -> 1) is a dot product, done on the VPU (no MXU latency),
    # then sigmoid.  nn.Linear weight layout is (out=1, in=D) == (1, D).
    logit = jnp.sum(features * cls_w_ref[...], axis=-1, keepdims=True) + cls_b_ref[...]
    prob = jax.nn.sigmoid(logit)                         # (B, 1)

    # Lane-dense output slab: one unmasked-lane store instead of two (B,1) outputs.
    lane = jax.lax.broadcasted_iota(jnp.int32, (B, OUT_LANES), 1)
    out_ref[...] = jnp.where(lane == 0, logit, jnp.where(lane == 1, prob, 0.0))


# ----------------------------- parameters ------------------------------------
def init_params(key):
    # TODO(synk): real module loads frozen pretrained distilgpt2 weights; here we
    # use deterministic random init with the same shapes / Conv1D convention.
    std = 0.02

    def nrm(k, shape):
        return std * jax.random.normal(k, shape, dtype=jnp.float32)

    keys = jax.random.split(key, 4 + N_LAYER)
    per_layer = []
    for li in range(N_LAYER):
        lk = jax.random.split(keys[4 + li], 4)
        per_layer.append({
            "ln1_g": jnp.ones((1, D), jnp.float32),
            "ln1_b": jnp.zeros((1, D), jnp.float32),
            "w_qkv": nrm(lk[0], (D, 3 * D)),
            "b_qkv": jnp.zeros((1, 3 * D), jnp.float32),
            "w_proj": nrm(lk[1], (D, D)),
            "b_proj": jnp.zeros((1, D), jnp.float32),
            "ln2_g": jnp.ones((1, D), jnp.float32),
            "ln2_b": jnp.zeros((1, D), jnp.float32),
            "w_fc": nrm(lk[2], (D, D_FF)),
            "b_fc": jnp.zeros((1, D_FF), jnp.float32),
            "w_mlp": nrm(lk[3], (D_FF, D)),
            "b_mlp": jnp.zeros((1, D), jnp.float32),
        })

    def stk(name):
        return jnp.stack([lp[name] for lp in per_layer], axis=0)

    params = {
        "wte": nrm(keys[0], (VOCAB, D)),
        "wpe": nrm(keys[1], (N_POS, D)),
        "lnf_g": jnp.ones((1, D), jnp.float32),
        "lnf_b": jnp.zeros((1, D), jnp.float32),
        # nn.Linear(n_embd, 1): weight (1, D), bias (1,)
        "cls_w": nrm(keys[2], (1, D)),
        "cls_b": jnp.zeros((1, 1), jnp.float32),
    }
    for name in ("ln1_g", "ln1_b", "w_qkv", "b_qkv", "w_proj", "b_proj",
                 "ln2_g", "ln2_b", "w_fc", "b_fc", "w_mlp", "b_mlp"):
        params[name] = stk(name)
    return params


# ----------------------------- forward ----------------------------------------
def forward(params, input_ids, attention_mask):
    B, T = input_ids.shape

    # Embedding gather (plain-JAX glue).
    h0 = (params["wte"][input_ids] + params["wpe"][:T][None, :, :]).reshape(B * T, D)
    h0 = h0.astype(jnp.float32)

    # Additive padding mask (0 for real tokens, -1e9 for padded keys), built once.
    add_mask = (attention_mask.astype(jnp.float32) - 1.0) * 1e9               # (B, T)

    # Last non-padded token index per sequence (clamped to 0 for empty masks).
    seq_lengths = jnp.sum(attention_mask, axis=1) - 1
    idx = jnp.maximum(seq_lengths, 0).astype(jnp.int32)                        # (B,)

    def full(shape):
        nd = len(shape)
        return pl.BlockSpec(shape, lambda *_: (0,) * nd)

    L = N_LAYER
    in_specs = [
        full((B * T, D)),                                   # h0
        full((B, T)),                                       # add_mask
        full((L, 1, D)), full((L, 1, D)),                   # ln1 gamma/beta
        full((L, D, 3 * D)), full((L, 1, 3 * D)),           # qkv
        full((L, D, D)), full((L, 1, D)),                   # attn out-proj
        full((L, 1, D)), full((L, 1, D)),                   # ln2 gamma/beta
        full((L, D, D_FF)), full((L, 1, D_FF)),             # mlp fc
        full((L, D_FF, D)), full((L, 1, D)),                # mlp proj
        full((1, D)), full((1, D)),                          # final ln
        full((1, D)), full((1, 1)),                          # classifier w/b
    ]

    grid_spec = pltpu.PrefetchScalarGridSpec(
        num_scalar_prefetch=1,                               # idx -> SMEM
        grid=(1,),
        in_specs=in_specs,
        out_specs=full((B, OUT_LANES)),
    )

    out_slab = pl.pallas_call(
        gpt2_fused_kernel,
        out_shape=jax.ShapeDtypeStruct((B, OUT_LANES), jnp.float32),
        grid_spec=grid_spec,
        compiler_params=pltpu.CompilerParams(
            dimension_semantics=("arbitrary",)),
    )(
        idx, h0, add_mask,
        params["ln1_g"], params["ln1_b"],
        params["w_qkv"], params["b_qkv"],
        params["w_proj"], params["b_proj"],
        params["ln2_g"], params["ln2_b"],
        params["w_fc"], params["b_fc"],
        params["w_mlp"], params["b_mlp"],
        params["lnf_g"], params["lnf_b"],
        params["cls_w"], params["cls_b"],
    )

    return {"logits": out_slab[:, 0], "probs": out_slab[:, 1]}


# ----------------------------- main -------------------------------------------
if __name__ == "__main__":
    key = jax.random.PRNGKey(0)
    pkey, ikey = jax.random.split(key)

    params = init_params(pkey)

    B, T = 2, 8
    input_ids = jax.random.randint(ikey, (B, T), 0, VOCAB, dtype=jnp.int32)
    attention_mask = jnp.array(
        [[1, 1, 1, 1, 1, 1, 1, 1],
         [1, 1, 1, 1, 1, 0, 0, 0]], dtype=jnp.int32)

    fwd = jax.jit(forward)
    out = fwd(params, input_ids, attention_mask)
    jax.block_until_ready(out)

    assert out["logits"].shape == (B,)
    assert out["probs"].shape == (B,)
    print("KERNEL_OK")
</pallas_src>

<mosaic_0001>
module attributes {stable_mosaic.version = 11 : i64} {
  func.func @gpt2_fused_kernel(%arg0: i32, %arg1: memref<2xi32, #tpu.memory_space<smem>>, %arg2: memref<16x32xf32, #tpu.memory_space<vmem>>, %arg3: memref<2x8xf32, #tpu.memory_space<vmem>>, %arg4: memref<2x1x32xf32, #tpu.memory_space<vmem>>, %arg5: memref<2x1x32xf32, #tpu.memory_space<vmem>>, %arg6: memref<2x32x96xf32, #tpu.memory_space<vmem>>, %arg7: memref<2x1x96xf32, #tpu.memory_space<vmem>>, %arg8: memref<2x32x32xf32, #tpu.memory_space<vmem>>, %arg9: memref<2x1x32xf32, #tpu.memory_space<vmem>>, %arg10: memref<2x1x32xf32, #tpu.memory_space<vmem>>, %arg11: memref<2x1x32xf32, #tpu.memory_space<vmem>>, %arg12: memref<2x32x128xf32, #tpu.memory_space<vmem>>, %arg13: memref<2x1x128xf32, #tpu.memory_space<vmem>>, %arg14: memref<2x128x32xf32, #tpu.memory_space<vmem>>, %arg15: memref<2x1x32xf32, #tpu.memory_space<vmem>>, %arg16: memref<1x32xf32, #tpu.memory_space<vmem>>, %arg17: memref<1x32xf32, #tpu.memory_space<vmem>>, %arg18: memref<1x32xf32, #tpu.memory_space<vmem>>, %arg19: memref<1x1xf32, #tpu.memory_space<vmem>>, %arg20: memref<2x128xf32, #tpu.memory_space<vmem>>) attributes {dimension_semantics = [#tpu.dimension_semantics<arbitrary>], iteration_bounds = array<i64: 1>, scalar_prefetch = 1 : i64, scratch_operands = 0 : i64, tpu.core_type = #tpu.core_type<tc>, window_params = [{pipeline_mode = #tpu.pipeline_mode<synchronous>, transform_indices = @transform_0, window_bounds = array<i64: 16, 32>}, {pipeline_mode = #tpu.pipeline_mode<synchronous>, transform_indices = @transform_1, window_bounds = array<i64: 2, 8>}, {pipeline_mode = #tpu.pipeline_mode<synchronous>, transform_indices = @transform_2, window_bounds = array<i64: 2, 1, 32>}, {pipeline_mode = #tpu.pipeline_mode<synchronous>, transform_indices = @transform_3, window_bounds = array<i64: 2, 1, 32>}, {pipeline_mode = #tpu.pipeline_mode<synchronous>, transform_indices = @transform_4, window_bounds = array<i64: 2, 32, 96>}, {pipeline_mode = #tpu.pipeline_mode<synchronous>, transform_indices = @transform_5, window_bounds = array<i64: 2, 1, 96>}, {pipeline_mode = #tpu.pipeline_mode<synchronous>, transform_indices = @transform_6, window_bounds = array<i64: 2, 32, 32>}, {pipeline_mode = #tpu.pipeline_mode<synchronous>, transform_indices = @transform_7, window_bounds = array<i64: 2, 1, 32>}, {pipeline_mode = #tpu.pipeline_mode<synchronous>, transform_indices = @transform_8, window_bounds = array<i64: 2, 1, 32>}, {pipeline_mode = #tpu.pipeline_mode<synchronous>, transform_indices = @transform_9, window_bounds = array<i64: 2, 1, 32>}, {pipeline_mode = #tpu.pipeline_mode<synchronous>, transform_indices = @transform_10, window_bounds = array<i64: 2, 32, 128>}, {pipeline_mode = #tpu.pipeline_mode<synchronous>, transform_indices = @transform_11, window_bounds = array<i64: 2, 1, 128>}, {pipeline_mode = #tpu.pipeline_mode<synchronous>, transform_indices = @transform_12, window_bounds = array<i64: 2, 128, 32>}, {pipeline_mode = #tpu.pipeline_mode<synchronous>, transform_indices = @transform_13, window_bounds = array<i64: 2, 1, 32>}, {pipeline_mode = #tpu.pipeline_mode<synchronous>, transform_indices = @transform_14, window_bounds = array<i64: 1, 32>}, {pipeline_mode = #tpu.pipeline_mode<synchronous>, transform_indices = @transform_15, window_bounds = array<i64: 1, 32>}, {pipeline_mode = #tpu.pipeline_mode<synchronous>, transform_indices = @transform_16, window_bounds = array<i64: 1, 32>}, {pipeline_mode = #tpu.pipeline_mode<synchronous>, transform_indices = @transform_17, window_bounds = array<i64: 1, 1>}, {pipeline_mode = #tpu.pipeline_mode<synchronous>, transform_indices = @transform_18, window_bounds = array<i64: 2, 128>}]} {
    %cst = arith.constant 8.000000e+00 : f32
    %0 = math.sqrt %cst : f32
    %cst_0 = arith.constant 1.000000e+00 : f32
    %1 = arith.divf %cst_0, %0 : f32
    %c0 = arith.constant 0 : index
    %c0_1 = arith.constant 0 : index
    %2 = vector.load %arg2[%c0, %c0_1] : memref<16x32xf32, #tpu.memory_space<vmem>>, vector<16x32xf32>
    %c0_2 = arith.constant 0 : index
    %c0_3 = arith.constant 0 : index
    %3 = vector.load %arg3[%c0_2, %c0_3] : memref<2x8xf32, #tpu.memory_space<vmem>>, vector<2x8xf32>
    %4 = tpu.iota {dimensions = array<i32: 0>} : vector<8x8xi32>
    %5 = tpu.iota {dimensions = array<i32: 1>} : vector<8x8xi32>
    %6 = arith.cmpi sle, %5, %4 : vector<8x8xi32>
    %c0_4 = arith.constant 0 : index
    %c0_5 = arith.constant 0 : index
    %c0_6 = arith.constant 0 : index
    %7 = vector.load %arg4[%c0_4, %c0_5, %c0_6] : memref<2x1x32xf32, #tpu.memory_space<vmem>>, vector<1x1x32xf32>
    %8 = vector.shape_cast %7 : vector<1x1x32xf32> to vector<1x32xf32>
    %c0_7 = arith.constant 0 : index
    %c0_8 = arith.constant 0 : index
    %c0_9 = arith.constant 0 : index
    %9 = vector.load %arg5[%c0_7, %c0_8, %c0_9] : memref<2x1x32xf32, #tpu.memory_space<vmem>>, vector<1x1x32xf32>
    %10 = vector.shape_cast %9 : vector<1x1x32xf32> to vector<1x32xf32>
    %cst_10 = arith.constant dense<0.000000e+00> : vector<16xf32>
    %11 = vector.multi_reduction <add>, %2, %cst_10 [1] : vector<16x32xf32> to vector<16xf32>
    %12 = vector.shape_cast %11 : vector<16xf32> to vector<16x1xf32>
    %cst_11 = arith.constant 3.200000e+01 : f32
    %13 = vector.broadcast %cst_11 : f32 to vector<16x1xf32>
    %14 = arith.divf %12, %13 : vector<16x1xf32>
    %15 = vector.broadcast %14 : vector<16x1xf32> to vector<16x32xf32>
    %16 = arith.subf %2, %15 : vector<16x32xf32>
    %17 = arith.mulf %16, %16 : vector<16x32xf32>
    %cst_12 = arith.constant dense<0.000000e+00> : vector<16xf32>
    %18 = vector.multi_reduction <add>, %17, %cst_12 [1] : vector<16x32xf32> to vector<16xf32>
    %19 = vector.shape_cast %18 : vector<16xf32> to vector<16x1xf32>
    %cst_13 = arith.constant 3.200000e+01 : f32
    %20 = vector.broadcast %cst_13 : f32 to vector<16x1xf32>
    %21 = arith.divf %19, %20 : vector<16x1xf32>
    %22 = vector.broadcast %14 : vector<16x1xf32> to vector<16x32xf32>
    %23 = arith.subf %2, %22 : vector<16x32xf32>
    %cst_14 = arith.constant 9.99999974E-6 : f32
    %24 = vector.broadcast %cst_14 : f32 to vector<16x1xf32>
    %25 = arith.addf %21, %24 : vector<16x1xf32>
    %26 = math.rsqrt %25 : vector<16x1xf32>
    %27 = vector.broadcast %26 : vector<16x1xf32> to vector<16x32xf32>
    %28 = arith.mulf %23, %27 : vector<16x32xf32>
    %29 = vector.broadcast %8 : vector<1x32xf32> to vector<16x32xf32>
    %30 = arith.mulf %28, %29 : vector<16x32xf32>
    %31 = vector.broadcast %10 : vector<1x32xf32> to vector<16x32xf32>
    %32 = arith.addf %30, %31 : vector<16x32xf32>
    %c0_15 = arith.constant 0 : index
    %c0_16 = arith.constant 0 : index
    %c0_17 = arith.constant 0 : index
    %33 = vector.load %arg6[%c0_15, %c0_16, %c0_17] : memref<2x32x96xf32, #tpu.memory_space<vmem>>, vector<1x32x96xf32>
    %34 = vector.shape_cast %33 : vector<1x32x96xf32> to vector<32x96xf32>
    %cst_18 = arith.constant dense<0.000000e+00> : vector<16x96xf32>
    %35 = tpu.matmul %32, %34, %cst_18 {dimension_numbers = #tpu.dot_dimension_numbers<[1], [0], [0], [1], [0, 0, 1, 1], [], []>} : vector<16x32xf32>, vector<32x96xf32>, vector<16x96xf32> -> vector<16x96xf32>
    %c0_19 = arith.constant 0 : index
    %c0_20 = arith.constant 0 : index
    %c0_21 = arith.constant 0 : index
    %36 = vector.load %arg7[%c0_19, %c0_20, %c0_21] : memref<2x1x96xf32, #tpu.memory_space<vmem>>, vector<1x1x96xf32>
    %37 = vector.shape_cast %36 : vector<1x1x96xf32> to vector<1x96xf32>
    %38 = vector.broadcast %37 : vector<1x96xf32> to vector<16x96xf32>
    %39 = arith.addf %35, %38 : vector<16x96xf32>
    %40 = vector.extract_strided_slice %39 {offsets = [0, 0], sizes = [16, 32], strides = [1, 1]} : vector<16x96xf32> to vector<16x32xf32>
    %41 = vector.extract_strided_slice %39 {offsets = [0, 32], sizes = [16, 32], strides = [1, 1]} : vector<16x96xf32> to vector<16x32xf32>
    %42 = vector.extract_strided_slice %39 {offsets = [0, 64], sizes = [16, 32], strides = [1, 1]} : vector<16x96xf32> to vector<16x32xf32>
    %c0_22 = arith.constant 0 : index
    %c0_23 = arith.constant 0 : index
    %c0_24 = arith.constant 0 : index
    %43 = vector.load %arg8[%c0_22, %c0_23, %c0_24] : memref<2x32x32xf32, #tpu.memory_space<vmem>>, vector<1x32x32xf32>
    %44 = vector.shape_cast %43 : vector<1x32x32xf32> to vector<32x32xf32>
    %45 = vector.extract_strided_slice %3 {offsets = [0, 0], sizes = [1, 8], strides = [1, 1]} : vector<2x8xf32> to vector<1x8xf32>
    %46 = vector.extract_strided_slice %40 {offsets = [0, 0], sizes = [8, 8], strides = [1, 1]} : vector<16x32xf32> to vector<8x8xf32>
    %47 = vector.extract_strided_slice %41 {offsets = [0, 0], sizes = [8, 8], strides = [1, 1]} : vector<16x32xf32> to vector<8x8xf32>
    %48 = vector.extract_strided_slice %42 {offsets = [0, 0], sizes = [8, 8], strides = [1, 1]} : vector<16x32xf32> to vector<8x8xf32>
    %cst_25 = arith.constant dense<0.000000e+00> : vector<8x8xf32>
    %49 = tpu.matmul %46, %47, %cst_25 {dimension_numbers = #tpu.dot_dimension_numbers<[1], [1], [0], [0], [0, 0, 1, 0], [], []>} : vector<8x8xf32>, vector<8x8xf32>, vector<8x8xf32> -> vector<8x8xf32>
    %50 = vector.broadcast %1 : f32 to vector<8x8xf32>
    %51 = arith.mulf %49, %50 : vector<8x8xf32>
    %cst_26 = arith.constant -1.000000e+09 : f32
    %52 = vector.broadcast %cst_26 : f32 to vector<8x8xf32>
    %53 = arith.select %6, %51, %52 : vector<8x8xi1>, vector<8x8xf32>
    %54 = vector.broadcast %45 : vector<1x8xf32> to vector<8x8xf32>
    %55 = arith.addf %53, %54 : vector<8x8xf32>
    %cst_27 = arith.constant dense<0xFF800000> : vector<8xf32>
    %56 = vector.multi_reduction <maximumf>, %55, %cst_27 [1] : vector<8x8xf32> to vector<8xf32>
    %57 = vector.shape_cast %56 : vector<8xf32> to vector<8x1xf32>
    %58 = vector.broadcast %57 : vector<8x1xf32> to vector<8x8xf32>
    %59 = arith.subf %55, %58 : vector<8x8xf32>
    %60 = math.exp %59 : vector<8x8xf32>
    %cst_28 = arith.constant dense<0.000000e+00> : vector<8xf32>
    %61 = vector.multi_reduction <add>, %60, %cst_28 [1] : vector<8x8xf32> to vector<8xf32>
    %62 = vector.shape_cast %61 : vector<8xf32> to vector<8x1xf32>
    %63 = tpu.reciprocal %62 : vector<8x1xf32> -> vector<8x1xf32>
    %64 = vector.broadcast %63 : vector<8x1xf32> to vector<8x8xf32>
    %65 = arith.mulf %60, %64 : vector<8x8xf32>
    %cst_29 = arith.constant dense<0.000000e+00> : vector<8x8xf32>
    %66 = tpu.matmul %65, %48, %cst_29 {dimension_numbers = #tpu.dot_dimension_numbers<[1], [0], [0], [1], [0, 0, 1, 1], [], []>} : vector<8x8xf32>, vector<8x8xf32>, vector<8x8xf32> -> vector<8x8xf32>
    %67 = vector.extract_strided_slice %44 {offsets = [0, 0], sizes = [8, 32], strides = [1, 1]} : vector<32x32xf32> to vector<8x32xf32>
    %cst_30 = arith.constant dense<0.000000e+00> : vector<8x32xf32>
    %68 = tpu.matmul %66, %67, %cst_30 {dimension_numbers = #tpu.dot_dimension_numbers<[1], [0], [0], [1], [0, 0, 1, 1], [], []>} : vector<8x8xf32>, vector<8x32xf32>, vector<8x32xf32> -> vector<8x32xf32>
    %69 = vector.extract_strided_slice %40 {offsets = [0, 8], sizes = [8, 8], strides = [1, 1]} : vector<16x32xf32> to vector<8x8xf32>
    %70 = vector.extract_strided_slice %41 {offsets = [0, 8], sizes = [8, 8], strides = [1, 1]} : vector<16x32xf32> to vector<8x8xf32>
    %71 = vector.extract_strided_slice %42 {offsets = [0, 8], sizes = [8, 8], strides = [1, 1]} : vector<16x32xf32> to vector<8x8xf32>
    %cst_31 = arith.constant dense<0.000000e+00> : vector<8x8xf32>
    %72 = tpu.matmul %69, %70, %cst_31 {dimension_numbers = #tpu.dot_dimension_numbers<[1], [1], [0], [0], [0, 0, 1, 0], [], []>} : vector<8x8xf32>, vector<8x8xf32>, vector<8x8xf32> -> vector<8x8xf32>
    %73 = vector.broadcast %1 : f32 to vector<8x8xf32>
    %74 = arith.mulf %72, %73 : vector<8x8xf32>
    %cst_32 = arith.constant -1.000000e+09 : f32
    %75 = vector.broadcast %cst_32 : f32 to vector<8x8xf32>
    %76 = arith.select %6, %74, %75 : vector<8x8xi1>, vector<8x8xf32>
    %77 = vector.broadcast %45 : vector<1x8xf32> to vector<8x8xf32>
    %78 = arith.addf %76, %77 : vector<8x8xf32>
    %cst_33 = arith.constant dense<0xFF800000> : vector<8xf32>
    %79 = vector.multi_reduction <maximumf>, %78, %cst_33 [1] : vector<8x8xf32> to vector<8xf32>
    %80 = vector.shape_cast %79 : vector<8xf32> to vector<8x1xf32>
    %81 = vector.broadcast %80 : vector<8x1xf32> to vector<8x8xf32>
    %82 = arith.subf %78, %81 : vector<8x8xf32>
    %83 = math.exp %82 : vector<8x8xf32>
    %cst_34 = arith.constant dense<0.000000e+00> : vector<8xf32>
    %84 = vector.multi_reduction <add>, %83, %cst_34 [1] : vector<8x8xf32> to vector<8xf32>
    %85 = vector.shape_cast %84 : vector<8xf32> to vector<8x1xf32>
    %86 = tpu.reciprocal %85 : vector<8x1xf32> -> vector<8x1xf32>
    %87 = vector.broadcast %86 : vector<8x1xf32> to vector<8x8xf32>
    %88 = arith.mulf %83, %87 : vector<8x8xf32>
    %cst_35 = arith.constant dense<0.000000e+00> : vector<8x8xf32>
    %89 = tpu.matmul %88, %71, %cst_35 {dimension_numbers = #tpu.dot_dimension_numbers<[1], [0], [0], [1], [0, 0, 1, 1], [], []>} : vector<8x8xf32>, vector<8x8xf32>, vector<8x8xf32> -> vector<8x8xf32>
    %90 = vector.extract_strided_slice %44 {offsets = [8, 0], sizes = [8, 32], strides = [1, 1]} : vector<32x32xf32> to vector<8x32xf32>
    %cst_36 = arith.constant dense<0.000000e+00> : vector<8x32xf32>
    %91 = tpu.matmul %89, %90, %cst_36 {dimension_numbers = #tpu.dot_dimension_numbers<[1], [0], [0], [1], [0, 0, 1, 1], [], []>} : vector<8x8xf32>, vector<8x32xf32>, vector<8x32xf32> -> vector<8x32xf32>
    %92 = arith.addf %68, %91 : vector<8x32xf32>
    %93 = vector.extract_strided_slice %40 {offsets = [0, 16], sizes = [8, 8], strides = [1, 1]} : vector<16x32xf32> to vector<8x8xf32>
    %94 = vector.extract_strided_slice %41 {offsets = [0, 16], sizes = [8, 8], strides = [1, 1]} : vector<16x32xf32> to vector<8x8xf32>
    %95 = vector.extract_strided_slice %42 {offsets = [0, 16], sizes = [8, 8], strides = [1, 1]} : vector<16x32xf32> to vector<8x8xf32>
    %cst_37 = arith.constant dense<0.000000e+00> : vector<8x8xf32>
    %96 = tpu.matmul %93, %94, %cst_37 {dimension_numbers = #tpu.dot_dimension_numbers<[1], [1], [0], [0], [0, 0, 1, 0], [], []>} : vector<8x8xf32>, vector<8x8xf32>, vector<8x8xf32> -> vector<8x8xf32>
    %97 = vector.broadcast %1 : f32 to vector<8x8xf32>
    %98 = arith.mulf %96, %97 : vector<8x8xf32>
    %cst_38 = arith.constant -1.000000e+09 : f32
    %99 = vector.broadcast %cst_38 : f32 to vector<8x8xf32>
    %100 = arith.select %6, %98, %99 : vector<8x8xi1>, vector<8x8xf32>
    %101 = vector.broadcast %45 : vector<1x8xf32> to vector<8x8xf32>
    %102 = arith.addf %100, %101 : vector<8x8xf32>
    %cst_39 = arith.constant dense<0xFF800000> : vector<8xf32>
    %103 = vector.multi_reduction <maximumf>, %102, %cst_39 [1] : vector<8x8xf32> to vector<8xf32>
    %104 = vector.shape_cast %103 : vector<8xf32> to vector<8x1xf32>
    %105 = vector.broadcast %104 : vector<8x1xf32> to vector<8x8xf32>
    %106 = arith.subf %102, %105 : vector<8x8xf32>
    %107 = math.exp %106 : vector<8x8xf32>
    %cst_40 = arith.constant dense<0.000000e+00> : vector<8xf32>
    %108 = vector.multi_reduction <add>, %107, %cst_40 [1] : vector<8x8xf32> to vector<8xf32>
    %109 = vector.shape_cast %108 : vector<8xf32> to vector<8x1xf32>
    %110 = tpu.reciprocal %109 : vector<8x1xf32> -> vector<8x1xf32>
    %111 = vector.broadcast %110 : vector<8x1xf32> to vector<8x8xf32>
    %112 = arith.mulf %107, %111 : vector<8x8xf32>
    %cst_41 = arith.constant dense<0.000000e+00> : vector<8x8xf32>
    %113 = tpu.matmul %112, %95, %cst_41 {dimension_numbers = #tpu.dot_dimension_numbers<[1], [0], [0], [1], [0, 0, 1, 1], [], []>} : vector<8x8xf32>, vector<8x8xf32>, vector<8x8xf32> -> vector<8x8xf32>
    %114 = vector.extract_strided_slice %44 {offsets = [16, 0], sizes = [8, 32], strides = [1, 1]} : vector<32x32xf32> to vector<8x32xf32>
    %cst_42 = arith.constant dense<0.000000e+00> : vector<8x32xf32>
    %115 = tpu.matmul %113, %114, %cst_42 {dimension_numbers = #tpu.dot_dimension_numbers<[1], [0], [0], [1], [0, 0, 1, 1], [], []>} : vector<8x8xf32>, vector<8x32xf32>, vector<8x32xf32> -> vector<8x32xf32>
    %116 = arith.addf %92, %115 : vector<8x32xf32>
    %117 = vector.extract_strided_slice %40 {offsets = [0, 24], sizes = [8, 8], strides = [1, 1]} : vector<16x32xf32> to vector<8x8xf32>
    %118 = vector.extract_strided_slice %41 {offsets = [0, 24], sizes = [8, 8], strides = [1, 1]} : vector<16x32xf32> to vector<8x8xf32>
    %119 = vector.extract_strided_slice %42 {offsets = [0, 24], sizes = [8, 8], strides = [1, 1]} : vector<16x32xf32> to vector<8x8xf32>
    %cst_43 = arith.constant dense<0.000000e+00> : vector<8x8xf32>
    %120 = tpu.matmul %117, %118, %cst_43 {dimension_numbers = #tpu.dot_dimension_numbers<[1], [1], [0], [0], [0, 0, 1, 0], [], []>} : vector<8x8xf32>, vector<8x8xf32>, vector<8x8xf32> -> vector<8x8xf32>
    %121 = vector.broadcast %1 : f32 to vector<8x8xf32>
    %122 = arith.mulf %120, %121 : vector<8x8xf32>
    %cst_44 = arith.constant -1.000000e+09 : f32
    %123 = vector.broadcast %cst_44 : f32 to vector<8x8xf32>
    %124 = arith.select %6, %122, %123 : vector<8x8xi1>, vector<8x8xf32>
    %125 = vector.broadcast %45 : vector<1x8xf32> to vector<8x8xf32>
    %126 = arith.addf %124, %125 : vector<8x8xf32>
    %cst_45 = arith.constant dense<0xFF800000> : vector<8xf32>
    %127 = vector.multi_reduction <maximumf>, %126, %cst_45 [1] : vector<8x8xf32> to vector<8xf32>
    %128 = vector.shape_cast %127 : vector<8xf32> to vector<8x1xf32>
    %129 = vector.broadcast %128 : vector<8x1xf32> to vector<8x8xf32>
    %130 = arith.subf %126, %129 : vector<8x8xf32>
    %131 = math.exp %130 : vector<8x8xf32>
    %cst_46 = arith.constant dense<0.000000e+00> : vector<8xf32>
    %132 = vector.multi_reduction <add>, %131, %cst_46 [1] : vector<8x8xf32> to vector<8xf32>
    %133 = vector.shape_cast %132 : vector<8xf32> to vector<8x1xf32>
    %134 = tpu.reciprocal %133 : vector<8x1xf32> -> vector<8x1xf32>
    %135 = vector.broadcast %134 : vector<8x1xf32> to vector<8x8xf32>
    %136 = arith.mulf %131, %135 : vector<8x8xf32>
    %cst_47 = arith.constant dense<0.000000e+00> : vector<8x8xf32>
    %137 = tpu.matmul %136, %119, %cst_47 {dimension_numbers = #tpu.dot_dimension_numbers<[1], [0], [0], [1], [0, 0, 1, 1], [], []>} : vector<8x8xf32>, vector<8x8xf32>, vector<8x8xf32> -> vector<8x8xf32>
    %138 = vector.extract_strided_slice %44 {offsets = [24, 0], sizes = [8, 32], strides = [1, 1]} : vector<32x32xf32> to vector<8x32xf32>
    %cst_48 = arith.constant dense<0.000000e+00> : vector<8x32xf32>
    %139 = tpu.matmul %137, %138, %cst_48 {dimension_numbers = #tpu.dot_dimension_numbers<[1], [0], [0], [1], [0, 0, 1, 1], [], []>} : vector<8x8xf32>, vector<8x32xf32>, vector<8x32xf32> -> vector<8x32xf32>
    %140 = arith.addf %116, %139 : vector<8x32xf32>
    %141 = vector.extract_strided_slice %3 {offsets = [1, 0], sizes = [1, 8], strides = [1, 1]} : vector<2x8xf32> to vector<1x8xf32>
    %142 = vector.extract_strided_slice %40 {offsets = [8, 0], sizes = [8, 8], strides = [1, 1]} : vector<16x32xf32> to vector<8x8xf32>
    %143 = vector.extract_strided_slice %41 {offsets = [8, 0], sizes = [8, 8], strides = [1, 1]} : vector<16x32xf32> to vector<8x8xf32>
    %144 = vector.extract_strided_slice %42 {offsets = [8, 0], sizes = [8, 8], strides = [1, 1]} : vector<16x32xf32> to vector<8x8xf32>
    %cst_49 = arith.constant dense<0.000000e+00> : vector<8x8xf32>
    %145 = tpu.matmul %142, %143, %cst_49 {dimension_numbers = #tpu.dot_dimension_numbers<[1], [1], [0], [0], [0, 0, 1, 0], [], []>} : vector<8x8xf32>, vector<8x8xf32>, vector<8x8xf32> -> vector<8x8xf32>
    %146 = vector.broadcast %1 : f32 to vector<8x8xf32>
    %147 = arith.mulf %145, %146 : vector<8x8xf32>
    %cst_50 = arith.constant -1.000000e+09 : f32
    %148 = vector.broadcast %cst_50 : f32 to vector<8x8xf32>
    %149 = arith.select %6, %147, %148 : vector<8x8xi1>, vector<8x8xf32>
    %150 = vector.broadcast %141 : vector<1x8xf32> to vector<8x8xf32>
    %151 = arith.addf %149, %150 : vector<8x8xf32>
    %cst_51 = arith.constant dense<0xFF800000> : vector<8xf32>
    %152 = vector.multi_reduction <maximumf>, %151, %cst_51 [1] : vector<8x8xf32> to vector<8xf32>
    %153 = vector.shape_cast %152 : vector<8xf32> to vector<8x1xf32>
    %154 = vector.broadcast %153 : vector<8x1xf32> to vector<8x8xf32>
    %155 = arith.subf %151, %154 : vector<8x8xf32>
    %156 = math.exp %155 : vector<8x8xf32>
    %cst_52 = arith.constant dense<0.000000e+00> : vector<8xf32>
    %157 = vector.multi_reduction <add>, %156, %cst_52 [1] : vector<8x8xf32> to vector<8xf32>
    %158 = vector.shape_cast %157 : vector<8xf32> to vector<8x1xf32>
    %159 = tpu.reciprocal %158 : vector<8x1xf32> -> vector<8x1xf32>
    %160 = vector.broadcast %159 : vector<8x1xf32> to vector<8x8xf32>
    %161 = arith.mulf %156, %160 : vector<8x8xf32>
    %cst_53 = arith.constant dense<0.000000e+00> : vector<8x8xf32>
    %162 = tpu.matmul %161, %144, %cst_53 {dimension_numbers = #tpu.dot_dimension_numbers<[1], [0], [0], [1], [0, 0, 1, 1], [], []>} : vector<8x8xf32>, vector<8x8xf32>, vector<8x8xf32> -> vector<8x8xf32>
    %163 = vector.extract_strided_slice %44 {offsets = [0, 0], sizes = [8, 32], strides = [1, 1]} : vector<32x32xf32> to vector<8x32xf32>
    %cst_54 = arith.constant dense<0.000000e+00> : vector<8x32xf32>
    %164 = tpu.matmul %162, %163, %cst_54 {dimension_numbers = #tpu.dot_dimension_numbers<[1], [0], [0], [1], [0, 0, 1, 1], [], []>} : vector<8x8xf32>, vector<8x32xf32>, vector<8x32xf32> -> vector<8x32xf32>
    %165 = vector.extract_strided_slice %40 {offsets = [8, 8], sizes = [8, 8], strides = [1, 1]} : vector<16x32xf32> to vector<8x8xf32>
    %166 = vector.extract_strided_slice %41 {offsets = [8, 8], sizes = [8, 8], strides = [1, 1]} : vector<16x32xf32> to vector<8x8xf32>
    %167 = vector.extract_strided_slice %42 {offsets = [8, 8], sizes = [8, 8], strides = [1, 1]} : vector<16x32xf32> to vector<8x8xf32>
    %cst_55 = arith.constant dense<0.000000e+00> : vector<8x8xf32>
    %168 = tpu.matmul %165, %166, %cst_55 {dimension_numbers = #tpu.dot_dimension_numbers<[1], [1], [0], [0], [0, 0, 1, 0], [], []>} : vector<8x8xf32>, vector<8x8xf32>, vector<8x8xf32> -> vector<8x8xf32>
    %169 = vector.broadcast %1 : f32 to vector<8x8xf32>
    %170 = arith.mulf %168, %169 : vector<8x8xf32>
    %cst_56 = arith.constant -1.000000e+09 : f32
    %171 = vector.broadcast %cst_56 : f32 to vector<8x8xf32>
    %172 = arith.select %6, %170, %171 : vector<8x8xi1>, vector<8x8xf32>
    %173 = vector.broadcast %141 : vector<1x8xf32> to vector<8x8xf32>
    %174 = arith.addf %172, %173 : vector<8x8xf32>
    %cst_57 = arith.constant dense<0xFF800000> : vector<8xf32>
    %175 = vector.multi_reduction <maximumf>, %174, %cst_57 [1] : vector<8x8xf32> to vector<8xf32>
    %176 = vector.shape_cast %175 : vector<8xf32> to vector<8x1xf32>
    %177 = vector.broadcast %176 : vector<8x1xf32> to vector<8x8xf32>
    %178 = arith.subf %174, %177 : vector<8x8xf32>
    %179 = math.exp %178 : vector<8x8xf32>
    %cst_58 = arith.constant dense<0.000000e+00> : vector<8xf32>
    %180 = vector.multi_reduction <add>, %179, %cst_58 [1] : vector<8x8xf32> to vector<8xf32>
    %181 = vector.shape_cast %180 : vector<8xf32> to vector<8x1xf32>
    %182 = tpu.reciprocal %181 : vector<8x1xf32> -> vector<8x1xf32>
    %183 = vector.broadcast %182 : vector<8x1xf32> to vector<8x8xf32>
    %184 = arith.mulf %179, %183 : vector<8x8xf32>
    %cst_59 = arith.constant dense<0.000000e+00> : vector<8x8xf32>
    %185 = tpu.matmul %184, %167, %cst_59 {dimension_numbers = #tpu.dot_dimension_numbers<[1], [0], [0], [1], [0, 0, 1, 1], [], []>} : vector<8x8xf32>, vector<8x8xf32>, vector<8x8xf32> -> vector<8x8xf32>
    %186 = vector.extract_strided_slice %44 {offsets = [8, 0], sizes = [8, 32], strides = [1, 1]} : vector<32x32xf32> to vector<8x32xf32>
    %cst_60 = arith.constant dense<0.000000e+00> : vector<8x32xf32>
    %187 = tpu.matmul %185, %186, %cst_60 {dimension_numbers = #tpu.dot_dimension_numbers<[1], [0], [0], [1], [0, 0, 1, 1], [], []>} : vector<8x8xf32>, vector<8x32xf32>, vector<8x32xf32> -> vector<8x32xf32>
    %188 = arith.addf %164, %187 : vector<8x32xf32>
    %189 = vector.extract_strided_slice %40 {offsets = [8, 16], sizes = [8, 8], strides = [1, 1]} : vector<16x32xf32> to vector<8x8xf32>
    %190 = vector.extract_strided_slice %41 {offsets = [8, 16], sizes = [8, 8], strides = [1, 1]} : vector<16x32xf32> to vector<8x8xf32>
    %191 = vector.extract_strided_slice %42 {offsets = [8, 16], sizes = [8, 8], strides = [1, 1]} : vector<16x32xf32> to vector<8x8xf32>
    %cst_61 = arith.constant dense<0.000000e+00> : vector<8x8xf32>
    %192 = tpu.matmul %189, %190, %cst_61 {dimension_numbers = #tpu.dot_dimension_numbers<[1], [1], [0], [0], [0, 0, 1, 0], [], []>} : vector<8x8xf32>, vector<8x8xf32>, vector<8x8xf32> -> vector<8x8xf32>
    %193 = vector.broadcast %1 : f32 to vector<8x8xf32>
    %194 = arith.mulf %192, %193 : vector<8x8xf32>
    %cst_62 = arith.constant -1.000000e+09 : f32
    %195 = vector.broadcast %cst_62 : f32 to vector<8x8xf32>
    %196 = arith.select %6, %194, %195 : vector<8x8xi1>, vector<8x8xf32>
    %197 = vector.broadcast %141 : vector<1x8xf32> to vector<8x8xf32>
    %198 = arith.addf %196, %197 : vector<8x8xf32>
    %cst_63 = arith.constant dense<0xFF800000> : vector<8xf32>
    %199 = vector.multi_reduction <maximumf>, %198, %cst_63 [1] : vector<8x8xf32> to vector<8xf32>
    %200 = vector.shape_cast %199 : vector<8xf32> to vector<8x1xf32>
    %201 = vector.broadcast %200 : vector<8x1xf32> to vector<8x8xf32>
    %202 = arith.subf %198, %201 : vector<8x8xf32>
    %203 = math.exp %202 : vector<8x8xf32>
    %cst_64 = arith.constant dense<0.000000e+00> : vector<8xf32>
    %204 = vector.multi_reduction <add>, %203, %cst_64 [1] : vector<8x8xf32> to vector<8xf32>
    %205 = vector.shape_cast %204 : vector<8xf32> to vector<8x1xf32>
    %206 = tpu.reciprocal %205 : vector<8x1xf32> -> vector<8x1xf32>
    %207 = vector.broadcast %206 : vector<8x1xf32> to vector<8x8xf32>
    %208 = arith.mulf %203, %207 : vector<8x8xf32>
    %cst_65 = arith.constant dense<0.000000e+00> : vector<8x8xf32>
    %209 = tpu.matmul %208, %191, %cst_65 {dimension_numbers = #tpu.dot_dimension_numbers<[1], [0], [0], [1], [0, 0, 1, 1], [], []>} : vector<8x8xf32>, vector<8x8xf32>, vector<8x8xf32> -> vector<8x8xf32>
    %210 = vector.extract_strided_slice %44 {offsets = [16, 0], sizes = [8, 32], strides = [1, 1]} : vector<32x32xf32> to vector<8x32xf32>
    %cst_66 = arith.constant dense<0.000000e+00> : vector<8x32xf32>
    %211 = tpu.matmul %209, %210, %cst_66 {dimension_numbers = #tpu.dot_dimension_numbers<[1], [0], [0], [1], [0, 0, 1, 1], [], []>} : vector<8x8xf32>, vector<8x32xf32>, vector<8x32xf32> -> vector<8x32xf32>
    %212 = arith.addf %188, %211 : vector<8x32xf32>
    %213 = vector.extract_strided_slice %40 {offsets = [8, 24], sizes = [8, 8], strides = [1, 1]} : vector<16x32xf32> to vector<8x8xf32>
    %214 = vector.extract_strided_slice %41 {offsets = [8, 24], sizes = [8, 8], strides = [1, 1]} : vector<16x32xf32> to vector<8x8xf32>
    %215 = vector.extract_strided_slice %42 {offsets = [8, 24], sizes = [8, 8], strides = [1, 1]} : vector<16x32xf32> to vector<8x8xf32>
    %cst_67 = arith.constant dense<0.000000e+00> : vector<8x8xf32>
    %216 = tpu.matmul %213, %214, %cst_67 {dimension_numbers = #tpu.dot_dimension_numbers<[1], [1], [0], [0], [0, 0, 1, 0], [], []>} : vector<8x8xf32>, vector<8x8xf32>, vector<8x8xf32> -> vector<8x8xf32>
    %217 = vector.broadcast %1 : f32 to vector<8x8xf32>
    %218 = arith.mulf %216, %217 : vector<8x8xf32>
    %cst_68 = arith.constant -1.000000e+09 : f32
    %219 = vector.broadcast %cst_68 : f32 to vector<8x8xf32>
    %220 = arith.select %6, %218, %219 : vector<8x8xi1>, vector<8x8xf32>
    %221 = vector.broadcast %141 : vector<1x8xf32> to vector<8x8xf32>
    %222 = arith.addf %220, %221 : vector<8x8xf32>
    %cst_69 = arith.constant dense<0xFF800000> : vector<8xf32>
    %223 = vector.multi_reduction <maximumf>, %222, %cst_69 [1] : vector<8x8xf32> to vector<8xf32>
    %224 = vector.shape_cast %223 : vector<8xf32> to vector<8x1xf32>
    %225 = vector.broadcast %224 : vector<8x1xf32> to vector<8x8xf32>
    %226 = arith.subf %222, %225 : vector<8x8xf32>
    %227 = math.exp %226 : vector<8x8xf32>
    %cst_70 = arith.constant dense<0.000000e+00> : vector<8xf32>
    %228 = vector.multi_reduction <add>, %227, %cst_70 [1] : vector<8x8xf32> to vector<8xf32>
    %229 = vector.shape_cast %228 : vector<8xf32> to vector<8x1xf32>
    %230 = tpu.reciprocal %229 : vector<8x1xf32> -> vector<8x1xf32>
    %231 = vector.broadcast %230 : vector<8x1xf32> to vector<8x8xf32>
    %232 = arith.mulf %227, %231 : vector<8x8xf32>
    %cst_71 = arith.constant dense<0.000000e+00> : vector<8x8xf32>
    %233 = tpu.matmul %232, %215, %cst_71 {dimension_numbers = #tpu.dot_dimension_numbers<[1], [0], [0], [1], [0, 0, 1, 1], [], []>} : vector<8x8xf32>, vector<8x8xf32>, vector<8x8xf32> -> vector<8x8xf32>
    %234 = vector.extract_strided_slice %44 {offsets = [24, 0], sizes = [8, 32], strides = [1, 1]} : vector<32x32xf32> to vector<8x32xf32>
    %cst_72 = arith.constant dense<0.000000e+00> : vector<8x32xf32>
    %235 = tpu.matmul %233, %234, %cst_72 {dimension_numbers = #tpu.dot_dimension_numbers<[1], [0], [0], [1], [0, 0, 1, 1], [], []>} : vector<8x8xf32>, vector<8x32xf32>, vector<8x32xf32> -> vector<8x32xf32>
    %236 = arith.addf %212, %235 : vector<8x32xf32>
    %237 = tpu.concatenate %140, %236 in 0 : vector<8x32xf32>, vector<8x32xf32> -> vector<16x32xf32>
    %c0_73 = arith.constant 0 : index
    %c0_74 = arith.constant 0 : index
    %c0_75 = arith.constant 0 : index
    %238 = vector.load %arg9[%c0_73, %c0_74, %c0_75] : memref<2x1x32xf32, #tpu.memory_space<vmem>>, vector<1x1x32xf32>
    %239 = vector.shape_cast %238 : vector<1x1x32xf32> to vector<1x32xf32>
    %240 = vector.broadcast %239 : vector<1x32xf32> to vector<16x32xf32>
    %241 = arith.addf %237, %240 : vector<16x32xf32>
    %242 = arith.addf %2, %241 : vector<16x32xf32>
    %c0_76 = arith.constant 0 : index
    %c0_77 = arith.constant 0 : index
    %c0_78 = arith.constant 0 : index
    %243 = vector.load %arg10[%c0_76, %c0_77, %c0_78] : memref<2x1x32xf32, #tpu.memory_space<vmem>>, vector<1x1x32xf32>
    %244 = vector.shape_cast %243 : vector<1x1x32xf32> to vector<1x32xf32>
    %c0_79 = arith.constant 0 : index
    %c0_80 = arith.constant 0 : index
    %c0_81 = arith.constant 0 : index
    %245 = vector.load %arg11[%c0_79, %c0_80, %c0_81] : memref<2x1x32xf32, #tpu.memory_space<vmem>>, vector<1x1x32xf32>
    %246 = vector.shape_cast %245 : vector<1x1x32xf32> to vector<1x32xf32>
    %cst_82 = arith.constant dense<0.000000e+00> : vector<16xf32>
    %247 = vector.multi_reduction <add>, %242, %cst_82 [1] : vector<16x32xf32> to vector<16xf32>
    %248 = vector.shape_cast %247 : vector<16xf32> to vector<16x1xf32>
    %cst_83 = arith.constant 3.200000e+01 : f32
    %249 = vector.broadcast %cst_83 : f32 to vector<16x1xf32>
    %250 = arith.divf %248, %249 : vector<16x1xf32>
    %251 = vector.broadcast %250 : vector<16x1xf32> to vector<16x32xf32>
    %252 = arith.subf %242, %251 : vector<16x32xf32>
    %253 = arith.mulf %252, %252 : vector<16x32xf32>
    %cst_84 = arith.constant dense<0.000000e+00> : vector<16xf32>
    %254 = vector.multi_reduction <add>, %253, %cst_84 [1] : vector<16x32xf32> to vector<16xf32>
    %255 = vector.shape_cast %254 : vector<16xf32> to vector<16x1xf32>
    %cst_85 = arith.constant 3.200000e+01 : f32
    %256 = vector.broadcast %cst_85 : f32 to vector<16x1xf32>
    %257 = arith.divf %255, %256 : vector<16x1xf32>
    %258 = vector.broadcast %250 : vector<16x1xf32> to vector<16x32xf32>
    %259 = arith.subf %242, %258 : vector<16x32xf32>
    %cst_86 = arith.constant 9.99999974E-6 : f32
    %260 = vector.broadcast %cst_86 : f32 to vector<16x1xf32>
    %261 = arith.addf %257, %260 : vector<16x1xf32>
    %262 = math.rsqrt %261 : vector<16x1xf32>
    %263 = vector.broadcast %262 : vector<16x1xf32> to vector<16x32xf32>
    %264 = arith.mulf %259, %263 : vector<16x32xf32>
    %265 = vector.broadcast %244 : vector<1x32xf32> to vector<16x32xf32>
    %266 = arith.mulf %264, %265 : vector<16x32xf32>
    %267 = vector.broadcast %246 : vector<1x32xf32> to vector<16x32xf32>
    %268 = arith.addf %266, %267 : vector<16x32xf32>
    %c0_87 = arith.constant 0 : index
    %c0_88 = arith.constant 0 : index
    %c0_89 = arith.constant 0 : index
    %269 = vector.load %arg12[%c0_87, %c0_88, %c0_89] : memref<2x32x128xf32, #tpu.memory_space<vmem>>, vector<1x32x128xf32>
    %270 = vector.shape_cast %269 : vector<1x32x128xf32> to vector<32x128xf32>
    %cst_90 = arith.constant dense<0.000000e+00> : vector<16x128xf32>
    %271 = tpu.matmul %268, %270, %cst_90 {dimension_numbers = #tpu.dot_dimension_numbers<[1], [0], [0], [1], [0, 0, 1, 1], [], []>} : vector<16x32xf32>, vector<32x128xf32>, vector<16x128xf32> -> vector<16x128xf32>
    %c0_91 = arith.constant 0 : index
    %c0_92 = arith.constant 0 : index
    %c0_93 = arith.constant 0 : index
    %272 = vector.load %arg13[%c0_91, %c0_92, %c0_93] : memref<2x1x128xf32, #tpu.memory_space<vmem>>, vector<1x1x128xf32>
    %273 = vector.shape_cast %272 : vector<1x1x128xf32> to vector<1x128xf32>
    %274 = vector.broadcast %273 : vector<1x128xf32> to vector<16x128xf32>
    %275 = arith.addf %271, %274 : vector<16x128xf32>
    %cst_94 = arith.constant 5.000000e-01 : f32
    %276 = vector.broadcast %cst_94 : f32 to vector<16x128xf32>
    %277 = arith.mulf %276, %275 : vector<16x128xf32>
    %cst_95 = arith.constant 4.471500e-02 : f32
    %278 = vector.broadcast %cst_95 : f32 to vector<16x128xf32>
    %279 = arith.mulf %278, %275 : vector<16x128xf32>
    %280 = arith.mulf %279, %275 : vector<16x128xf32>
    %281 = arith.mulf %280, %275 : vector<16x128xf32>
    %282 = arith.addf %275, %281 : vector<16x128xf32>
    %cst_96 = arith.constant 0.797884583 : f32
    %283 = vector.broadcast %cst_96 : f32 to vector<16x128xf32>
    %284 = arith.mulf %283, %282 : vector<16x128xf32>
    %285 = math.tanh %284 : vector<16x128xf32>
    %cst_97 = arith.constant 1.000000e+00 : f32
    %286 = vector.broadcast %cst_97 : f32 to vector<16x128xf32>
    %287 = arith.addf %286, %285 : vector<16x128xf32>
    %288 = arith.mulf %277, %287 : vector<16x128xf32>
    %c0_98 = arith.constant 0 : index
    %c0_99 = arith.constant 0 : index
    %c0_100 = arith.constant 0 : index
    %289 = vector.load %arg14[%c0_98, %c0_99, %c0_100] : memref<2x128x32xf32, #tpu.memory_space<vmem>>, vector<1x128x32xf32>
    %290 = vector.shape_cast %289 : vector<1x128x32xf32> to vector<128x32xf32>
    %cst_101 = arith.constant dense<0.000000e+00> : vector<16x32xf32>
    %291 = tpu.matmul %288, %290, %cst_101 {dimension_numbers = #tpu.dot_dimension_numbers<[1], [0], [0], [1], [0, 0, 1, 1], [], []>} : vector<16x128xf32>, vector<128x32xf32>, vector<16x32xf32> -> vector<16x32xf32>
    %c0_102 = arith.constant 0 : index
    %c0_103 = arith.constant 0 : index
    %c0_104 = arith.constant 0 : index
    %292 = vector.load %arg15[%c0_102, %c0_103, %c0_104] : memref<2x1x32xf32, #tpu.memory_space<vmem>>, vector<1x1x32xf32>
    %293 = vector.shape_cast %292 : vector<1x1x32xf32> to vector<1x32xf32>
    %294 = vector.broadcast %293 : vector<1x32xf32> to vector<16x32xf32>
    %295 = arith.addf %291, %294 : vector<16x32xf32>
    %296 = arith.addf %242, %295 : vector<16x32xf32>
    %c1 = arith.constant 1 : index
    %c0_105 = arith.constant 0 : index
    %c0_106 = arith.constant 0 : index
    %297 = vector.load %arg4[%c1, %c0_105, %c0_106] : memref<2x1x32xf32, #tpu.memory_space<vmem>>, vector<1x1x32xf32>
    %298 = vector.shape_cast %297 : vector<1x1x32xf32> to vector<1x32xf32>
    %c1_107 = arith.constant 1 : index
    %c0_108 = arith.constant 0 : index
    %c0_109 = arith.constant 0 : index
    %299 = vector.load %arg5[%c1_107, %c0_108, %c0_109] : memref<2x1x32xf32, #tpu.memory_space<vmem>>, vector<1x1x32xf32>
    %300 = vector.shape_cast %299 : vector<1x1x32xf32> to vector<1x32xf32>
    %cst_110 = arith.constant dense<0.000000e+00> : vector<16xf32>
    %301 = vector.multi_reduction <add>, %296, %cst_110 [1] : vector<16x32xf32> to vector<16xf32>
    %302 = vector.shape_cast %301 : vector<16xf32> to vector<16x1xf32>
    %cst_111 = arith.constant 3.200000e+01 : f32
    %303 = vector.broadcast %cst_111 : f32 to vector<16x1xf32>
    %304 = arith.divf %302, %303 : vector<16x1xf32>
    %305 = vector.broadcast %304 : vector<16x1xf32> to vector<16x32xf32>
    %306 = arith.subf %296, %305 : vector<16x32xf32>
    %307 = arith.mulf %306, %306 : vector<16x32xf32>
    %cst_112 = arith.constant dense<0.000000e+00> : vector<16xf32>
    %308 = vector.multi_reduction <add>, %307, %cst_112 [1] : vector<16x32xf32> to vector<16xf32>
    %309 = vector.shape_cast %308 : vector<16xf32> to vector<16x1xf32>
    %cst_113 = arith.constant 3.200000e+01 : f32
    %310 = vector.broadcast %cst_113 : f32 to vector<16x1xf32>
    %311 = arith.divf %309, %310 : vector<16x1xf32>
    %312 = vector.broadcast %304 : vector<16x1xf32> to vector<16x32xf32>
    %313 = arith.subf %296, %312 : vector<16x32xf32>
    %cst_114 = arith.constant 9.99999974E-6 : f32
    %314 = vector.broadcast %cst_114 : f32 to vector<16x1xf32>
    %315 = arith.addf %311, %314 : vector<16x1xf32>
    %316 = math.rsqrt %315 : vector<16x1xf32>
    %317 = vector.broadcast %316 : vector<16x1xf32> to vector<16x32xf32>
    %318 = arith.mulf %313, %317 : vector<16x32xf32>
    %319 = vector.broadcast %298 : vector<1x32xf32> to vector<16x32xf32>
    %320 = arith.mulf %318, %319 : vector<16x32xf32>
    %321 = vector.broadcast %300 : vector<1x32xf32> to vector<16x32xf32>
    %322 = arith.addf %320, %321 : vector<16x32xf32>
    %c1_115 = arith.constant 1 : index
    %c0_116 = arith.constant 0 : index
    %c0_117 = arith.constant 0 : index
    %323 = vector.load %arg6[%c1_115, %c0_116, %c0_117] : memref<2x32x96xf32, #tpu.memory_space<vmem>>, vector<1x32x96xf32>
    %324 = vector.shape_cast %323 : vector<1x32x96xf32> to vector<32x96xf32>
    %cst_118 = arith.constant dense<0.000000e+00> : vector<16x96xf32>
    %325 = tpu.matmul %322, %324, %cst_118 {dimension_numbers = #tpu.dot_dimension_numbers<[1], [0], [0], [1], [0, 0, 1, 1], [], []>} : vector<16x32xf32>, vector<32x96xf32>, vector<16x96xf32> -> vector<16x96xf32>
    %c1_119 = arith.constant 1 : index
    %c0_120 = arith.constant 0 : index
    %c0_121 = arith.constant 0 : index
    %326 = vector.load %arg7[%c1_119, %c0_120, %c0_121] : memref<2x1x96xf32, #tpu.memory_space<vmem>>, vector<1x1x96xf32>
    %327 = vector.shape_cast %326 : vector<1x1x96xf32> to vector<1x96xf32>
    %328 = vector.broadcast %327 : vector<1x96xf32> to vector<16x96xf32>
    %329 = arith.addf %325, %328 : vector<16x96xf32>
    %330 = vector.extract_strided_slice %329 {offsets = [0, 0], sizes = [16, 32], strides = [1, 1]} : vector<16x96xf32> to vector<16x32xf32>
    %331 = vector.extract_strided_slice %329 {offsets = [0, 32], sizes = [16, 32], strides = [1, 1]} : vector<16x96xf32> to vector<16x32xf32>
    %332 = vector.extract_strided_slice %329 {offsets = [0, 64], sizes = [16, 32], strides = [1, 1]} : vector<16x96xf32> to vector<16x32xf32>
    %c1_122 = arith.constant 1 : index
    %c0_123 = arith.constant 0 : index
    %c0_124 = arith.constant 0 : index
    %333 = vector.load %arg8[%c1_122, %c0_123, %c0_124] : memref<2x32x32xf32, #tpu.memory_space<vmem>>, vector<1x32x32xf32>
    %334 = vector.shape_cast %333 : vector<1x32x32xf32> to vector<32x32xf32>
    %335 = vector.extract_strided_slice %3 {offsets = [0, 0], sizes = [1, 8], strides = [1, 1]} : vector<2x8xf32> to vector<1x8xf32>
    %336 = vector.extract_strided_slice %330 {offsets = [0, 0], sizes = [8, 8], strides = [1, 1]} : vector<16x32xf32> to vector<8x8xf32>
    %337 = vector.extract_strided_slice %331 {offsets = [0, 0], sizes = [8, 8], strides = [1, 1]} : vector<16x32xf32> to vector<8x8xf32>
    %338 = vector.extract_strided_slice %332 {offsets = [0, 0], sizes = [8, 8], strides = [1, 1]} : vector<16x32xf32> to vector<8x8xf32>
    %cst_125 = arith.constant dense<0.000000e+00> : vector<8x8xf32>
    %339 = tpu.matmul %336, %337, %cst_125 {dimension_numbers = #tpu.dot_dimension_numbers<[1], [1], [0], [0], [0, 0, 1, 0], [], []>} : vector<8x8xf32>, vector<8x8xf32>, vector<8x8xf32> -> vector<8x8xf32>
    %340 = vector.broadcast %1 : f32 to vector<8x8xf32>
    %341 = arith.mulf %339, %340 : vector<8x8xf32>
    %cst_126 = arith.constant -1.000000e+09 : f32
    %342 = vector.broadcast %cst_126 : f32 to vector<8x8xf32>
    %343 = arith.select %6, %341, %342 : vector<8x8xi1>, vector<8x8xf32>
    %344 = vector.broadcast %335 : vector<1x8xf32> to vector<8x8xf32>
    %345 = arith.addf %343, %344 : vector<8x8xf32>
    %cst_127 = arith.constant dense<0xFF800000> : vector<8xf32>
    %346 = vector.multi_reduction <maximumf>, %345, %cst_127 [1] : vector<8x8xf32> to vector<8xf32>
    %347 = vector.shape_cast %346 : vector<8xf32> to vector<8x1xf32>
    %348 = vector.broadcast %347 : vector<8x1xf32> to vector<8x8xf32>
    %349 = arith.subf %345, %348 : vector<8x8xf32>
    %350 = math.exp %349 : vector<8x8xf32>
    %cst_128 = arith.constant dense<0.000000e+00> : vector<8xf32>
    %351 = vector.multi_reduction <add>, %350, %cst_128 [1] : vector<8x8xf32> to vector<8xf32>
    %352 = vector.shape_cast %351 : vector<8xf32> to vector<8x1xf32>
    %353 = tpu.reciprocal %352 : vector<8x1xf32> -> vector<8x1xf32>
    %354 = vector.broadcast %353 : vector<8x1xf32> to vector<8x8xf32>
    %355 = arith.mulf %350, %354 : vector<8x8xf32>
    %cst_129 = arith.constant dense<0.000000e+00> : vector<8x8xf32>
    %356 = tpu.matmul %355, %338, %cst_129 {dimension_numbers = #tpu.dot_dimension_numbers<[1], [0], [0], [1], [0, 0, 1, 1], [], []>} : vector<8x8xf32>, vector<8x8xf32>, vector<8x8xf32> -> vector<8x8xf32>
    %357 = vector.extract_strided_slice %334 {offsets = [0, 0], sizes = [8, 32], strides = [1, 1]} : vector<32x32xf32> to vector<8x32xf32>
    %cst_130 = arith.constant dense<0.000000e+00> : vector<8x32xf32>
    %358 = tpu.matmul %356, %357, %cst_130 {dimension_numbers = #tpu.dot_dimension_numbers<[1], [0], [0], [1], [0, 0, 1, 1], [], []>} : vector<8x8xf32>, vector<8x32xf32>, vector<8x32xf32> -> vector<8x32xf32>
    %359 = vector.extract_strided_slice %330 {offsets = [0, 8], sizes = [8, 8], strides = [1, 1]} : vector<16x32xf32> to vector<8x8xf32>
    %360 = vector.extract_strided_slice %331 {offsets = [0, 8], sizes = [8, 8], strides = [1, 1]} : vector<16x32xf32> to vector<8x8xf32>
    %361 = vector.extract_strided_slice %332 {offsets = [0, 8], sizes = [8, 8], strides = [1, 1]} : vector<16x32xf32> to vector<8x8xf32>
    %cst_131 = arith.constant dense<0.000000e+00> : vector<8x8xf32>
    %362 = tpu.matmul %359, %360, %cst_131 {dimension_numbers = #tpu.dot_dimension_numbers<[1], [1], [0], [0], [0, 0, 1, 0], [], []>} : vector<8x8xf32>, vector<8x8xf32>, vector<8x8xf32> -> vector<8x8xf32>
    %363 = vector.broadcast %1 : f32 to vector<8x8xf32>
    %364 = arith.mulf %362, %363 : vector<8x8xf32>
    %cst_132 = arith.constant -1.000000e+09 : f32
    %365 = vector.broadcast %cst_132 : f32 to vector<8x8xf32>
    %366 = arith.select %6, %364, %365 : vector<8x8xi1>, vector<8x8xf32>
    %367 = vector.broadcast %335 : vector<1x8xf32> to vector<8x8xf32>
    %368 = arith.addf %366, %367 : vector<8x8xf32>
    %cst_133 = arith.constant dense<0xFF800000> : vector<8xf32>
    %369 = vector.multi_reduction <maximumf>, %368, %cst_133 [1] : vector<8x8xf32> to vector<8xf32>
    %370 = vector.shape_cast %369 : vector<8xf32> to vector<8x1xf32>
    %371 = vector.broadcast %370 : vector<8x1xf32> to vector<8x8xf32>
    %372 = arith.subf %368, %371 : vector<8x8xf32>
    %373 = math.exp %372 : vector<8x8xf32>
    %cst_134 = arith.constant dense<0.000000e+00> : vector<8xf32>
    %374 = vector.multi_reduction <add>, %373, %cst_134 [1] : vector<8x8xf32> to vector<8xf32>
    %375 = vector.shape_cast %374 : vector<8xf32> to vector<8x1xf32>
    %376 = tpu.reciprocal %375 : vector<8x1xf32> -> vector<8x1xf32>
    %377 = vector.broadcast %376 : vector<8x1xf32> to vector<8x8xf32>
    %378 = arith.mulf %373, %377 : vector<8x8xf32>
    %cst_135 = arith.constant dense<0.000000e+00> : vector<8x8xf32>
    %379 = tpu.matmul %378, %361, %cst_135 {dimension_numbers = #tpu.dot_dimension_numbers<[1], [0], [0], [1], [0, 0, 1, 1], [], []>} : vector<8x8xf32>, vector<8x8xf32>, vector<8x8xf32> -> vector<8x8xf32>
    %380 = vector.extract_strided_slice %334 {offsets = [8, 0], sizes = [8, 32], strides = [1, 1]} : vector<32x32xf32> to vector<8x32xf32>
    %cst_136 = arith.constant dense<0.000000e+00> : vector<8x32xf32>
    %381 = tpu.matmul %379, %380, %cst_136 {dimension_numbers = #tpu.dot_dimension_numbers<[1], [0], [0], [1], [0, 0, 1, 1], [], []>} : vector<8x8xf32>, vector<8x32xf32>, vector<8x32xf32> -> vector<8x32xf32>
    %382 = arith.addf %358, %381 : vector<8x32xf32>
    %383 = vector.extract_strided_slice %330 {offsets = [0, 16], sizes = [8, 8], strides = [1, 1]} : vector<16x32xf32> to vector<8x8xf32>
    %384 = vector.extract_strided_slice %331 {offsets = [0, 16], sizes = [8, 8], strides = [1, 1]} : vector<16x32xf32> to vector<8x8xf32>
    %385 = vector.extract_strided_slice %332 {offsets = [0, 16], sizes = [8, 8], strides = [1, 1]} : vector<16x32xf32> to vector<8x8xf32>
    %cst_137 = arith.constant dense<0.000000e+00> : vector<8x8xf32>
    %386 = tpu.matmul %383, %384, %cst_137 {dimension_numbers = #tpu.dot_dimension_numbers<[1], [1], [0], [0], [0, 0, 1, 0], [], []>} : vector<8x8xf32>, vector<8x8xf32>, vector<8x8xf32> -> vector<8x8xf32>
    %387 = vector.broadcast %1 : f32 to vector<8x8xf32>
    %388 = arith.mulf %386, %387 : vector<8x8xf32>
    %cst_138 = arith.constant -1.000000e+09 : f32
    %389 = vector.broadcast %cst_138 : f32 to vector<8x8xf32>
    %390 = arith.select %6, %388, %389 : vector<8x8xi1>, vector<8x8xf32>
    %391 = vector.broadcast %335 : vector<1x8xf32> to vector<8x8xf32>
    %392 = arith.addf %390, %391 : vector<8x8xf32>
    %cst_139 = arith.constant dense<0xFF800000> : vector<8xf32>
    %393 = vector.multi_reduction <maximumf>, %392, %cst_139 [1] : vector<8x8xf32> to vector<8xf32>
    %394 = vector.shape_cast %393 : vector<8xf32> to vector<8x1xf32>
    %395 = vector.broadcast %394 : vector<8x1xf32> to vector<8x8xf32>
    %396 = arith.subf %392, %395 : vector<8x8xf32>
    %397 = math.exp %396 : vector<8x8xf32>
    %cst_140 = arith.constant dense<0.000000e+00> : vector<8xf32>
    %398 = vector.multi_reduction <add>, %397, %cst_140 [1] : vector<8x8xf32> to vector<8xf32>
    %399 = vector.shape_cast %398 : vector<8xf32> to vector<8x1xf32>
    %400 = tpu.reciprocal %399 : vector<8x1xf32> -> vector<8x1xf32>
    %401 = vector.broadcast %400 : vector<8x1xf32> to vector<8x8xf32>
    %402 = arith.mulf %397, %401 : vector<8x8xf32>
    %cst_141 = arith.constant dense<0.000000e+00> : vector<8x8xf32>
    %403 = tpu.matmul %402, %385, %cst_141 {dimension_numbers = #tpu.dot_dimension_numbers<[1], [0], [0], [1], [0, 0, 1, 1], [], []>} : vector<8x8xf32>, vector<8x8xf32>, vector<8x8xf32> -> vector<8x8xf32>
    %404 = vector.extract_strided_slice %334 {offsets = [16, 0], sizes = [8, 32], strides = [1, 1]} : vector<32x32xf32> to vector<8x32xf32>
    %cst_142 = arith.constant dense<0.000000e+00> : vector<8x32xf32>
    %405 = tpu.matmul %403, %404, %cst_142 {dimension_numbers = #tpu.dot_dimension_numbers<[1], [0], [0], [1], [0, 0, 1, 1], [], []>} : vector<8x8xf32>, vector<8x32xf32>, vector<8x32xf32> -> vector<8x32xf32>
    %406 = arith.addf %382, %405 : vector<8x32xf32>
    %407 = vector.extract_strided_slice %330 {offsets = [0, 24], sizes = [8, 8], strides = [1, 1]} : vector<16x32xf32> to vector<8x8xf32>
    %408 = vector.extract_strided_slice %331 {offsets = [0, 24], sizes = [8, 8], strides = [1, 1]} : vector<16x32xf32> to vector<8x8xf32>
    %409 = vector.extract_strided_slice %332 {offsets = [0, 24], sizes = [8, 8], strides = [1, 1]} : vector<16x32xf32> to vector<8x8xf32>
    %cst_143 = arith.constant dense<0.000000e+00> : vector<8x8xf32>
    %410 = tpu.matmul %407, %408, %cst_143 {dimension_numbers = #tpu.dot_dimension_numbers<[1], [1], [0], [0], [0, 0, 1, 0], [], []>} : vector<8x8xf32>, vector<8x8xf32>, vector<8x8xf32> -> vector<8x8xf32>
    %411 = vector.broadcast %1 : f32 to vector<8x8xf32>
    %412 = arith.mulf %410, %411 : vector<8x8xf32>
    %cst_144 = arith.constant -1.000000e+09 : f32
    %413 = vector.broadcast %cst_144 : f32 to vector<8x8xf32>
    %414 = arith.select %6, %412, %413 : vector<8x8xi1>, vector<8x8xf32>
    %415 = vector.broadcast %335 : vector<1x8xf32> to vector<8x8xf32>
    %416 = arith.addf %414, %415 : vector<8x8xf32>
    %cst_145 = arith.constant dense<0xFF800000> : vector<8xf32>
    %417 = vector.multi_reduction <maximumf>, %416, %cst_145 [1] : vector<8x8xf32> to vector<8xf32>
    %418 = vector.shape_cast %417 : vector<8xf32> to vector<8x1xf32>
    %419 = vector.broadcast %418 : vector<8x1xf32> to vector<8x8xf32>
    %420 = arith.subf %416, %419 : vector<8x8xf32>
    %421 = math.exp %420 : vector<8x8xf32>
    %cst_146 = arith.constant dense<0.000000e+00> : vector<8xf32>
    %422 = vector.multi_reduction <add>, %421, %cst_146 [1] : vector<8x8xf32> to vector<8xf32>
    %423 = vector.shape_cast %422 : vector<8xf32> to vector<8x1xf32>
    %424 = tpu.reciprocal %423 : vector<8x1xf32> -> vector<8x1xf32>
    %425 = vector.broadcast %424 : vector<8x1xf32> to vector<8x8xf32>
    %426 = arith.mulf %421, %425 : vector<8x8xf32>
    %cst_147 = arith.constant dense<0.000000e+00> : vector<8x8xf32>
    %427 = tpu.matmul %426, %409, %cst_147 {dimension_numbers = #tpu.dot_dimension_numbers<[1], [0], [0], [1], [0, 0, 1, 1], [], []>} : vector<8x8xf32>, vector<8x8xf32>, vector<8x8xf32> -> vector<8x8xf32>
    %428 = vector.extract_strided_slice %334 {offsets = [24, 0], sizes = [8, 32], strides = [1, 1]} : vector<32x32xf32> to vector<8x32xf32>
    %cst_148 = arith.constant dense<0.000000e+00> : vector<8x32xf32>
    %429 = tpu.matmul %427, %428, %cst_148 {dimension_numbers = #tpu.dot_dimension_numbers<[1], [0], [0], [1], [0, 0, 1, 1], [], []>} : vector<8x8xf32>, vector<8x32xf32>, vector<8x32xf32> -> vector<8x32xf32>
    %430 = arith.addf %406, %429 : vector<8x32xf32>
    %431 = vector.extract_strided_slice %3 {offsets = [1, 0], sizes = [1, 8], strides = [1, 1]} : vector<2x8xf32> to vector<1x8xf32>
    %432 = vector.extract_strided_slice %330 {offsets = [8, 0], sizes = [8, 8], strides = [1, 1]} : vector<16x32xf32> to vector<8x8xf32>
    %433 = vector.extract_strided_slice %331 {offsets = [8, 0], sizes = [8, 8], strides = [1, 1]} : vector<16x32xf32> to vector<8x8xf32>
    %434 = vector.extract_strided_slice %332 {offsets = [8, 0], sizes = [8, 8], strides = [1, 1]} : vector<16x32xf32> to vector<8x8xf32>
    %cst_149 = arith.constant dense<0.000000e+00> : vector<8x8xf32>
    %435 = tpu.matmul %432, %433, %cst_149 {dimension_numbers = #tpu.dot_dimension_numbers<[1], [1], [0], [0], [0, 0, 1, 0], [], []>} : vector<8x8xf32>, vector<8x8xf32>, vector<8x8xf32> -> vector<8x8xf32>
    %436 = vector.broadcast %1 : f32 to vector<8x8xf32>
    %437 = arith.mulf %435, %436 : vector<8x8xf32>
    %cst_150 = arith.constant -1.000000e+09 : f32
    %438 = vector.broadcast %cst_150 : f32 to vector<8x8xf32>
    %439 = arith.select %6, %437, %438 : vector<8x8xi1>, vector<8x8xf32>
    %440 = vector.broadcast %431 : vector<1x8xf32> to vector<8x8xf32>
    %441 = arith.addf %439, %440 : vector<8x8xf32>
    %cst_151 = arith.constant dense<0xFF800000> : vector<8xf32>
    %442 = vector.multi_reduction <maximumf>, %441, %cst_151 [1] : vector<8x8xf32> to vector<8xf32>
    %443 = vector.shape_cast %442 : vector<8xf32> to vector<8x1xf32>
    %444 = vector.broadcast %443 : vector<8x1xf32> to vector<8x8xf32>
    %445 = arith.subf %441, %444 : vector<8x8xf32>
    %446 = math.exp %445 : vector<8x8xf32>
    %cst_152 = arith.constant dense<0.000000e+00> : vector<8xf32>
    %447 = vector.multi_reduction <add>, %446, %cst_152 [1] : vector<8x8xf32> to vector<8xf32>
    %448 = vector.shape_cast %447 : vector<8xf32> to vector<8x1xf32>
    %449 = tpu.reciprocal %448 : vector<8x1xf32> -> vector<8x1xf32>
    %450 = vector.broadcast %449 : vector<8x1xf32> to vector<8x8xf32>
    %451 = arith.mulf %446, %450 : vector<8x8xf32>
    %cst_153 = arith.constant dense<0.000000e+00> : vector<8x8xf32>
    %452 = tpu.matmul %451, %434, %cst_153 {dimension_numbers = #tpu.dot_dimension_numbers<[1], [0], [0], [1], [0, 0, 1, 1], [], []>} : vector<8x8xf32>, vector<8x8xf32>, vector<8x8xf32> -> vector<8x8xf32>
    %453 = vector.extract_strided_slice %334 {offsets = [0, 0], sizes = [8, 32], strides = [1, 1]} : vector<32x32xf32> to vector<8x32xf32>
    %cst_154 = arith.constant dense<0.000000e+00> : vector<8x32xf32>
    %454 = tpu.matmul %452, %453, %cst_154 {dimension_numbers = #tpu.dot_dimension_numbers<[1], [0], [0], [1], [0, 0, 1, 1], [], []>} : vector<8x8xf32>, vector<8x32xf32>, vector<8x32xf32> -> vector<8x32xf32>
    %455 = vector.extract_strided_slice %330 {offsets = [8, 8], sizes = [8, 8], strides = [1, 1]} : vector<16x32xf32> to vector<8x8xf32>
    %456 = vector.extract_strided_slice %331 {offsets = [8, 8], sizes = [8, 8], strides = [1, 1]} : vector<16x32xf32> to vector<8x8xf32>
    %457 = vector.extract_strided_slice %332 {offsets = [8, 8], sizes = [8, 8], strides = [1, 1]} : vector<16x32xf32> to vector<8x8xf32>
    %cst_155 = arith.constant dense<0.000000e+00> : vector<8x8xf32>
    %458 = tpu.matmul %455, %456, %cst_155 {dimension_numbers = #tpu.dot_dimension_numbers<[1], [1], [0], [0], [0, 0, 1, 0], [], []>} : vector<8x8xf32>, vector<8x8xf32>, vector<8x8xf32> -> vector<8x8xf32>
    %459 = vector.broadcast %1 : f32 to vector<8x8xf32>
    %460 = arith.mulf %458, %459 : vector<8x8xf32>
    %cst_156 = arith.constant -1.000000e+09 : f32
    %461 = vector.broadcast %cst_156 : f32 to vector<8x8xf32>
    %462 = arith.select %6, %460, %461 : vector<8x8xi1>, vector<8x8xf32>
    %463 = vector.broadcast %431 : vector<1x8xf32> to vector<8x8xf32>
    %464 = arith.addf %462, %463 : vector<8x8xf32>
    %cst_157 = arith.constant dense<0xFF800000> : vector<8xf32>
    %465 = vector.multi_reduction <maximumf>, %464, %cst_157 [1] : vector<8x8xf32> to vector<8xf32>
    %466 = vector.shape_cast %465 : vector<8xf32> to vector<8x1xf32>
    %467 = vector.broadcast %466 : vector<8x1xf32> to vector<8x8xf32>
    %468 = arith.subf %464, %467 : vector<8x8xf32>
    %469 = math.exp %468 : vector<8x8xf32>
    %cst_158 = arith.constant dense<0.000000e+00> : vector<8xf32>
    %470 = vector.multi_reduction <add>, %469, %cst_158 [1] : vector<8x8xf32> to vector<8xf32>
    %471 = vector.shape_cast %470 : vector<8xf32> to vector<8x1xf32>
    %472 = tpu.reciprocal %471 : vector<8x1xf32> -> vector<8x1xf32>
    %473 = vector.broadcast %472 : vector<8x1xf32> to vector<8x8xf32>
    %474 = arith.mulf %469, %473 : vector<8x8xf32>
    %cst_159 = arith.constant dense<0.000000e+00> : vector<8x8xf32>
    %475 = tpu.matmul %474, %457, %cst_159 {dimension_numbers = #tpu.dot_dimension_numbers<[1], [0], [0], [1], [0, 0, 1, 1], [], []>} : vector<8x8xf32>, vector<8x8xf32>, vector<8x8xf32> -> vector<8x8xf32>
    %476 = vector.extract_strided_slice %334 {offsets = [8, 0], sizes = [8, 32], strides = [1, 1]} : vector<32x32xf32> to vector<8x32xf32>
    %cst_160 = arith.constant dense<0.000000e+00> : vector<8x32xf32>
    %477 = tpu.matmul %475, %476, %cst_160 {dimension_numbers = #tpu.dot_dimension_numbers<[1], [0], [0], [1], [0, 0, 1, 1], [], []>} : vector<8x8xf32>, vector<8x32xf32>, vector<8x32xf32> -> vector<8x32xf32>
    %478 = arith.addf %454, %477 : vector<8x32xf32>
    %479 = vector.extract_strided_slice %330 {offsets = [8, 16], sizes = [8, 8], strides = [1, 1]} : vector<16x32xf32> to vector<8x8xf32>
    %480 = vector.extract_strided_slice %331 {offsets = [8, 16], sizes = [8, 8], strides = [1, 1]} : vector<16x32xf32> to vector<8x8xf32>
    %481 = vector.extract_strided_slice %332 {offsets = [8, 16], sizes = [8, 8], strides = [1, 1]} : vector<16x32xf32> to vector<8x8xf32>
    %cst_161 = arith.constant dense<0.000000e+00> : vector<8x8xf32>
    %482 = tpu.matmul %479, %480, %cst_161 {dimension_numbers = #tpu.dot_dimension_numbers<[1], [1], [0], [0], [0, 0, 1, 0], [], []>} : vector<8x8xf32>, vector<8x8xf32>, vector<8x8xf32> -> vector<8x8xf32>
    %483 = vector.broadcast %1 : f32 to vector<8x8xf32>
    %484 = arith.mulf %482, %483 : vector<8x8xf32>
    %cst_162 = arith.constant -1.000000e+09 : f32
    %485 = vector.broadcast %cst_162 : f32 to vector<8x8xf32>
    %486 = arith.select %6, %484, %485 : vector<8x8xi1>, vector<8x8xf32>
    %487 = vector.broadcast %431 : vector<1x8xf32> to vector<8x8xf32>
    %488 = arith.addf %486, %487 : vector<8x8xf32>
    %cst_163 = arith.constant dense<0xFF800000> : vector<8xf32>
    %489 = vector.multi_reduction <maximumf>, %488, %cst_163 [1] : vector<8x8xf32> to vector<8xf32>
    %490 = vector.shape_cast %489 : vector<8xf32> to vector<8x1xf32>
    %491 = vector.broadcast %490 : vector<8x1xf32> to vector<8x8xf32>
    %492 = arith.subf %488, %491 : vector<8x8xf32>
    %493 = math.exp %492 : vector<8x8xf32>
    %cst_164 = arith.constant dense<0.000000e+00> : vector<8xf32>
    %494 = vector.multi_reduction <add>, %493, %cst_164 [1] : vector<8x8xf32> to vector<8xf32>
    %495 = vector.shape_cast %494 : vector<8xf32> to vector<8x1xf32>
    %496 = tpu.reciprocal %495 : vector<8x1xf32> -> vector<8x1xf32>
    %497 = vector.broadcast %496 : vector<8x1xf32> to vector<8x8xf32>
    %498 = arith.mulf %493, %497 : vector<8x8xf32>
    %cst_165 = arith.constant dense<0.000000e+00> : vector<8x8xf32>
    %499 = tpu.matmul %498, %481, %cst_165 {dimension_numbers = #tpu.dot_dimension_numbers<[1], [0], [0], [1], [0, 0, 1, 1], [], []>} : vector<8x8xf32>, vector<8x8xf32>, vector<8x8xf32> -> vector<8x8xf32>
    %500 = vector.extract_strided_slice %334 {offsets = [16, 0], sizes = [8, 32], strides = [1, 1]} : vector<32x32xf32> to vector<8x32xf32>
    %cst_166 = arith.constant dense<0.000000e+00> : vector<8x32xf32>
    %501 = tpu.matmul %499, %500, %cst_166 {dimension_numbers = #tpu.dot_dimension_numbers<[1], [0], [0], [1], [0, 0, 1, 1], [], []>} : vector<8x8xf32>, vector<8x32xf32>, vector<8x32xf32> -> vector<8x32xf32>
    %502 = arith.addf %478, %501 : vector<8x32xf32>
    %503 = vector.extract_strided_slice %330 {offsets = [8, 24], sizes = [8, 8], strides = [1, 1]} : vector<16x32xf32> to vector<8x8xf32>
    %504 = vector.extract_strided_slice %331 {offsets = [8, 24], sizes = [8, 8], strides = [1, 1]} : vector<16x32xf32> to vector<8x8xf32>
    %505 = vector.extract_strided_slice %332 {offsets = [8, 24], sizes = [8, 8], strides = [1, 1]} : vector<16x32xf32> to vector<8x8xf32>
    %cst_167 = arith.constant dense<0.000000e+00> : vector<8x8xf32>
    %506 = tpu.matmul %503, %504, %cst_167 {dimension_numbers = #tpu.dot_dimension_numbers<[1], [1], [0], [0], [0, 0, 1, 0], [], []>} : vector<8x8xf32>, vector<8x8xf32>, vector<8x8xf32> -> vector<8x8xf32>
    %507 = vector.broadcast %1 : f32 to vector<8x8xf32>
    %508 = arith.mulf %506, %507 : vector<8x8xf32>
    %cst_168 = arith.constant -1.000000e+09 : f32
    %509 = vector.broadcast %cst_168 : f32 to vector<8x8xf32>
    %510 = arith.select %6, %508, %509 : vector<8x8xi1>, vector<8x8xf32>
    %511 = vector.broadcast %431 : vector<1x8xf32> to vector<8x8xf32>
    %512 = arith.addf %510, %511 : vector<8x8xf32>
    %cst_169 = arith.constant dense<0xFF800000> : vector<8xf32>
    %513 = vector.multi_reduction <maximumf>, %512, %cst_169 [1] : vector<8x8xf32> to vector<8xf32>
    %514 = vector.shape_cast %513 : vector<8xf32> to vector<8x1xf32>
    %515 = vector.broadcast %514 : vector<8x1xf32> to vector<8x8xf32>
    %516 = arith.subf %512, %515 : vector<8x8xf32>
    %517 = math.exp %516 : vector<8x8xf32>
    %cst_170 = arith.constant dense<0.000000e+00> : vector<8xf32>
    %518 = vector.multi_reduction <add>, %517, %cst_170 [1] : vector<8x8xf32> to vector<8xf32>
    %519 = vector.shape_cast %518 : vector<8xf32> to vector<8x1xf32>
    %520 = tpu.reciprocal %519 : vector<8x1xf32> -> vector<8x1xf32>
    %521 = vector.broadcast %520 : vector<8x1xf32> to vector<8x8xf32>
    %522 = arith.mulf %517, %521 : vector<8x8xf32>
    %cst_171 = arith.constant dense<0.000000e+00> : vector<8x8xf32>
    %523 = tpu.matmul %522, %505, %cst_171 {dimension_numbers = #tpu.dot_dimension_numbers<[1], [0], [0], [1], [0, 0, 1, 1], [], []>} : vector<8x8xf32>, vector<8x8xf32>, vector<8x8xf32> -> vector<8x8xf32>
    %524 = vector.extract_strided_slice %334 {offsets = [24, 0], sizes = [8, 32], strides = [1, 1]} : vector<32x32xf32> to vector<8x32xf32>
    %cst_172 = arith.constant dense<0.000000e+00> : vector<8x32xf32>
    %525 = tpu.matmul %523, %524, %cst_172 {dimension_numbers = #tpu.dot_dimension_numbers<[1], [0], [0], [1], [0, 0, 1, 1], [], []>} : vector<8x8xf32>, vector<8x32xf32>, vector<8x32xf32> -> vector<8x32xf32>
    %526 = arith.addf %502, %525 : vector<8x32xf32>
    %527 = tpu.concatenate %430, %526 in 0 : vector<8x32xf32>, vector<8x32xf32> -> vector<16x32xf32>
    %c1_173 = arith.constant 1 : index
    %c0_174 = arith.constant 0 : index
    %c0_175 = arith.constant 0 : index
    %528 = vector.load %arg9[%c1_173, %c0_174, %c0_175] : memref<2x1x32xf32, #tpu.memory_space<vmem>>, vector<1x1x32xf32>
    %529 = vector.shape_cast %528 : vector<1x1x32xf32> to vector<1x32xf32>
    %530 = vector.broadcast %529 : vector<1x32xf32> to vector<16x32xf32>
    %531 = arith.addf %527, %530 : vector<16x32xf32>
    %532 = arith.addf %296, %531 : vector<16x32xf32>
    %c1_176 = arith.constant 1 : index
    %c0_177 = arith.constant 0 : index
    %c0_178 = arith.constant 0 : index
    %533 = vector.load %arg10[%c1_176, %c0_177, %c0_178] : memref<2x1x32xf32, #tpu.memory_space<vmem>>, vector<1x1x32xf32>
    %534 = vector.shape_cast %533 : vector<1x1x32xf32> to vector<1x32xf32>
    %c1_179 = arith.constant 1 : index
    %c0_180 = arith.constant 0 : index
    %c0_181 = arith.constant 0 : index
    %535 = vector.load %arg11[%c1_179, %c0_180, %c0_181] : memref<2x1x32xf32, #tpu.memory_space<vmem>>, vector<1x1x32xf32>
    %536 = vector.shape_cast %535 : vector<1x1x32xf32> to vector<1x32xf32>
    %cst_182 = arith.constant dense<0.000000e+00> : vector<16xf32>
    %537 = vector.multi_reduction <add>, %532, %cst_182 [1] : vector<16x32xf32> to vector<16xf32>
    %538 = vector.shape_cast %537 : vector<16xf32> to vector<16x1xf32>
    %cst_183 = arith.constant 3.200000e+01 : f32
    %539 = vector.broadcast %cst_183 : f32 to vector<16x1xf32>
    %540 = arith.divf %538, %539 : vector<16x1xf32>
    %541 = vector.broadcast %540 : vector<16x1xf32> to vector<16x32xf32>
    %542 = arith.subf %532, %541 : vector<16x32xf32>
    %543 = arith.mulf %542, %542 : vector<16x32xf32>
    %cst_184 = arith.constant dense<0.000000e+00> : vector<16xf32>
    %544 = vector.multi_reduction <add>, %543, %cst_184 [1] : vector<16x32xf32> to vector<16xf32>
    %545 = vector.shape_cast %544 : vector<16xf32> to vector<16x1xf32>
    %cst_185 = arith.constant 3.200000e+01 : f32
    %546 = vector.broadcast %cst_185 : f32 to vector<16x1xf32>
    %547 = arith.divf %545, %546 : vector<16x1xf32>
    %548 = vector.broadcast %540 : vector<16x1xf32> to vector<16x32xf32>
    %549 = arith.subf %532, %548 : vector<16x32xf32>
    %cst_186 = arith.constant 9.99999974E-6 : f32
    %550 = vector.broadcast %cst_186 : f32 to vector<16x1xf32>
    %551 = arith.addf %547, %550 : vector<16x1xf32>
    %552 = math.rsqrt %551 : vector<16x1xf32>
    %553 = vector.broadcast %552 : vector<16x1xf32> to vector<16x32xf32>
    %554 = arith.mulf %549, %553 : vector<16x32xf32>
    %555 = vector.broadcast %534 : vector<1x32xf32> to vector<16x32xf32>
    %556 = arith.mulf %554, %555 : vector<16x32xf32>
    %557 = vector.broadcast %536 : vector<1x32xf32> to vector<16x32xf32>
    %558 = arith.addf %556, %557 : vector<16x32xf32>
    %c1_187 = arith.constant 1 : index
    %c0_188 = arith.constant 0 : index
    %c0_189 = arith.constant 0 : index
    %559 = vector.load %arg12[%c1_187, %c0_188, %c0_189] : memref<2x32x128xf32, #tpu.memory_space<vmem>>, vector<1x32x128xf32>
    %560 = vector.shape_cast %559 : vector<1x32x128xf32> to vector<32x128xf32>
    %cst_190 = arith.constant dense<0.000000e+00> : vector<16x128xf32>
    %561 = tpu.matmul %558, %560, %cst_190 {dimension_numbers = #tpu.dot_dimension_numbers<[1], [0], [0], [1], [0, 0, 1, 1], [], []>} : vector<16x32xf32>, vector<32x128xf32>, vector<16x128xf32> -> vector<16x128xf32>
    %c1_191 = arith.constant 1 : index
    %c0_192 = arith.constant 0 : index
    %c0_193 = arith.constant 0 : index
    %562 = vector.load %arg13[%c1_191, %c0_192, %c0_193] : memref<2x1x128xf32, #tpu.memory_space<vmem>>, vector<1x1x128xf32>
    %563 = vector.shape_cast %562 : vector<1x1x128xf32> to vector<1x128xf32>
    %564 = vector.broadcast %563 : vector<1x128xf32> to vector<16x128xf32>
    %565 = arith.addf %561, %564 : vector<16x128xf32>
    %cst_194 = arith.constant 5.000000e-01 : f32
    %566 = vector.broadcast %cst_194 : f32 to vector<16x128xf32>
    %567 = arith.mulf %566, %565 : vector<16x128xf32>
    %cst_195 = arith.constant 4.471500e-02 : f32
    %568 = vector.broadcast %cst_195 : f32 to vector<16x128xf32>
    %569 = arith.mulf %568, %565 : vector<16x128xf32>
    %570 = arith.mulf %569, %565 : vector<16x128xf32>
    %571 = arith.mulf %570, %565 : vector<16x128xf32>
    %572 = arith.addf %565, %571 : vector<16x128xf32>
    %cst_196 = arith.constant 0.797884583 : f32
    %573 = vector.broadcast %cst_196 : f32 to vector<16x128xf32>
    %574 = arith.mulf %573, %572 : vector<16x128xf32>
    %575 = math.tanh %574 : vector<16x128xf32>
    %cst_197 = arith.constant 1.000000e+00 : f32
    %576 = vector.broadcast %cst_197 : f32 to vector<16x128xf32>
    %577 = arith.addf %576, %575 : vector<16x128xf32>
    %578 = arith.mulf %567, %577 : vector<16x128xf32>
    %c1_198 = arith.constant 1 : index
    %c0_199 = arith.constant 0 : index
    %c0_200 = arith.constant 0 : index
    %579 = vector.load %arg14[%c1_198, %c0_199, %c0_200] : memref<2x128x32xf32, #tpu.memory_space<vmem>>, vector<1x128x32xf32>
    %580 = vector.shape_cast %579 : vector<1x128x32xf32> to vector<128x32xf32>
    %cst_201 = arith.constant dense<0.000000e+00> : vector<16x32xf32>
    %581 = tpu.matmul %578, %580, %cst_201 {dimension_numbers = #tpu.dot_dimension_numbers<[1], [0], [0], [1], [0, 0, 1, 1], [], []>} : vector<16x128xf32>, vector<128x32xf32>, vector<16x32xf32> -> vector<16x32xf32>
    %c1_202 = arith.constant 1 : index
    %c0_203 = arith.constant 0 : index
    %c0_204 = arith.constant 0 : index
    %582 = vector.load %arg15[%c1_202, %c0_203, %c0_204] : memref<2x1x32xf32, #tpu.memory_space<vmem>>, vector<1x1x32xf32>
    %583 = vector.shape_cast %582 : vector<1x1x32xf32> to vector<1x32xf32>
    %584 = vector.broadcast %583 : vector<1x32xf32> to vector<16x32xf32>
    %585 = arith.addf %581, %584 : vector<16x32xf32>
    %586 = arith.addf %532, %585 : vector<16x32xf32>
    %c0_205 = arith.constant 0 : index
    %c0_206 = arith.constant 0 : index
    %587 = vector.load %arg16[%c0_205, %c0_206] : memref<1x32xf32, #tpu.memory_space<vmem>>, vector<1x32xf32>
    %c0_207 = arith.constant 0 : index
    %c0_208 = arith.constant 0 : index
    %588 = vector.load %arg17[%c0_207, %c0_208] : memref<1x32xf32, #tpu.memory_space<vmem>>, vector<1x32xf32>
    %cst_209 = arith.constant dense<0.000000e+00> : vector<16xf32>
    %589 = vector.multi_reduction <add>, %586, %cst_209 [1] : vector<16x32xf32> to vector<16xf32>
    %590 = vector.shape_cast %589 : vector<16xf32> to vector<16x1xf32>
    %cst_210 = arith.constant 3.200000e+01 : f32
    %591 = vector.broadcast %cst_210 : f32 to vector<16x1xf32>
    %592 = arith.divf %590, %591 : vector<16x1xf32>
    %593 = vector.broadcast %592 : vector<16x1xf32> to vector<16x32xf32>
    %594 = arith.subf %586, %593 : vector<16x32xf32>
    %595 = arith.mulf %594, %594 : vector<16x32xf32>
    %cst_211 = arith.constant dense<0.000000e+00> : vector<16xf32>
    %596 = vector.multi_reduction <add>, %595, %cst_211 [1] : vector<16x32xf32> to vector<16xf32>
    %597 = vector.shape_cast %596 : vector<16xf32> to vector<16x1xf32>
    %cst_212 = arith.constant 3.200000e+01 : f32
    %598 = vector.broadcast %cst_212 : f32 to vector<16x1xf32>
    %599 = arith.divf %597, %598 : vector<16x1xf32>
    %600 = vector.broadcast %592 : vector<16x1xf32> to vector<16x32xf32>
    %601 = arith.subf %586, %600 : vector<16x32xf32>
    %cst_213 = arith.constant 9.99999974E-6 : f32
    %602 = vector.broadcast %cst_213 : f32 to vector<16x1xf32>
    %603 = arith.addf %599, %602 : vector<16x1xf32>
    %604 = math.rsqrt %603 : vector<16x1xf32>
    %605 = vector.broadcast %604 : vector<16x1xf32> to vector<16x32xf32>
    %606 = arith.mulf %601, %605 : vector<16x32xf32>
    %607 = vector.broadcast %587 : vector<1x32xf32> to vector<16x32xf32>
    %608 = arith.mulf %606, %607 : vector<16x32xf32>
    %609 = vector.broadcast %588 : vector<1x32xf32> to vector<16x32xf32>
    %610 = arith.addf %608, %609 : vector<16x32xf32>
    %611 = tpu.iota {dimensions = array<i32: 0>} : vector<16x1xi32>
    %c0_214 = arith.constant 0 : index
    %612 = memref.load %arg1[%c0_214] : memref<2xi32, #tpu.memory_space<smem>>
    %c0_i32 = arith.constant 0 : i32
    %613 = arith.addi %c0_i32, %612 : i32
    %614 = vector.broadcast %613 : i32 to vector<16x1xi32>
    %615 = arith.cmpi eq, %611, %614 : vector<16x1xi32>
    %616 = arith.extui %615 : vector<16x1xi1> to vector<16x1xi32>
    %617 = arith.sitofp %616 : vector<16x1xi32> to vector<16x1xf32>
    %618 = vector.broadcast %617 : vector<16x1xf32> to vector<16x32xf32>
    %619 = arith.mulf %610, %618 : vector<16x32xf32>
    %cst_215 = arith.constant dense<0.000000e+00> : vector<32xf32>
    %620 = vector.multi_reduction <add>, %619, %cst_215 [0] : vector<16x32xf32> to vector<32xf32>
    %621 = vector.shape_cast %620 : vector<32xf32> to vector<1x32xf32>
    %c1_216 = arith.constant 1 : index
    %622 = memref.load %arg1[%c1_216] : memref<2xi32, #tpu.memory_space<smem>>
    %c8_i32 = arith.constant 8 : i32
    %623 = arith.addi %c8_i32, %622 : i32
    %624 = vector.broadcast %623 : i32 to vector<16x1xi32>
    %625 = arith.cmpi eq, %611, %624 : vector<16x1xi32>
    %626 = arith.extui %625 : vector<16x1xi1> to vector<16x1xi32>
    %627 = arith.sitofp %626 : vector<16x1xi32> to vector<16x1xf32>
    %628 = vector.broadcast %627 : vector<16x1xf32> to vector<16x32xf32>
    %629 = arith.mulf %610, %628 : vector<16x32xf32>
    %cst_217 = arith.constant dense<0.000000e+00> : vector<32xf32>
    %630 = vector.multi_reduction <add>, %629, %cst_217 [0] : vector<16x32xf32> to vector<32xf32>
    %631 = vector.shape_cast %630 : vector<32xf32> to vector<1x32xf32>
    %632 = tpu.concatenate %621, %631 in 0 : vector<1x32xf32>, vector<1x32xf32> -> vector<2x32xf32>
    %c0_218 = arith.constant 0 : index
    %c0_219 = arith.constant 0 : index
    %633 = vector.load %arg18[%c0_218, %c0_219] : memref<1x32xf32, #tpu.memory_space<vmem>>, vector<1x32xf32>
    %634 = vector.broadcast %633 : vector<1x32xf32> to vector<2x32xf32>
    %635 = arith.mulf %632, %634 : vector<2x32xf32>
    %cst_220 = arith.constant dense<0.000000e+00> : vector<2xf32>
    %636 = vector.multi_reduction <add>, %635, %cst_220 [1] : vector<2x32xf32> to vector<2xf32>
    %637 = vector.shape_cast %636 : vector<2xf32> to vector<2x1xf32>
    %c0_221 = arith.constant 0 : index
    %c0_222 = arith.constant 0 : index
    %638 = vector.load %arg19[%c0_221, %c0_222] : memref<1x1xf32, #tpu.memory_space<vmem>>, vector<1x1xf32>
    %639 = vector.broadcast %638 : vector<1x1xf32> to vector<2x1xf32>
    %640 = arith.addf %637, %639 : vector<2x1xf32>
    %641 = arith.negf %640 : vector<2x1xf32>
    %642 = math.exp %641 : vector<2x1xf32>
    %cst_223 = arith.constant 1.000000e+00 : f32
    %643 = vector.broadcast %cst_223 : f32 to vector<2x1xf32>
    %644 = arith.addf %643, %642 : vector<2x1xf32>
    %645 = arith.divf %643, %644 : vector<2x1xf32>
    %646 = tpu.iota {dimensions = array<i32: 1>} : vector<2x128xi32>
    %c0_i32_224 = arith.constant 0 : i32
    %647 = vector.broadcast %c0_i32_224 : i32 to vector<2x128xi32>
    %648 = arith.cmpi eq, %646, %647 : vector<2x128xi32>
    %c1_i32 = arith.constant 1 : i32
    %649 = vector.broadcast %c1_i32 : i32 to vector<2x128xi32>
    %650 = arith.cmpi eq, %646, %649 : vector<2x128xi32>
    %cst_225 = arith.constant 0.000000e+00 : f32
    %651 = vector.shape_cast %645 : vector<2x1xf32> to vector<2x1xf32>
    %652 = vector.broadcast %651 : vector<2x1xf32> to vector<2x128xf32>
    %653 = vector.broadcast %cst_225 : f32 to vector<2x128xf32>
    %654 = arith.select %650, %652, %653 : vector<2x128xi1>, vector<2x128xf32>
    %655 = vector.shape_cast %640 : vector<2x1xf32> to vector<2x1xf32>
    %656 = vector.broadcast %655 : vector<2x1xf32> to vector<2x128xf32>
    %657 = arith.select %648, %656, %654 : vector<2x128xi1>, vector<2x128xf32>
    %c0_226 = arith.constant 0 : index
    %c0_227 = arith.constant 0 : index
    %658 = vector.load %arg20[%c0_226, %c0_227] : memref<2x128xf32, #tpu.memory_space<vmem>>, vector<2x128xf32>
    tpu.vector_store %arg20[%c0_226, %c0_227], %657 {strides = array<i32>} : memref<2x128xf32, #tpu.memory_space<vmem>>, vector<2x128xf32>,
    return
  }
  func.func @transform_0(%arg0: i32, %arg1: memref<2xi32, #tpu.memory_space<smem>>) -> (i32, i32) {
    %c0_i32 = arith.constant 0 : i32
    %c0_i32_0 = arith.constant 0 : i32
    %c0_i32_1 = arith.constant 0 : i32
    return %c0_i32, %c0_i32_0 : i32, i32
  }
  func.func @transform_1(%arg0: i32, %arg1: memref<2xi32, #tpu.memory_space<smem>>) -> (i32, i32) {
    %c0_i32 = arith.constant 0 : i32
    %c0_i32_0 = arith.constant 0 : i32
    %c0_i32_1 = arith.constant 0 : i32
    return %c0_i32, %c0_i32_0 : i32, i32
  }
  func.func @transform_2(%arg0: i32, %arg1: memref<2xi32, #tpu.memory_space<smem>>) -> (i32, i32, i32) {
    %c0_i32 = arith.constant 0 : i32
    %c0_i32_0 = arith.constant 0 : i32
    %c0_i32_1 = arith.constant 0 : i32
    %c0_i32_2 = arith.constant 0 : i32
    return %c0_i32, %c0_i32_0, %c0_i32_1 : i32, i32, i32
  }
  func.func @transform_3(%arg0: i32, %arg1: memref<2xi32, #tpu.memory_space<smem>>) -> (i32, i32, i32) {
    %c0_i32 = arith.constant 0 : i32
    %c0_i32_0 = arith.constant 0 : i32
    %c0_i32_1 = arith.constant 0 : i32
    %c0_i32_2 = arith.constant 0 : i32
    return %c0_i32, %c0_i32_0, %c0_i32_1 : i32, i32, i32
  }
  func.func @transform_4(%arg0: i32, %arg1: memref<2xi32, #tpu.memory_space<smem>>) -> (i32, i32, i32) {
    %c0_i32 = arith.constant 0 : i32
    %c0_i32_0 = arith.constant 0 : i32
    %c0_i32_1 = arith.constant 0 : i32
    %c0_i32_2 = arith.constant 0 : i32
    return %c0_i32, %c0_i32_0, %c0_i32_1 : i32, i32, i32
  }
  func.func @transform_5(%arg0: i32, %arg1: memref<2xi32, #tpu.memory_space<smem>>) -> (i32, i32, i32) {
    %c0_i32 = arith.constant 0 : i32
    %c0_i32_0 = arith.constant 0 : i32
    %c0_i32_1 = arith.constant 0 : i32
    %c0_i32_2 = arith.constant 0 : i32
    return %c0_i32, %c0_i32_0, %c0_i32_1 : i32, i32, i32
  }
  func.func @transform_6(%arg0: i32, %arg1: memref<2xi32, #tpu.memory_space<smem>>) -> (i32, i32, i32) {
    %c0_i32 = arith.constant 0 : i32
    %c0_i32_0 = arith.constant 0 : i32
    %c0_i32_1 = arith.constant 0 : i32
    %c0_i32_2 = arith.constant 0 : i32
    return %c0_i32, %c0_i32_0, %c0_i32_1 : i32, i32, i32
  }
  func.func @transform_7(%arg0: i32, %arg1: memref<2xi32, #tpu.memory_space<smem>>) -> (i32, i32, i32) {
    %c0_i32 = arith.constant 0 : i32
    %c0_i32_0 = arith.constant 0 : i32
    %c0_i32_1 = arith.constant 0 : i32
    %c0_i32_2 = arith.constant 0 : i32
    return %c0_i32, %c0_i32_0, %c0_i32_1 : i32, i32, i32
  }
  func.func @transform_8(%arg0: i32, %arg1: memref<2xi32, #tpu.memory_space<smem>>) -> (i32, i32, i32) {
    %c0_i32 = arith.constant 0 : i32
    %c0_i32_0 = arith.constant 0 : i32
    %c0_i32_1 = arith.constant 0 : i32
    %c0_i32_2 = arith.constant 0 : i32
    return %c0_i32, %c0_i32_0, %c0_i32_1 : i32, i32, i32
  }
  func.func @transform_9(%arg0: i32, %arg1: memref<2xi32, #tpu.memory_space<smem>>) -> (i32, i32, i32) {
    %c0_i32 = arith.constant 0 : i32
    %c0_i32_0 = arith.constant 0 : i32
    %c0_i32_1 = arith.constant 0 : i32
    %c0_i32_2 = arith.constant 0 : i32
    return %c0_i32, %c0_i32_0, %c0_i32_1 : i32, i32, i32
  }
  func.func @transform_10(%arg0: i32, %arg1: memref<2xi32, #tpu.memory_space<smem>>) -> (i32, i32, i32) {
    %c0_i32 = arith.constant 0 : i32
    %c0_i32_0 = arith.constant 0 : i32
    %c0_i32_1 = arith.constant 0 : i32
    %c0_i32_2 = arith.constant 0 : i32
    return %c0_i32, %c0_i32_0, %c0_i32_1 : i32, i32, i32
  }
  func.func @transform_11(%arg0: i32, %arg1: memref<2xi32, #tpu.memory_space<smem>>) -> (i32, i32, i32) {
    %c0_i32 = arith.constant 0 : i32
    %c0_i32_0 = arith.constant 0 : i32
    %c0_i32_1 = arith.constant 0 : i32
    %c0_i32_2 = arith.constant 0 : i32
    return %c0_i32, %c0_i32_0, %c0_i32_1 : i32, i32, i32
  }
  func.func @transform_12(%arg0: i32, %arg1: memref<2xi32, #tpu.memory_space<smem>>) -> (i32, i32, i32) {
    %c0_i32 = arith.constant 0 : i32
    %c0_i32_0 = arith.constant 0 : i32
    %c0_i32_1 = arith.constant 0 : i32
    %c0_i32_2 = arith.constant 0 : i32
    return %c0_i32, %c0_i32_0, %c0_i32_1 : i32, i32, i32
  }
  func.func @transform_13(%arg0: i32, %arg1: memref<2xi32, #tpu.memory_space<smem>>) -> (i32, i32, i32) {
    %c0_i32 = arith.constant 0 : i32
    %c0_i32_0 = arith.constant 0 : i32
    %c0_i32_1 = arith.constant 0 : i32
    %c0_i32_2 = arith.constant 0 : i32
    return %c0_i32, %c0_i32_0, %c0_i32_1 : i32, i32, i32
  }
  func.func @transform_14(%arg0: i32, %arg1: memref<2xi32, #tpu.memory_space<smem>>) -> (i32, i32) {
    %c0_i32 = arith.constant 0 : i32
    %c0_i32_0 = arith.constant 0 : i32
    %c0_i32_1 = arith.constant 0 : i32
    return %c0_i32, %c0_i32_0 : i32, i32
  }
  func.func @transform_15(%arg0: i32, %arg1: memref<2xi32, #tpu.memory_space<smem>>) -> (i32, i32) {
    %c0_i32 = arith.constant 0 : i32
    %c0_i32_0 = arith.constant 0 : i32
    %c0_i32_1 = arith.constant 0 : i32
    return %c0_i32, %c0_i32_0 : i32, i32
  }
  func.func @transform_16(%arg0: i32, %arg1: memref<2xi32, #tpu.memory_space<smem>>) -> (i32, i32) {
    %c0_i32 = arith.constant 0 : i32
    %c0_i32_0 = arith.constant 0 : i32
    %c0_i32_1 = arith.constant 0 : i32
    return %c0_i32, %c0_i32_0 : i32, i32
  }
  func.func @transform_17(%arg0: i32, %arg1: memref<2xi32, #tpu.memory_space<smem>>) -> (i32, i32) {
    %c0_i32 = arith.constant 0 : i32
    %c0_i32_0 = arith.constant 0 : i32
    %c0_i32_1 = arith.constant 0 : i32
    return %c0_i32, %c0_i32_0 : i32, i32
  }
  func.func @transform_18(%arg0: i32, %arg1: memref<2xi32, #tpu.memory_space<smem>>) -> (i32, i32) {
    %c0_i32 = arith.constant 0 : i32
    %c0_i32_0 = arith.constant 0 : i32
    %c0_i32_1 = arith.constant 0 : i32
    return %c0_i32, %c0_i32_0 : i32, i32
  }
}

</mosaic_0001>

<bundles_post_ra>
// kernel: forward.1
= control target key start
LH: loop header
LB: loop body
LE: loop exit
PB: predicated region body
PF: predicated region fallthrough
CT: control target
= control target key end

     0   :  { %s6661_s0 = inlined_call_operand.vmem [shape: s32[2], index: 0, kind: input, shape index: {}]   ;;  %s6662_s1 = inlined_call_operand.vmem [shape: f32[16,32], index: 1, kind: input, shape index: {}]   ;;  %s6663_s2 = inlined_call_operand.vmem [shape: f32[2,8], index: 2, kind: input, shape index: {}]   ;;  %s6664_s3 = inlined_call_operand.vmem [shape: f32[2,1,32], index: 3, kind: input, shape index: {}]   ;;  %s6665_s4 = inlined_call_operand.vmem [shape: f32[2,1,32], index: 4, kind: input, shape index: {}]   ;;  %s6666_s5 = inlined_call_operand.vmem [shape: f32[2,32,96], index: 5, kind: input, shape index: {}]   ;;  %s6667_s6 = inlined_call_operand.vmem [shape: f32[2,1,96], index: 6, kind: input, shape index: {}]   ;;  %s6668_s7 = inlined_call_operand.vmem [shape: f32[2,32,32], index: 7, kind: input, shape index: {}]   ;;  %s6669_s8 = inlined_call_operand.vmem [shape: f32[2,1,32], index: 8, kind: input, shape index: {}]   ;;  %s6670_s9 = inlined_call_operand.vmem [shape: f32[2,1,32], index: 9, kind: input, shape index: {}]   ;;  %s6671_s10 = inlined_call_operand.vmem [shape: f32[2,1,32], index: 10, kind: input, shape index: {}]   ;;  %s6672_s11 = inlined_call_operand.vmem [shape: f32[2,32,128], index: 11, kind: input, shape index: {}]   ;;  %s6673_s12 = inlined_call_operand.vmem [shape: f32[2,1,128], index: 12, kind: input, shape index: {}]   ;;  %s6674_s13 = inlined_call_operand.vmem [shape: f32[2,128,32], index: 13, kind: input, shape index: {}]   ;;  %s6675_s14 = inlined_call_operand.vmem [shape: f32[2,1,32], index: 14, kind: input, shape index: {}]   ;;  %s6676_s15 = inlined_call_operand.vmem [shape: f32[1,32], index: 15, kind: input, shape index: {}]   ;;  %s6677_s16 = inlined_call_operand.vmem [shape: f32[1,32], index: 16, kind: input, shape index: {}]   ;;  %s6678_s17 = inlined_call_operand.vmem [shape: f32[1,32], index: 17, kind: input, shape index: {}]   ;;  %s6679_s19 = inlined_call_operand.vmem [shape: f32[2,128], index: 19, kind: output, shape index: {}]   ;;  %s6680_s18 = inlined_call_operand.<no memory space> [shape: f32[1,1], index: 18, kind: input, shape index: {}]  }
   0x1   :  { %6694 = sst [smem:[#allocation6_spill]] %s6661_s0  ;;  %v28_v0 = vstv %s6680_s18 }
   0x2   :  { %6695 = sst [smem:[#allocation7_spill]] %s6662_s1  ;;  %s6699_s20 = sld [smem:[#allocation6_spill]]  ;;  %29 = vst [vmem:[#allocation4] sm:$0x1] %v28_v0 }
   0x3   :  { %6696 = sst [smem:[#allocation8_spill]] %s6663_s2 }
   0x4   :  { %6697 = sst [smem:[#allocation9_spill]] %s6664_s3 }
   0x5   :  { %6698 = sst [smem:[#allocation10_spill]] %s6673_s12 }
   0x8   :  { %s24_s12 = sshll.u32 %s6699_s20, 4  ;;  %s25_s12 = int_to_ptr.vmem [resolvable:$true] %s24_s12 }
   0x9   :  { %s5753_s22 = scalar_lea.vmem %s25_s12, 16  ;;  %p5758_p1 = scmp.lt.s32.totalorder %s25_s12, %s25_s12 }
   0xa   :  { %p5754_p0 = scmp.ne.s32.totalorder %s25_s12, %s5753_s22  ;;  %p5759_p2 = scmp.lt.s32.totalorder %s5753_s22, %s5753_s22 }
   0xc   :  { %p5760_p3 = por %p5759_p2, %p5758_p1 }
   0xe   :  { %p5761_p4 = pnand %p5760_p3, %p5754_p0 }
  0x10   :  { %5764 = shalt.err (!%p5761_p4)  }
  0x11   :  { %s5767_s2 = smov [#allocation3]  }
  0x12   :  { %27 = dma.vmem_to_smem %s25_s12, 16, %s5767_s2, [#allocation2] }
  0x13   :  { %5765 = dma.done.wait [#allocation2], 16 }
  0x14   :  { %5766 = vsyncadd [#allocation2], 4294967280 }
  0x15   :  { %31 = sfence }
  0x16   :  { %s6700_s25 = sld [smem:[#allocation7_spill]]  ;;  %vm78_vm0 = vcmask 261120   ;;  %v122_v15 = vld [vmem:[%s6666_s5] sm:$0xff]  ;;  %v123_v16 = vld [vmem:[%s6666_s5 + $0x8] sm:$0xff]  ;;  %v124_v17 = vld [vmem:[%s6666_s5 + $0x10] sm:$0xff]  ;;  %s6701_s22 = sld [smem:[#allocation9_spill]]  ;;  %v71_v44 = vlaneseq }
  0x17   :  { %v5544_v18 = vpack.c.bf16 %v123_v16, %v122_v15  ;;  %v125_v19 = vld [vmem:[%s6666_s5 + $0x18] sm:$0xff]  ;;  %v4901_v30 = vld [vmem:[%s6665_s4] ss:$0 sm:$0xff]  ;;  %v5768_v37 = vmov 0.0   ;;  %vm5769_vm1 = vmmov 0   ;;  %s5770_s18 = smov 96  }
  0x18   :  { %v5548_v20 = vpack.c.bf16 %v125_v19, %v124_v17  ;;  %5226 = vmatprep.subr.mxu1 %v5768_v37  ;;  %5228 = vmatprep.mubr.msk.f32.mxu1 %vm5769_vm1, %v5768_v37  ;;  %v4902_v38 = vld [vmem:[%s6667_s6] ss:$0 sm:$0xff]  ;;  %s5771_s3 = smov 88   ;;  %vm221_vm2 = vcmask 64512   ;;  %v5949_v45 = vshrl.u32 %v71_v44, 7  ;;  %v5951_v46 = vand.u32 127, %v71_v44 }
  0x19   :  { %5545 = vmatprep.subr.bf16.mxu0 %v5544_v18  ;;  %s6702_s27 = sld [smem:[#allocation8_spill]]  ;;  %s5772_s28 = smov 64   ;;  %vm4853_vm8 = vcmask 1040384   ;;  %vm4863_vm9 = vcmask 254976  }
  0x1a   :  { %5547 = vmatpush3.bf16.msra.mxu0 %v5544_v18  ;;  %v300_v47 = vsub.s32 0, %v5949_v45  ;;  %vm5961_vm3 = vcmp.le.s32.totalorder %v5951_v46, %v5949_v45  ;;  %s5773_s29 = smov 120   ;;  %s5774_s20 = smov 56   ;;  %vm4882_vm10 = vcmp.eq.s32.totalorder %v5951_v46, 1  ;;  %vm4881_vm11 = vcmp.eq.s32.totalorder %v5951_v46, 0 }
  0x1b   :  { %5549 = vmatprep.subr.bf16.mxu0 %v5548_v20  ;;  %s6692_s21 = smov 112   ;;  %s5776_s1 = smov 80  }
  0x1c   :  { %v5891_v1 = vld [vmem:[%s6700_s25] sm:$0xff]  ;;  %v5896_v2 = vld [vmem:[%s6700_s25 + $0x8] sm:$0xff]  ;;  %s6688_s24 = smov 72   ;;  %s6686_s25 = smov 104  }
  0x1d   :  { %v79_v3 = vsel %vm78_vm0, %v5891_v1, 0.0  ;;  %v82_v4 = vsel %vm78_vm0, %v5896_v2, 0.0  ;;  %v4900_v28 = vld [vmem:[%s6701_s22] ss:$0 sm:$0xff]  ;;  %s6690_s12 = smov 48   ;;  %s6684_s0 = smov 40  }
  0x1e   :  { %80 = vadd.xlane.f32.xlu0 %v79_v3  ;;  %5551 = vmatpush3.bf16.msra.mxu0 %v5548_v20  ;;  %s6705_s2 = sld [smem:[#allocation10_spill]] }
  0x1f   :  { %5201 = vmatprep.subr.mxu0 %v5768_v37  ;;  %v5957_v48 = vld [vmem:[%s6702_s27] sm:$0x3]  ;;  %s6708_s27 = smov 72  }
  0x20   :  { %v5966_v51 = vrot.slane %v5957_v48, %v300_v47 }
  0x22   :  { %83 = vadd.xlane.f32.xlu0 %v82_v4 }
  0xab   :  { %v81_v5 = vpop.xlane.xlu0 %80 }
  0xac   :  { %v86_v6 = vmul.f32 0.03125, %v81_v5 }
  0xae   :  { %v88_v7 = vsub.f32 %v5891_v1, %v86_v6  ;;  %v5989_v6 = vld [vmem:[%s6668_s7] sm:$0xff] }
  0xaf   :  { %v84_v8 = vpop.xlane.xlu0 %83  ;;  %5227 = vmatpush3.msra.mxu1 %v5989_v6 }
  0xb0   :  { %v87_v9 = vmul.f32 0.03125, %v84_v8  ;;  %v90_v10 = vmul.f32 %v88_v7, %v88_v7  ;;  %5236 = vmatprep.subr.mxu1 %v5768_v37 }
  0xb2   :  { %v89_v11 = vsub.f32 %v5896_v2, %v87_v9  ;;  %v92_v12 = vsel %vm78_vm0, %v90_v10, 0.0 }
  0xb3   :  { %93 = vadd.xlane.f32.xlu1 %v92_v12 }
  0xb4   :  { %v91_v13 = vmul.f32 %v89_v11, %v89_v11 }
  0xb6   :  { %v95_v14 = vsel %vm78_vm0, %v91_v13, 0.0 }
  0xb7   :  { %96 = vadd.xlane.f32.xlu1 %v95_v14 }
 0x140   :  { %v94_v21 = vpop.xlane.xlu1 %93 }
 0x141   :  { %v98_v22 = vmul.f32 0.03125, %v94_v21 }
 0x143   :  { %v100_v23 = vadd.f32 1e-05, %v98_v22 }
 0x144   :  { %v97_v24 = vpop.xlane.xlu1 %96 }
 0x145   :  { %5657 = vrsqrt.f32 %v100_v23  ;;  %v99_v25 = vmul.f32 0.03125, %v97_v24 }
 0x147   :  { %v101_v26 = vadd.f32 1e-05, %v99_v25 }
 0x149   :  { %5659 = vrsqrt.f32 %v101_v26  ;;  %v6011_v26 = vld [vmem:[%s6668_s7 + $0x8] sm:$0xff] }
 0x14f   :  { %v5658_v27 = vpop.eup %5657 }
 0x150   :  { %v104_v29 = vmul.f32 %v5658_v27, %v88_v7 }
 0x152   :  { %v112_v31 = vmul.f32 %v4900_v28, %v104_v29 }
 0x153   :  { %v5660_v32 = vpop.eup %5659 }
 0x154   :  { %v105_v33 = vmul.f32 %v5660_v32, %v89_v11  ;;  %v120_v34 = vadd.f32 %v4901_v30, %v112_v31 }
 0x156   :  { %v113_v35 = vmul.f32 %v4900_v28, %v105_v33  ;;  %5198 = vmatprep.mubr.msk.f32.mxu0 %vm78_vm0, %v120_v34 }
 0x158   :  { %v121_v36 = vadd.f32 %v4901_v30, %v113_v35 }
 0x15a   :  { %5199 = vmatmul.mubr.msk.f32.vlgmr.msra.gmra.mrb[0].mxu0 %vm78_vm0, %v121_v36 }
 0x15b   :  { %5203 = vmatprep.mubr.msk.f32.mxu0 %vm5769_vm1, %v5768_v37 }
 0x22d   :  { %v5200_v39 = vpop.f32.mrb[0].mxu0 }
 0x22e   :  { %v5935_v40 = vadd.f32 %v5200_v39, %v4902_v38  ;;  %v205_v41 = vpop.f32.mrb[1].mxu0 }
 0x22f   :  { %v5937_v42 = vadd.f32 %v4902_v38, %v205_v41 }
 0x231   :  { %219 = vrot.lane.b32.xlu0 %v5937_v42, %s5770_s18 }
 0x235   :  { %392 = vrot.lane.b32.xlu0 %v5937_v42, %s5771_s3 }
 0x2a3   :  { %v220_v43 = vpop.permute.xlu0 %219 }
 0x2a4   :  { %5202 = vmatpush3.xpose.msk.msra.mxu0 %vm221_vm2, %v220_v43 }
 0x2a5   :  { %5206 = vmatprep.subr.mxu0 %v5768_v37 }
 0x2a7   :  { %5204 = vmatmul.mubr.msk.f32.vlgmr.msra.gmra.mrb[2].mxu0 %vm221_vm2, %v5937_v42  ;;  %v393_v4 = vpop.permute.xlu0 %392 }
 0x2a8   :  { %5208 = vmatprep.mubr.msk.f32.mxu0 %vm5769_vm1, %v5768_v37 }
 0x37a   :  { %v292_v50 = vpop.f32.mrb[2].mxu0 }
 0x37b   :  { %v296_v52 = vmul.f32 0.35355338, %v292_v50  ;;  %v5205_v53 = vpop.f32.mrb[3].mxu0 }
 0x37d   :  { %v297_v54 = vsel %vm5961_vm3, %v296_v52, -1e+09 }
 0x37e   :  { %v302_v55 = vadd.f32 %v5966_v51, %v297_v54 }
 0x380   :  { %v303_v56 = vsel %vm221_vm2, %v302_v55, -inf }
 0x381   :  { %304 = vmax.xlane.f32.xlu1 %v303_v56 }
 0x392   :  { %314 = vrot.lane.b32.xlu1 %v5937_v42, %s5772_s28 }
 0x40e   :  { %v305_v57 = vpop.xlane.xlu1 %304 }
 0x40f   :  { %v306_v58 = vsub.f32 %v302_v55, %v305_v57 }
 0x411   :  { %v307_v59 = vmul.f32 1.442695, %v306_v58 }
 0x412   :  { %v315_v60 = vpop.permute.xlu1 %314 }
 0x413   :  { %5661 = vpow2.f32 %v307_v59  ;;  %5207 = vmatpush3.msra.mxu0 %v315_v60  ;;  %v6053_v59 = vld [vmem:[%s6668_s7 + $0x10] sm:$0xff] }
 0x414   :  { %5211 = vmatprep.subr.mxu0 %v5768_v37 }
 0x41d   :  { %v5662_v61 = vpop.eup %5661 }
 0x41e   :  { %v309_v62 = vsel %vm221_vm2, %v5662_v61, 0.0 }
 0x41f   :  { %310 = vadd.xlane.f32.xlu1 %v309_v62 }
 0x430   :  { %390 = vrot.lane.b32.xlu1 %v5937_v42, %s5773_s29 }
 0x4ac   :  { %v311_v63 = vpop.xlane.xlu1 %310 }
 0x4ad   :  { %5663 = vrcp.f32 %v311_v63 }
 0x4b0   :  { %v391_v5 = vpop.permute.xlu1 %390 }
 0x4b7   :  { %v5664_v0 = vpop.eup %5663 }
 0x4b8   :  { %v313_v3 = vmul.f32 %v5664_v0, %v5662_v61 }
 0x4ba   :  { %5209 = vmatmul.mubr.msk.f32.vlgmr.msra.gmra.mrb[4].mxu0 %vm221_vm2, %v313_v3 }
 0x4bb   :  { %5212 = vmatpush3.xpose.msk.msra.mxu0 %vm221_vm2, %v393_v4  ;;  %5213 = vmatprep.mubr.msk.f32.mxu0 %vm5769_vm1, %v5768_v37 }
 0x4bc   :  { %5216 = vmatprep.subr.mxu0 %v5768_v37 }
 0x4be   :  { %5214 = vmatmul.mubr.msk.f32.vlgmr.msra.gmra.mrb[6].mxu0 %vm221_vm2, %v391_v5 }
 0x4bf   :  { %5218 = vmatprep.mubr.msk.f32.mxu0 %vm5769_vm1, %v5768_v37 }
 0x58d   :  { %v386_v7 = vpop.f32.mrb[4].mxu0 }
 0x58e   :  { %v5210_v8 = vpop.f32.mrb[5].mxu0  ;;  %5229 = vmatmul.mubr.msk.f32.vlgmr.msra.gmra.mrb[0].mxu1 %vm221_vm2, %v386_v7 }
 0x58f   :  { %5238 = vmatprep.mubr.msk.f32.mxu1 %vm5769_vm1, %v5768_v37 }
 0x591   :  { %v464_v9 = vpop.f32.mrb[6].mxu0 }
 0x592   :  { %v468_v10 = vmul.f32 0.35355338, %v464_v9  ;;  %v5215_v11 = vpop.f32.mrb[7].mxu0 }
 0x594   :  { %v469_v12 = vsel %vm5961_vm3, %v468_v10, -1e+09 }
 0x595   :  { %v470_v13 = vadd.f32 %v469_v12, %v5966_v51 }
 0x597   :  { %v471_v14 = vsel %vm221_vm2, %v470_v13, -inf }
 0x598   :  { %472 = vmax.xlane.f32.xlu0 %v471_v14 }
 0x5ae   :  { %482 = vrot.lane.b32.xlu0 %v5937_v42, %s5774_s20 }
 0x5b2   :  { %704 = vrot.lane.b32.xlu0 %v5937_v42, %s6692_s21 }
 0x625   :  { %v473_v15 = vpop.xlane.xlu0 %472 }
 0x626   :  { %v474_v16 = vsub.f32 %v470_v13, %v473_v15 }
 0x628   :  { %v475_v17 = vmul.f32 1.442695, %v474_v16 }
 0x629   :  { %v483_v18 = vpop.permute.xlu0 %482 }
 0x62a   :  { %5665 = vpow2.f32 %v475_v17  ;;  %5217 = vmatpush3.msra.mxu0 %v483_v18 }
 0x62b   :  { %5221 = vmatprep.subr.mxu0 %v5768_v37 }
 0x62d   :  { %v705_v30 = vpop.permute.xlu0 %704 }
 0x634   :  { %v5666_v19 = vpop.eup %5665 }
 0x635   :  { %v477_v20 = vsel %vm221_vm2, %v5666_v19, 0.0 }
 0x636   :  { %478 = vadd.xlane.f32.xlu1 %v477_v20 }
 0x647   :  { %706 = vrot.lane.b32.xlu1 %v5937_v42, %s5776_s1 }
 0x661   :  { %v700_v21 = vpop.f32.mrb[0].mxu1 }
 0x662   :  { %v5230_v22 = vpop.f32.mrb[1].mxu1 }
 0x6c3   :  { %v479_v23 = vpop.xlane.xlu1 %478 }
 0x6c4   :  { %5667 = vrcp.f32 %v479_v23  ;;  %v1269_v23 = vsub.s32 1, %v5949_v45 }
 0x6c7   :  { %v707_v28 = vpop.permute.xlu1 %706 }
 0x6ce   :  { %v5668_v24 = vpop.eup %5667 }
 0x6cf   :  { %v481_v25 = vmul.f32 %v5668_v24, %v5666_v19 }
 0x6d1   :  { %5219 = vmatmul.mubr.msk.f32.vlgmr.msra.gmra.mrb[8].mxu0 %vm221_vm2, %v481_v25 }
 0x6d2   :  { %5222 = vmatpush3.msra.mxu0 %v6011_v26  ;;  %5223 = vmatprep.mubr.msk.f32.mxu0 %vm5769_vm1, %v5768_v37 }
 0x6d3   :  { %5231 = vmatprep.subr.mxu0 %v5768_v37 }
 0x7a4   :  { %v554_v27 = vpop.f32.mrb[8].mxu0 }
 0x7a5   :  { %v5220_v29 = vpop.f32.mrb[9].mxu0  ;;  %5224 = vmatmul.mubr.msk.f32.vlgmr.msra.gmra.mrb[10].mxu0 %vm221_vm2, %v554_v27 }
 0x7a6   :  { %5232 = vmatpush3.xpose.msk.msra.mxu0 %vm221_vm2, %v707_v28  ;;  %5233 = vmatprep.mubr.msk.f32.mxu0 %vm5769_vm1, %v5768_v37 }
 0x7a7   :  { %5241 = vmatprep.subr.mxu0 %v5768_v37 }
 0x7a9   :  { %5234 = vmatmul.mubr.msk.f32.vlgmr.msra.gmra.mrb[12].mxu0 %vm221_vm2, %v705_v30 }
 0x7aa   :  { %5243 = vmatprep.mubr.msk.f32.mxu0 %vm5769_vm1, %v5768_v37  ;;  %5242 = vmatpush3.msra.mxu0 %v6053_v59 }
 0x7ab   :  { %5251 = vmatprep.subr.mxu0 %v5768_v37 }
 0x878   :  { %v627_v31 = vpop.f32.mrb[10].mxu0 }
 0x879   :  { %v6026_v32 = vadd.f32 %v700_v21, %v627_v31  ;;  %v5225_v33 = vpop.f32.mrb[11].mxu0  ;;  %v6094_v21 = vld [vmem:[%s6668_s7 + $0x18] sm:$0xff] }
 0x87c   :  { %v778_v34 = vpop.f32.mrb[12].mxu0 }
 0x87d   :  { %v782_v35 = vmul.f32 0.35355338, %v778_v34  ;;  %v5235_v36 = vpop.f32.mrb[13].mxu0 }
 0x87f   :  { %v783_v38 = vsel %vm5961_vm3, %v782_v35, -1e+09 }
 0x880   :  { %v784_v39 = vadd.f32 %v783_v38, %v5966_v51 }
 0x882   :  { %v785_v41 = vsel %vm221_vm2, %v784_v39, -inf }
 0x883   :  { %786 = vmax.xlane.f32.xlu1 %v785_v41 }
 0x894   :  { %948 = vrot.lane.b32.xlu1 %v5937_v42, %s6688_s24 }
 0x898   :  { %946 = vrot.lane.b32.xlu1 %v5937_v42, %s6686_s25 }
 0x89c   :  { %1189 = vrot.lane.b32.xlu1 %v5935_v40, %s5770_s18 }
 0x910   :  { %v787_v43 = vpop.xlane.xlu1 %786 }
 0x911   :  { %v788_v44 = vsub.f32 %v784_v39, %v787_v43 }
 0x913   :  { %v789_v47 = vmul.f32 1.442695, %v788_v44 }
 0x914   :  { %v949_v56 = vpop.permute.xlu1 %948 }
 0x915   :  { %5669 = vpow2.f32 %v789_v47 }
 0x918   :  { %v947_v58 = vpop.permute.xlu1 %946 }
 0x91c   :  { %v1190_v15 = vpop.permute.xlu1 %1189 }
 0x91f   :  { %v5670_v50 = vpop.eup %5669 }
 0x920   :  { %v791_v52 = vsel %vm221_vm2, %v5670_v50, 0.0 }
 0x921   :  { %792 = vadd.xlane.f32.xlu0 %v791_v52 }
 0x937   :  { %796 = vrot.lane.b32.xlu0 %v5937_v42, %s6690_s12 }
 0x9ae   :  { %v793_v53 = vpop.xlane.xlu0 %792 }
 0x9af   :  { %5671 = vrcp.f32 %v793_v53 }
 0x9b2   :  { %v797_v54 = vpop.permute.xlu0 %796 }
 0x9b3   :  { %5237 = vmatpush3.msra.mxu1 %v797_v54 }
 0x9b4   :  { %5246 = vmatprep.subr.mxu1 %v5768_v37 }
 0x9b9   :  { %v5672_v55 = vpop.eup %5671 }
 0x9ba   :  { %v795_v57 = vmul.f32 %v5672_v55, %v5670_v50 }
 0x9bc   :  { %5239 = vmatmul.mubr.msk.f32.vlgmr.msra.gmra.mrb[2].mxu1 %vm221_vm2, %v795_v57 }
 0x9bd   :  { %5247 = vmatpush3.xpose.msk.msra.mxu1 %vm221_vm2, %v949_v56  ;;  %5248 = vmatprep.mubr.msk.f32.mxu1 %vm5769_vm1, %v5768_v37 }
 0x9be   :  { %5256 = vmatprep.subr.mxu1 %v5768_v37 }
 0x9c0   :  { %5249 = vmatmul.mubr.msk.f32.vlgmr.msra.gmra.mrb[4].mxu1 %vm221_vm2, %v947_v58 }
 0x9c1   :  { %5258 = vmatprep.mubr.msk.f32.mxu1 %vm5769_vm1, %v5768_v37  ;;  %5257 = vmatpush3.msra.mxu1 %v6094_v21 }
 0x9c2   :  { %5266 = vmatprep.subr.mxu1 %v5768_v37 }
 0xa8f   :  { %v868_v60 = vpop.f32.mrb[2].mxu1 }
 0xa90   :  { %v5240_v61 = vpop.f32.mrb[3].mxu1  ;;  %5244 = vmatmul.mubr.msk.f32.vlgmr.msra.gmra.mrb[14].mxu0 %vm221_vm2, %v868_v60 }
 0xa91   :  { %5253 = vmatprep.mubr.msk.f32.mxu0 %vm5769_vm1, %v5768_v37 }
 0xa93   :  { %v1020_v62 = vpop.f32.mrb[4].mxu1 }
 0xa94   :  { %v1024_v63 = vmul.f32 0.35355338, %v1020_v62  ;;  %v5250_v0 = vpop.f32.mrb[5].mxu1 }
 0xa96   :  { %v1025_v3 = vsel %vm5961_vm3, %v1024_v63, -1e+09 }
 0xa97   :  { %v1026_v4 = vadd.f32 %v1025_v3, %v5966_v51 }
 0xa99   :  { %v1027_v5 = vsel %vm221_vm2, %v1026_v4, -inf }
 0xa9a   :  { %1028 = vmax.xlane.f32.xlu0 %v1027_v5 }
 0xab0   :  { %1038 = vrot.lane.b32.xlu0 %v5937_v42, %s6684_s0 }
 0xab4   :  { %1361 = vrot.lane.b32.xlu0 %v5935_v40, %s5771_s3 }
 0xb27   :  { %v1029_v7 = vpop.xlane.xlu0 %1028 }
 0xb28   :  { %v1030_v8 = vsub.f32 %v1026_v4, %v1029_v7 }
 0xb2a   :  { %v1031_v9 = vmul.f32 1.442695, %v1030_v8 }
 0xb2b   :  { %v1039_v10 = vpop.permute.xlu0 %1038 }
 0xb2c   :  { %5673 = vpow2.f32 %v1031_v9  ;;  %5252 = vmatpush3.msra.mxu0 %v1039_v10 }
 0xb2d   :  { %5261 = vmatprep.subr.mxu0 %v5768_v37 }
 0xb2f   :  { %v1362_v19 = vpop.permute.xlu0 %1361 }
 0xb36   :  { %v5674_v11 = vpop.eup %5673 }
 0xb37   :  { %v1033_v12 = vsel %vm221_vm2, %v5674_v11, 0.0 }
 0xb38   :  { %1034 = vadd.xlane.f32.xlu1 %v1033_v12 }
 0xb49   :  { %1359 = vrot.lane.b32.xlu1 %v5935_v40, %s5773_s29 }
 0xb63   :  { %v941_v13 = vpop.f32.mrb[14].mxu0 }
 0xb64   :  { %v6073_v42 = vadd.f32 %v941_v13, %v6026_v32  ;;  %v5245_v14 = vpop.f32.mrb[15].mxu0 }
 0xbc5   :  { %v1035_v16 = vpop.xlane.xlu1 %1034 }
 0xbc6   :  { %5675 = vrcp.f32 %v1035_v16 }
 0xbc9   :  { %v1360_v20 = vpop.permute.xlu1 %1359 }
 0xbd0   :  { %v5676_v17 = vpop.eup %5675 }
 0xbd1   :  { %v1037_v18 = vmul.f32 %v5676_v17, %v5674_v11 }
 0xbd3   :  { %5254 = vmatmul.mubr.msk.f32.vlgmr.msra.gmra.mrb[16].mxu0 %vm221_vm2, %v1037_v18 }
 0xbd4   :  { %5262 = vmatpush3.xpose.msk.msra.mxu0 %vm221_vm2, %v1190_v15  ;;  %5263 = vmatprep.mubr.msk.f32.mxu0 %vm5769_vm1, %v5768_v37 }
 0xbd5   :  { %5271 = vmatprep.subr.mxu0 %v5768_v37 }
 0xbd7   :  { %5264 = vmatmul.mubr.msk.f32.vlgmr.msra.gmra.mrb[18].mxu0 %vm221_vm2, %v5935_v40 }
 0xbd8   :  { %5272 = vmatpush3.xpose.msk.msra.mxu0 %vm221_vm2, %v1362_v19  ;;  %5273 = vmatprep.mubr.msk.f32.mxu0 %vm5769_vm1, %v5768_v37 }
 0xbd9   :  { %5281 = vmatprep.subr.mxu0 %v5768_v37 }
 0xbdb   :  { %5274 = vmatmul.mubr.msk.f32.vlgmr.msra.gmra.mrb[20].mxu0 %vm221_vm2, %v1360_v20 }
 0xbdc   :  { %5282 = vmatpush3.msra.mxu0 %v6011_v26  ;;  %5283 = vmatprep.mubr.msk.f32.mxu0 %vm5769_vm1, %v5768_v37  ;;  %v6103_v26 = vrot.slane %v5957_v48, %v1269_v23 }
 0xbdd   :  { %5291 = vmatprep.subr.mxu0 %v5768_v37 }
 0xca6   :  { %v1110_v22 = vpop.f32.mrb[16].mxu0 }
 0xca7   :  { %v5255_v24 = vpop.f32.mrb[17].mxu0  ;;  %5259 = vmatmul.mubr.msk.f32.vlgmr.msra.gmra.mrb[6].mxu1 %vm221_vm2, %v1110_v22 }
 0xca8   :  { %5268 = vmatprep.mubr.msk.f32.mxu1 %vm5769_vm1, %v5768_v37 }
 0xcaa   :  { %v1261_v25 = vpop.f32.mrb[18].mxu0 }
 0xcab   :  { %v1265_v27 = vmul.f32 0.35355338, %v1261_v25  ;;  %v5265_v28 = vpop.f32.mrb[19].mxu0 }
 0xcad   :  { %v1266_v29 = vsel %vm5961_vm3, %v1265_v27, -1e+09 }
 0xcae   :  { %v1433_v30 = vpop.f32.mrb[20].mxu0  ;;  %v1271_v31 = vadd.f32 %v6103_v26, %v1266_v29 }
 0xcaf   :  { %v1437_v32 = vmul.f32 0.35355338, %v1433_v30  ;;  %v5275_v33 = vpop.f32.mrb[21].mxu0 }
 0xcb0   :  { %v1272_v34 = vsel %vm221_vm2, %v1271_v31, -inf }
 0xcb1   :  { %v1438_v35 = vsel %vm5961_vm3, %v1437_v32, -1e+09  ;;  %1273 = vmax.xlane.f32.xlu0 %v1272_v34 }
 0xcb2   :  { %v1439_v36 = vadd.f32 %v1438_v35, %v6103_v26  ;;  %v4937_v35 = vld [vmem:[%s6669_s8] ss:$0 sm:$0xff] }
 0xcb4   :  { %v1440_v48 = vsel %vm221_vm2, %v1439_v36, -inf }
 0xcb5   :  { %1441 = vmax.xlane.f32.xlu1 %v1440_v48 }
 0xcc6   :  { %1451 = vrot.lane.b32.xlu1 %v5935_v40, %s5774_s20 }
 0xcca   :  { %1675 = vrot.lane.b32.xlu1 %v5935_v40, %s5776_s1 }
 0xcce   :  { %1673 = vrot.lane.b32.xlu1 %v5935_v40, %s6692_s21 }
 0xd3e   :  { %v1274_v38 = vpop.xlane.xlu0 %1273 }
 0xd3f   :  { %v1275_v39 = vsub.f32 %v1271_v31, %v1274_v38 }
 0xd41   :  { %v1276_v41 = vmul.f32 1.442695, %v1275_v39 }
 0xd42   :  { %v1442_v43 = vpop.xlane.xlu1 %1441 }
 0xd43   :  { %5677 = vpow2.f32 %v1276_v41  ;;  %v1443_v44 = vsub.f32 %v1439_v36, %v1442_v43 }
 0xd45   :  { %v1444_v47 = vmul.f32 1.442695, %v1443_v44 }
 0xd46   :  { %v1452_v0 = vpop.permute.xlu1 %1451 }
 0xd47   :  { %5679 = vpow2.f32 %v1444_v47 }
 0xd4a   :  { %v1676_v8 = vpop.permute.xlu1 %1675 }
 0xd4d   :  { %v5678_v50 = vpop.eup %5677 }
 0xd4e   :  { %v1278_v52 = vsel %vm221_vm2, %v5678_v50, 0.0 }
 0xd4f   :  { %1279 = vadd.xlane.f32.xlu0 %v1278_v52 }
 0xd51   :  { %v5680_v53 = vpop.eup %5679 }
 0xd52   :  { %v1446_v54 = vsel %vm221_vm2, %v5680_v53, 0.0 }
 0xd53   :  { %1447 = vadd.xlane.f32.xlu0 %v1446_v54 }
 0xd69   :  { %1283 = vrot.lane.b32.xlu0 %v5935_v40, %s5772_s28 }
 0xd7a   :  { %v1183_v55 = vpop.f32.mrb[6].mxu1 }
 0xd7b   :  { %v6124_v56 = vadd.f32 %v1183_v55, %v6073_v42  ;;  %v5260_v57 = vpop.f32.mrb[7].mxu1 }
 0xd7d   :  { %v2164_v39 = vadd.f32 %v4937_v35, %v6124_v56 }
 0xd7f   :  { %v6181_v43 = vadd.f32 %v2164_v39, %v5891_v1 }
 0xd81   :  { %v2170_v47 = vsel %vm78_vm0, %v6181_v43, 0.0 }
 0xddc   :  { %v1280_v58 = vpop.xlane.xlu0 %1279 }
 0xddd   :  { %5681 = vrcp.f32 %v1280_v58 }
 0xde0   :  { %v1448_v60 = vpop.xlane.xlu0 %1447 }
 0xde1   :  { %5683 = vrcp.f32 %v1448_v60 }
 0xde4   :  { %v1284_v61 = vpop.permute.xlu0 %1283 }
 0xde5   :  { %5267 = vmatpush3.msra.mxu1 %v1284_v61 }
 0xde6   :  { %5276 = vmatprep.subr.mxu1 %v5768_v37 }
 0xde7   :  { %v5682_v62 = vpop.eup %5681 }
 0xde8   :  { %v1282_v63 = vmul.f32 %v5682_v62, %v5678_v50 }
 0xdea   :  { %5269 = vmatmul.mubr.msk.f32.vlgmr.msra.gmra.mrb[8].mxu1 %vm221_vm2, %v1282_v63 }
 0xdeb   :  { %v5684_v3 = vpop.eup %5683  ;;  %5277 = vmatpush3.msra.mxu1 %v1452_v0  ;;  %5278 = vmatprep.mubr.msk.f32.mxu1 %vm5769_vm1, %v5768_v37 }
 0xdec   :  { %v1450_v4 = vmul.f32 %v5684_v3, %v5680_v53  ;;  %5286 = vmatprep.subr.mxu1 %v5768_v37 }
 0xdee   :  { %5279 = vmatmul.mubr.msk.f32.vlgmr.msra.gmra.mrb[10].mxu1 %vm221_vm2, %v1450_v4 }
 0xdef   :  { %5287 = vmatpush3.msra.mxu1 %v5989_v6  ;;  %5288 = vmatprep.mubr.msk.f32.mxu1 %vm5769_vm1, %v5768_v37  ;;  %v1674_v6 = vpop.permute.xlu1 %1673 }
 0xdf0   :  { %5296 = vmatprep.subr.mxu1 %v5768_v37 }
 0xebd   :  { %v1355_v5 = vpop.f32.mrb[8].mxu1 }
 0xebe   :  { %v5270_v7 = vpop.f32.mrb[9].mxu1  ;;  %5289 = vmatmul.mubr.msk.f32.vlgmr.msra.gmra.mrb[12].mxu1 %vm221_vm2, %v1355_v5 }
 0xebf   :  { %5298 = vmatprep.mubr.msk.f32.mxu1 %vm5769_vm1, %v5768_v37 }
 0xec1   :  { %v1523_v9 = vpop.f32.mrb[10].mxu1 }
 0xec2   :  { %v5280_v10 = vpop.f32.mrb[11].mxu1  ;;  %5284 = vmatmul.mubr.msk.f32.vlgmr.msra.gmra.mrb[22].mxu0 %vm221_vm2, %v1523_v9 }
 0xec3   :  { %5292 = vmatpush3.xpose.msk.msra.mxu0 %vm221_vm2, %v1676_v8  ;;  %5293 = vmatprep.mubr.msk.f32.mxu0 %vm5769_vm1, %v5768_v37 }
 0xec4   :  { %5301 = vmatprep.subr.mxu0 %v5768_v37 }
 0xec6   :  { %5294 = vmatmul.mubr.msk.f32.vlgmr.msra.gmra.mrb[24].mxu0 %vm221_vm2, %v1674_v6 }
 0xec7   :  { %5302 = vmatpush3.msra.mxu0 %v6053_v59  ;;  %5303 = vmatprep.mubr.msk.f32.mxu0 %vm5769_vm1, %v5768_v37 }
 0xec8   :  { %5311 = vmatprep.subr.mxu0 %v5768_v37 }
 0xf91   :  { %v1669_v11 = vpop.f32.mrb[12].mxu1 }
 0xf92   :  { %v5290_v12 = vpop.f32.mrb[13].mxu1 }
 0xf95   :  { %v1596_v13 = vpop.f32.mrb[22].mxu0 }
 0xf96   :  { %v1670_v42 = vadd.f32 %v1669_v11, %v1596_v13  ;;  %v5285_v14 = vpop.f32.mrb[23].mxu0 }
 0xf99   :  { %v1747_v15 = vpop.f32.mrb[24].mxu0 }
 0xf9a   :  { %v1751_v16 = vmul.f32 0.35355338, %v1747_v15  ;;  %v5295_v17 = vpop.f32.mrb[25].mxu0 }
 0xf9c   :  { %v1752_v18 = vsel %vm5961_vm3, %v1751_v16, -1e+09 }
 0xf9d   :  { %v1753_v19 = vadd.f32 %v1752_v18, %v6103_v26 }
 0xf9f   :  { %v1754_v59 = vsel %vm221_vm2, %v1753_v19, -inf }
 0xfa0   :  { %1755 = vmax.xlane.f32.xlu0 %v1754_v59  ;;  %v4938_v59 = vld [vmem:[%s6670_s9] ss:$0 sm:$0xff] }
 0xfb6   :  { %1765 = vrot.lane.b32.xlu0 %v5935_v40, %s6690_s12  ;;  %s6709_s12 = smov 104  }
 0xfba   :  { %1915 = vrot.lane.b32.xlu0 %v5935_v40, %s6686_s25  ;;  %s6707_s25 = smov 48  }
0x102d   :  { %v1756_v20 = vpop.xlane.xlu0 %1755 }
0x102e   :  { %v1757_v22 = vsub.f32 %v1753_v19, %v1756_v20 }
0x1030   :  { %v1758_v23 = vmul.f32 1.442695, %v1757_v22  ;;  %v4939_v22 = vld [vmem:[%s6671_s10] ss:$0 sm:$0xff] }
0x1031   :  { %v1766_v24 = vpop.permute.xlu0 %1765 }
0x1032   :  { %5685 = vpow2.f32 %v1758_v23  ;;  %5297 = vmatpush3.msra.mxu1 %v1766_v24 }
0x1033   :  { %5306 = vmatprep.subr.mxu1 %v5768_v37 }
0x1035   :  { %v1916_v32 = vpop.permute.xlu0 %1915 }
0x103c   :  { %v5686_v25 = vpop.eup %5685 }
0x103d   :  { %v1760_v27 = vsel %vm221_vm2, %v5686_v25, 0.0 }
0x103e   :  { %1761 = vadd.xlane.f32.xlu1 %v1760_v27  ;;  %v2213_v27 = vld [vmem:[%s6672_s11 + $0x8] sm:$0xff] }
0x104f   :  { %1917 = vrot.lane.b32.xlu1 %v5935_v40, %s6688_s24  ;;  %s6706_s24 = smov 112  }
0x10cb   :  { %v1762_v28 = vpop.xlane.xlu1 %1761 }
0x10cc   :  { %5687 = vrcp.f32 %v1762_v28 }
0x10cf   :  { %v1918_v31 = vpop.permute.xlu1 %1917 }
0x10d6   :  { %v5688_v29 = vpop.eup %5687 }
0x10d7   :  { %v1764_v30 = vmul.f32 %v5688_v29, %v5686_v25  ;;  %v2212_v25 = vld [vmem:[%s6672_s11] sm:$0xff]  ;;  %v2214_v29 = vld [vmem:[%s6672_s11 + $0x10] sm:$0xff] }
0x10d8   :  { %v5552_v28 = vpack.c.bf16 %v2213_v27, %v2212_v25 }
0x10d9   :  { %5299 = vmatmul.mubr.msk.f32.vlgmr.msra.gmra.mrb[14].mxu1 %vm221_vm2, %v1764_v30  ;;  %v2215_v30 = vld [vmem:[%s6672_s11 + $0x18] sm:$0xff] }
0x10da   :  { %5307 = vmatpush3.xpose.msk.msra.mxu1 %vm221_vm2, %v1918_v31  ;;  %5308 = vmatprep.mubr.msk.f32.mxu1 %vm5769_vm1, %v5768_v37  ;;  %v5556_v31 = vpack.c.bf16 %v2215_v30, %v2214_v29  ;;  %v4943_v30 = vld [vmem:[%s6675_s14] ss:$0 sm:$0xff] }
0x10db   :  { %5316 = vmatprep.subr.mxu1 %v5768_v37 }
0x10dd   :  { %5309 = vmatmul.mubr.msk.f32.vlgmr.msra.gmra.mrb[16].mxu1 %vm221_vm2, %v1916_v32  ;;  %v2322_v32 = vld [vmem:[%s6674_s13] sm:$0xff] }
0x10de   :  { %5317 = vmatpush3.msra.mxu1 %v6094_v21  ;;  %5318 = vmatprep.mubr.msk.f32.mxu1 %vm5769_vm1, %v5768_v37 }
0x11ac   :  { %v1837_v33 = vpop.f32.mrb[14].mxu1 }
0x11ad   :  { %v5300_v34 = vpop.f32.mrb[15].mxu1  ;;  %5304 = vmatmul.mubr.msk.f32.vlgmr.msra.gmra.mrb[26].mxu0 %vm221_vm2, %v1837_v33  ;;  %v2323_v33 = vld [vmem:[%s6674_s13 + $0x8] sm:$0xff] }
0x11ae   :  { %5313 = vmatprep.mubr.msk.f32.mxu0 %vm5769_vm1, %v5768_v37  ;;  %v5560_v34 = vpack.c.bf16 %v2323_v33, %v2322_v32 }
0x11b0   :  { %v1989_v36 = vpop.f32.mrb[16].mxu1  ;;  %5561 = vmatprep.subr.bf16.mxu1 %v5560_v34 }
0x11b1   :  { %v1993_v48 = vmul.f32 0.35355338, %v1989_v36  ;;  %v5310_v38 = vpop.f32.mrb[17].mxu1 }
0x11b3   :  { %v1994_v21 = vsel %vm5961_vm3, %v1993_v48, -1e+09 }
0x11b4   :  { %v1995_v41 = vadd.f32 %v1994_v21, %v6103_v26 }
0x11b6   :  { %v1996_v44 = vsel %vm221_vm2, %v1995_v41, -inf }
0x11b7   :  { %1997 = vmax.xlane.f32.xlu1 %v1996_v44  ;;  %v2324_v44 = vld [vmem:[%s6674_s13 + $0x10] sm:$0xff] }
0x11bb   :  { %2171 = vadd.xlane.f32.xlu1 %v2170_v47  ;;  %v2325_v47 = vld [vmem:[%s6674_s13 + $0x18] sm:$0xff] }
0x1244   :  { %v1998_v50 = vpop.xlane.xlu1 %1997 }
0x1245   :  { %v1999_v52 = vsub.f32 %v1995_v41, %v1998_v50  ;;  %v5564_v50 = vpack.c.bf16 %v2325_v47, %v2324_v44 }
0x1247   :  { %v2000_v53 = vmul.f32 1.442695, %v1999_v52  ;;  %v2326_v52 = vld [vmem:[%s6674_s13 + $0x20] sm:$0xff] }
0x1248   :  { %v2172_v3 = vpop.xlane.xlu1 %2171 }
0x1249   :  { %5689 = vpow2.f32 %v2000_v53  ;;  %v2176_v4 = vmul.f32 0.03125, %v2172_v3  ;;  %v2327_v53 = vld [vmem:[%s6674_s13 + $0x28] sm:$0xff] }
0x124a   :  { %v2335_v3 = vld [vmem:[%s6674_s13 + $0x68] sm:$0xff] }
0x124b   :  { %v2178_v8 = vsub.f32 %v6181_v43, %v2176_v4 }
0x124d   :  { %v2180_v11 = vmul.f32 %v2178_v8, %v2178_v8 }
0x124f   :  { %v2182_v12 = vsel %vm78_vm0, %v2180_v11, 0.0 }
0x1253   :  { %v5690_v54 = vpop.eup %5689 }
0x1254   :  { %v2002_v55 = vsel %vm221_vm2, %v5690_v54, 0.0 }
0x1255   :  { %2003 = vadd.xlane.f32.xlu0 %v2002_v55  ;;  %v2328_v55 = vld [vmem:[%s6674_s13 + $0x30] sm:$0xff] }
0x126b   :  { %2007 = vrot.lane.b32.xlu0 %v5935_v40, %s6684_s0  ;;  %s6710_s0 = smov 40  }
0x1280   :  { %v1910_v1 = vpop.f32.mrb[26].mxu0 }
0x1281   :  { %v1914_v56 = vadd.f32 %v1910_v1, %v1670_v42  ;;  %v5305_v57 = vpop.f32.mrb[27].mxu0  ;;  %v2329_v1 = vld [vmem:[%s6674_s13 + $0x38] sm:$0xff] }
0x1282   :  { %v2330_v57 = vld [vmem:[%s6674_s13 + $0x40] sm:$0xff] }
0x12e2   :  { %v2004_v58 = vpop.xlane.xlu0 %2003 }
0x12e3   :  { %5691 = vrcp.f32 %v2004_v58  ;;  %v2331_v58 = vld [vmem:[%s6674_s13 + $0x48] sm:$0xff] }
0x12e6   :  { %v2008_v60 = vpop.permute.xlu0 %2007 }
0x12e7   :  { %5312 = vmatpush3.msra.mxu0 %v2008_v60  ;;  %v5576_v60 = vpack.c.bf16 %v2331_v58, %v2330_v57  ;;  %v4951_v57 = vld [vmem:[%s6666_s5 + $0x38] sm:$0xff] }
0x12e8   :  { %5553 = vmatprep.subr.bf16.mxu0 %v5552_v28 }
0x12ed   :  { %v5692_v61 = vpop.eup %5691 }
0x12ee   :  { %v2006_v62 = vmul.f32 %v5692_v61, %v5690_v54  ;;  %v5568_v54 = vpack.c.bf16 %v2327_v53, %v2326_v52  ;;  %v2332_v61 = vld [vmem:[%s6674_s13 + $0x50] sm:$0xff] }
0x12f0   :  { %5314 = vmatmul.mubr.msk.f32.vlgmr.msra.gmra.mrb[28].mxu0 %vm221_vm2, %v2006_v62  ;;  %v2333_v62 = vld [vmem:[%s6674_s13 + $0x58] sm:$0xff] }
0x12f1   :  { %5555 = vmatpush3.bf16.msra.mxu0 %v5552_v28 }
0x12f2   :  { %5557 = vmatprep.subr.bf16.mxu0 %v5556_v31 }
0x12f5   :  { %5559 = vmatpush3.bf16.msra.mxu0 %v5556_v31 }
0x13c3   :  { %v2079_v63 = vpop.f32.mrb[28].mxu0 }
0x13c4   :  { %v5315_v0 = vpop.f32.mrb[29].mxu0  ;;  %5319 = vmatmul.mubr.msk.f32.vlgmr.msra.gmra.mrb[18].mxu1 %vm221_vm2, %v2079_v63  ;;  %v5580_v63 = vpack.c.bf16 %v2333_v62, %v2332_v61 }
0x13c5   :  { %5563 = vmatpush3.bf16.msra.mxu1 %v5560_v34  ;;  %v2334_v0 = vld [vmem:[%s6674_s13 + $0x60] sm:$0xff] }
0x13c6   :  { %5565 = vmatprep.subr.bf16.mxu1 %v5564_v50  ;;  %v5584_v4 = vpack.c.bf16 %v2335_v3, %v2334_v0 }
0x13c9   :  { %5567 = vmatpush3.bf16.msra.mxu1 %v5564_v50 }
0x13ca   :  { %5569 = vmatprep.subr.bf16.mxu1 %v5568_v54 }
0x13cd   :  { %5571 = vmatpush3.bf16.msra.mxu1 %v5568_v54  ;;  %v4948_v54 = vld [vmem:[%s6666_s5 + $0x20] sm:$0xff] }
0x1497   :  { %v2152_v5 = vpop.f32.mrb[18].mxu1 }
0x1498   :  { %v2156_v7 = vadd.f32 %v2152_v5, %v1914_v56  ;;  %v5320_v40 = vpop.f32.mrb[19].mxu1  ;;  %v5572_v56 = vpack.c.bf16 %v2329_v1, %v2328_v55  ;;  %v2336_v5 = vld [vmem:[%s6674_s13 + $0x70] sm:$0xff]  ;;  %v4949_v55 = vld [vmem:[%s6666_s5 + $0x28] sm:$0xff] }
0x1499   :  { %v5592_v1 = vpack.c.bf16 %v4949_v55, %v4948_v54 }
0x149a   :  { %v2165_v9 = vadd.f32 %v4937_v35, %v2156_v7  ;;  %5573 = vmatprep.subr.bf16.mxu1 %v5572_v56  ;;  %v2337_v7 = vld [vmem:[%s6674_s13 + $0x78] sm:$0xff] }
0x149b   :  { %5575 = vmatpush3.bf16.msra.mxu1 %v5572_v56  ;;  %v5588_v40 = vpack.c.bf16 %v2337_v7, %v2336_v5  ;;  %5593 = vmatprep.subr.bf16.mxu0 %v5592_v1  ;;  %v4950_v56 = vld [vmem:[%s6666_s5 + $0x30] sm:$0xff]  ;;  %v4946_v5 = vld [vmem:[%s6701_s22 + $0x1] ss:$0 sm:$0xff] }
0x149c   :  { %v6193_v10 = vadd.f32 %v2165_v9, %v5896_v2  ;;  %5577 = vmatprep.subr.bf16.mxu1 %v5576_v60  ;;  %v5596_v58 = vpack.c.bf16 %v4951_v57, %v4950_v56 }
0x149e   :  { %v2173_v6 = vsel %vm78_vm0, %v6193_v10, 0.0 }
0x149f   :  { %2174 = vadd.xlane.f32.xlu1 %v2173_v6  ;;  %5579 = vmatpush3.bf16.msra.mxu1 %v5576_v60 }
0x14a0   :  { %5581 = vmatprep.subr.bf16.mxu1 %v5580_v63 }
0x14a3   :  { %2183 = vadd.xlane.f32.xlu1 %v2182_v12  ;;  %5583 = vmatpush3.bf16.msra.mxu1 %v5580_v63 }
0x14a4   :  { %5585 = vmatprep.subr.bf16.mxu1 %v5584_v4 }
0x14a7   :  { %5587 = vmatpush3.bf16.msra.mxu1 %v5584_v4 }
0x14a8   :  { %5589 = vmatprep.subr.bf16.mxu1 %v5588_v40 }
0x14ab   :  { %5591 = vmatpush3.bf16.msra.mxu1 %v5588_v40  ;;  %v4947_v40 = vld [vmem:[%s6665_s4 + $0x1] ss:$0 sm:$0xff] }
0x14ac   :  { %5403 = vmatprep.subr.mxu1 %v5768_v37 }
0x152c   :  { %v2175_v13 = vpop.xlane.xlu1 %2174 }
0x152d   :  { %v2177_v42 = vmul.f32 0.03125, %v2175_v13 }
0x152f   :  { %v2179_v14 = vsub.f32 %v6193_v10, %v2177_v42 }
0x1530   :  { %v2184_v15 = vpop.xlane.xlu1 %2183 }
0x1531   :  { %v2188_v16 = vmul.f32 0.03125, %v2184_v15  ;;  %v2181_v17 = vmul.f32 %v2179_v14, %v2179_v14 }
0x1533   :  { %v2190_v18 = vadd.f32 1e-05, %v2188_v16  ;;  %v2185_v19 = vsel %vm78_vm0, %v2181_v17, 0.0 }
0x1534   :  { %2186 = vadd.xlane.f32.xlu1 %v2185_v19 }
0x1535   :  { %5693 = vrsqrt.f32 %v2190_v18 }
0x153f   :  { %v5694_v2 = vpop.eup %5693 }
0x1540   :  { %v2194_v20 = vmul.f32 %v5694_v2, %v2178_v8  ;;  %v4940_v8 = vld [vmem:[%s6705_s2] ss:$0 sm:$0xff] }
0x1542   :  { %v2202_v23 = vmul.f32 %v4938_v59, %v2194_v20 }
0x1544   :  { %v2210_v24 = vadd.f32 %v4939_v22, %v2202_v23 }
0x1546   :  { %5329 = vmatprep.mubr.msk.f32.mxu0 %vm78_vm0, %v2210_v24 }
0x15c1   :  { %v2187_v35 = vpop.xlane.xlu1 %2186 }
0x15c2   :  { %v2189_v36 = vmul.f32 0.03125, %v2187_v35 }
0x15c4   :  { %v2191_v48 = vadd.f32 1e-05, %v2189_v36 }
0x15c6   :  { %5695 = vrsqrt.f32 %v2191_v48 }
0x15d0   :  { %v5696_v38 = vpop.eup %5695 }
0x15d1   :  { %v2195_v39 = vmul.f32 %v5696_v38, %v2179_v14 }
0x15d3   :  { %v2203_v21 = vmul.f32 %v4938_v59, %v2195_v39 }
0x15d5   :  { %v2211_v41 = vadd.f32 %v4939_v22, %v2203_v21 }
0x15d7   :  { %5330 = vmatmul.mubr.msk.f32.vlgmr.msra.gmra.mrb[30].mxu0 %vm78_vm0, %v2211_v41 }
0x15d8   :  { %5595 = vmatpush3.bf16.msra.mxu0 %v5592_v1 }
0x15d9   :  { %5597 = vmatprep.subr.bf16.mxu0 %v5596_v58 }
0x15dc   :  { %5599 = vmatpush3.bf16.msra.mxu0 %v5596_v58 }
0x15dd   :  { %5378 = vmatprep.subr.mxu0 %v5768_v37 }
0x16aa   :  { %v5331_v9 = vpop.f32.mrb[30].mxu0 }
0x16ab   :  { %v2301_v6 = vadd.f32 %v5331_v9, %v4940_v8  ;;  %v2295_v11 = vpop.f32.mrb[31].mxu0 }
0x16ac   :  { %v2296_v12 = vadd.f32 %v4940_v8, %v2295_v11 }
0x16ad   :  { %v2307_v13 = vmul.f32 0.044715, %v2301_v6  ;;  %v2305_v27 = vmul.f32 0.5, %v2301_v6 }
0x16ae   :  { %v2306_v42 = vmul.f32 0.044715, %v2296_v12  ;;  %v2304_v24 = vmul.f32 0.5, %v2296_v12 }
0x16af   :  { %v2309_v14 = vmul.f32 %v2307_v13, %v2301_v6 }
0x16b0   :  { %v2308_v15 = vmul.f32 %v2306_v42, %v2296_v12  ;;  %v4953_v42 = vld [vmem:[%s6667_s6 + $0x1] ss:$0 sm:$0xff] }
0x16b1   :  { %v2311_v16 = vmul.f32 %v2309_v14, %v2301_v6 }
0x16b2   :  { %v2310_v17 = vmul.f32 %v2308_v15, %v2296_v12 }
0x16b3   :  { %v2313_v18 = vadd.f32 %v2311_v16, %v2301_v6 }
0x16b4   :  { %v2312_v19 = vadd.f32 %v2310_v17, %v2296_v12 }
0x16b5   :  { %v2315_v2 = vmul.f32 0.7978846, %v2313_v18 }
0x16b6   :  { %v2314_v59 = vmul.f32 0.7978846, %v2312_v19 }
0x16b7   :  { %5697 = vtanh.f32 %v2315_v2 }
0x16b8   :  { %5699 = vtanh.f32 %v2314_v59 }
0x16c1   :  { %v5698_v20 = vpop.eup %5697 }
0x16c2   :  { %v5700_v22 = vpop.eup %5699  ;;  %v2319_v23 = vadd.f32 1.0, %v5698_v20 }
0x16c3   :  { %v2318_v25 = vadd.f32 1.0, %v5700_v22 }
0x16c4   :  { %v2321_v29 = vmul.f32 %v2319_v23, %v2305_v27 }
0x16c5   :  { %v2320_v28 = vmul.f32 %v2318_v25, %v2304_v24 }
0x16c7   :  { %5364 = vmatprep.mubr.f32.mxu1 %v2320_v28 }
0x16c8   :  { %5365 = vmatmul.mubr.f32.vlgmr.msra.gmra.mrb[20].mxu1 %v2321_v29 }
0x16c9   :  { %5405 = vmatprep.mubr.msk.f32.mxu1 %vm5769_vm1, %v5768_v37 }
0x179b   :  { %v5366_v31 = vpop.f32.mrb[20].mxu1 }
0x179c   :  { %v2417_v32 = vadd.f32 %v5366_v31, %v4943_v30  ;;  %v2411_v33 = vpop.f32.mrb[21].mxu1 }
0x179d   :  { %v2412_v34 = vadd.f32 %v4943_v30, %v2411_v33 }
0x179e   :  { %v6278_v35 = vadd.f32 %v2417_v32, %v6193_v10 }
0x179f   :  { %v6281_v36 = vadd.f32 %v2412_v34, %v6181_v43 }
0x17a0   :  { %v2429_v48 = vsel %vm78_vm0, %v6278_v35, 0.0 }
0x17a1   :  { %2430 = vadd.xlane.f32.xlu0 %v2429_v48  ;;  %v2426_v38 = vsel %vm78_vm0, %v6281_v36, 0.0 }
0x17a2   :  { %2427 = vadd.xlane.f32.xlu1 %v2426_v38  ;;  %v6352_v38 = vld [vmem:[%s6668_s7 + $0x20] sm:$0xff] }
0x17a3   :  { %5404 = vmatpush3.msra.mxu1 %v6352_v38 }
0x17a4   :  { %5413 = vmatprep.subr.mxu1 %v5768_v37 }
0x182e   :  { %v2431_v39 = vpop.xlane.xlu0 %2430 }
0x182f   :  { %v2433_v21 = vmul.f32 0.03125, %v2431_v39  ;;  %v2428_v41 = vpop.xlane.xlu1 %2427 }
0x1830   :  { %v2432_v44 = vmul.f32 0.03125, %v2428_v41 }
0x1831   :  { %v2435_v47 = vsub.f32 %v6278_v35, %v2433_v21 }
0x1832   :  { %v2434_v10 = vsub.f32 %v6281_v36, %v2432_v44 }
0x1833   :  { %v2437_v52 = vmul.f32 %v2435_v47, %v2435_v47 }
0x1834   :  { %v2436_v50 = vmul.f32 %v2434_v10, %v2434_v10 }
0x1835   :  { %v2441_v53 = vsel %vm78_vm0, %v2437_v52, 0.0 }
0x1836   :  { %v2438_v43 = vsel %vm78_vm0, %v2436_v50, 0.0 }
0x1837   :  { %2439 = vadd.xlane.f32.xlu1 %v2438_v43 }
0x183b   :  { %2442 = vadd.xlane.f32.xlu1 %v2441_v53 }
0x18c4   :  { %v2440_v60 = vpop.xlane.xlu1 %2439 }
0x18c5   :  { %v2444_v61 = vmul.f32 0.03125, %v2440_v60 }
0x18c7   :  { %v2446_v62 = vadd.f32 1e-05, %v2444_v61 }
0x18c8   :  { %v2443_v63 = vpop.xlane.xlu1 %2442 }
0x18c9   :  { %5701 = vrsqrt.f32 %v2446_v62  ;;  %v2445_v0 = vmul.f32 0.03125, %v2443_v63 }
0x18cb   :  { %v2447_v3 = vadd.f32 1e-05, %v2445_v0  ;;  %v6379_v0 = vld [vmem:[%s6668_s7 + $0x28] sm:$0xff] }
0x18cd   :  { %5703 = vrsqrt.f32 %v2447_v3 }
0x18d3   :  { %v5702_v4 = vpop.eup %5701 }
0x18d4   :  { %v2450_v7 = vmul.f32 %v5702_v4, %v2434_v10 }
0x18d6   :  { %v2458_v8 = vmul.f32 %v4946_v5, %v2450_v7 }
0x18d7   :  { %v5704_v9 = vpop.eup %5703 }
0x18d8   :  { %v2451_v6 = vmul.f32 %v5704_v9, %v2435_v47  ;;  %v2466_v11 = vadd.f32 %v4947_v40, %v2458_v8 }
0x18da   :  { %v2459_v12 = vmul.f32 %v4946_v5, %v2451_v6  ;;  %5375 = vmatprep.mubr.msk.f32.mxu0 %vm78_vm0, %v2466_v11 }
0x18dc   :  { %v2467_v13 = vadd.f32 %v4947_v40, %v2459_v12 }
0x18de   :  { %5376 = vmatmul.mubr.msk.f32.vlgmr.msra.gmra.mrb[32].mxu0 %vm78_vm0, %v2467_v13 }
0x18df   :  { %5380 = vmatprep.mubr.msk.f32.mxu0 %vm5769_vm1, %v5768_v37 }
0x19b1   :  { %v5377_v14 = vpop.f32.mrb[32].mxu0 }
0x19b2   :  { %v6317_v15 = vadd.f32 %v5377_v14, %v4953_v42  ;;  %v2553_v16 = vpop.f32.mrb[33].mxu0 }
0x19b3   :  { %v6319_v17 = vadd.f32 %v4953_v42, %v2553_v16 }
0x19b5   :  { %2658 = vrot.lane.b32.xlu0 %v6319_v17, %s5772_s28  ;;  %2568 = vrot.lane.b32.xlu1 %v6319_v17, %s5770_s18 }
0x19b9   :  { %2736 = vrot.lane.b32.xlu0 %v6319_v17, %s5771_s3 }
0x1a27   :  { %v2569_v18 = vpop.permute.xlu1 %2568  ;;  %v2659_v19 = vpop.permute.xlu0 %2658 }
0x1a28   :  { %5379 = vmatpush3.xpose.msk.msra.mxu0 %vm221_vm2, %v2569_v18 }
0x1a29   :  { %5383 = vmatprep.subr.mxu0 %v5768_v37 }
0x1a2b   :  { %5381 = vmatmul.mubr.msk.f32.vlgmr.msra.gmra.mrb[34].mxu0 %vm221_vm2, %v6319_v17  ;;  %v2737_v31 = vpop.permute.xlu0 %2736 }
0x1a2c   :  { %5384 = vmatpush3.msra.mxu0 %v2659_v19  ;;  %5385 = vmatprep.mubr.msk.f32.mxu0 %vm5769_vm1, %v5768_v37 }
0x1a2d   :  { %5388 = vmatprep.subr.mxu0 %v5768_v37 }
0x1afe   :  { %v2640_v2 = vpop.f32.mrb[34].mxu0 }
0x1aff   :  { %v2644_v59 = vmul.f32 0.35355338, %v2640_v2  ;;  %v5382_v20 = vpop.f32.mrb[35].mxu0 }
0x1b01   :  { %v2645_v22 = vsel %vm5961_vm3, %v2644_v59, -1e+09 }
0x1b02   :  { %v2646_v23 = vadd.f32 %v2645_v22, %v5966_v51 }
0x1b04   :  { %v2647_v24 = vsel %vm221_vm2, %v2646_v23, -inf }
0x1b05   :  { %2648 = vmax.xlane.f32.xlu1 %v2647_v24 }
0x1b92   :  { %v2649_v25 = vpop.xlane.xlu1 %2648 }
0x1b93   :  { %v2650_v27 = vsub.f32 %v2646_v23, %v2649_v25 }
0x1b95   :  { %v2651_v28 = vmul.f32 1.442695, %v2650_v27  ;;  %v6412_v27 = vld [vmem:[%s6668_s7 + $0x30] sm:$0xff] }
0x1b97   :  { %5705 = vpow2.f32 %v2651_v28 }
0x1ba1   :  { %v5706_v29 = vpop.eup %5705 }
0x1ba2   :  { %v2653_v30 = vsel %vm221_vm2, %v5706_v29, 0.0 }
0x1ba3   :  { %2654 = vadd.xlane.f32.xlu0 %v2653_v30 }
0x1bb9   :  { %2734 = vrot.lane.b32.xlu0 %v6319_v17, %s5773_s29 }
0x1c30   :  { %v2655_v32 = vpop.xlane.xlu0 %2654 }
0x1c31   :  { %5707 = vrcp.f32 %v2655_v32 }
0x1c34   :  { %v2735_v48 = vpop.permute.xlu0 %2734 }
0x1c3b   :  { %v5708_v33 = vpop.eup %5707 }
0x1c3c   :  { %v2657_v34 = vmul.f32 %v5708_v33, %v5706_v29 }
0x1c3e   :  { %5386 = vmatmul.mubr.msk.f32.vlgmr.msra.gmra.mrb[36].mxu0 %vm221_vm2, %v2657_v34 }
0x1c3f   :  { %5389 = vmatpush3.xpose.msk.msra.mxu0 %vm221_vm2, %v2737_v31  ;;  %5390 = vmatprep.mubr.msk.f32.mxu0 %vm5769_vm1, %v5768_v37 }
0x1c40   :  { %5393 = vmatprep.subr.mxu0 %v5768_v37 }
0x1c42   :  { %5391 = vmatmul.mubr.msk.f32.vlgmr.msra.gmra.mrb[38].mxu0 %vm221_vm2, %v2735_v48 }
0x1c43   :  { %5395 = vmatprep.mubr.msk.f32.mxu0 %vm5769_vm1, %v5768_v37 }
0x1d11   :  { %v2730_v39 = vpop.f32.mrb[36].mxu0 }
0x1d12   :  { %v5387_v21 = vpop.f32.mrb[37].mxu0  ;;  %5406 = vmatmul.mubr.msk.f32.vlgmr.msra.gmra.mrb[22].mxu1 %vm221_vm2, %v2730_v39 }
0x1d13   :  { %5415 = vmatprep.mubr.msk.f32.mxu1 %vm5769_vm1, %v5768_v37 }
0x1d15   :  { %v2808_v41 = vpop.f32.mrb[38].mxu0 }
0x1d16   :  { %v2812_v44 = vmul.f32 0.35355338, %v2808_v41  ;;  %v5392_v47 = vpop.f32.mrb[39].mxu0 }
0x1d18   :  { %v2813_v10 = vsel %vm5961_vm3, %v2812_v44, -1e+09 }
0x1d19   :  { %v2814_v50 = vadd.f32 %v2813_v10, %v5966_v51 }
0x1d1b   :  { %v2815_v43 = vsel %vm221_vm2, %v2814_v50, -inf }
0x1d1c   :  { %2816 = vmax.xlane.f32.xlu1 %v2815_v43 }
0x1d2d   :  { %2826 = vrot.lane.b32.xlu1 %v6319_v17, %s5774_s20 }
0x1d31   :  { %3050 = vrot.lane.b32.xlu1 %v6319_v17, %s5776_s1 }
0x1d35   :  { %3048 = vrot.lane.b32.xlu1 %v6319_v17, %s6706_s24 }
0x1da9   :  { %v2817_v52 = vpop.xlane.xlu1 %2816 }
0x1daa   :  { %v2818_v53 = vsub.f32 %v2814_v50, %v2817_v52 }
0x1dac   :  { %v2819_v54 = vmul.f32 1.442695, %v2818_v53 }
0x1dad   :  { %v2827_v55 = vpop.permute.xlu1 %2826 }
0x1dae   :  { %5709 = vpow2.f32 %v2819_v54  ;;  %5394 = vmatpush3.msra.mxu0 %v2827_v55 }
0x1daf   :  { %5398 = vmatprep.subr.mxu0 %v5768_v37 }
0x1db1   :  { %v3051_v3 = vpop.permute.xlu1 %3050 }
0x1db5   :  { %v3049_v7 = vpop.permute.xlu1 %3048 }
0x1db8   :  { %v5710_v1 = vpop.eup %5709 }
0x1db9   :  { %v2821_v56 = vsel %vm221_vm2, %v5710_v1, 0.0 }
0x1dba   :  { %2822 = vadd.xlane.f32.xlu0 %v2821_v56  ;;  %v6454_v56 = vld [vmem:[%s6668_s7 + $0x38] sm:$0xff]  ;;  %s4814_s7 = sld [smem:[#allocation3]] }
0x1dd0   :  { %3140 = vrot.lane.b32.xlu0 %v6319_v17, %s6707_s25 }
0x1dd4   :  { %3292 = vrot.lane.b32.xlu0 %v6319_v17, %s6708_s27 }
0x1de5   :  { %v3044_v57 = vpop.f32.mrb[22].mxu1 }
0x1de6   :  { %v5407_v58 = vpop.f32.mrb[23].mxu1 }
0x1e47   :  { %v2823_v60 = vpop.xlane.xlu0 %2822 }
0x1e48   :  { %5711 = vrcp.f32 %v2823_v60 }
0x1e4b   :  { %v3141_v61 = vpop.permute.xlu0 %3140 }
0x1e4c   :  { %5414 = vmatpush3.msra.mxu1 %v3141_v61 }
0x1e4d   :  { %5423 = vmatprep.subr.mxu1 %v5768_v37 }
0x1e4f   :  { %v3293_v20 = vpop.permute.xlu0 %3292 }
0x1e52   :  { %v5712_v62 = vpop.eup %5711 }
0x1e53   :  { %v2825_v63 = vmul.f32 %v5712_v62, %v5710_v1 }
0x1e55   :  { %5396 = vmatmul.mubr.msk.f32.vlgmr.msra.gmra.mrb[40].mxu0 %vm221_vm2, %v2825_v63 }
0x1e56   :  { %5399 = vmatpush3.msra.mxu0 %v6379_v0  ;;  %5400 = vmatprep.mubr.msk.f32.mxu0 %vm5769_vm1, %v5768_v37 }
0x1e57   :  { %5408 = vmatprep.subr.mxu0 %v5768_v37 }
0x1f28   :  { %v2898_v4 = vpop.f32.mrb[40].mxu0 }
0x1f29   :  { %v5397_v5 = vpop.f32.mrb[41].mxu0  ;;  %5401 = vmatmul.mubr.msk.f32.vlgmr.msra.gmra.mrb[42].mxu0 %vm221_vm2, %v2898_v4 }
0x1f2a   :  { %5409 = vmatpush3.xpose.msk.msra.mxu0 %vm221_vm2, %v3051_v3  ;;  %5410 = vmatprep.mubr.msk.f32.mxu0 %vm5769_vm1, %v5768_v37 }
0x1f2b   :  { %5418 = vmatprep.subr.mxu0 %v5768_v37 }
0x1f2d   :  { %5411 = vmatmul.mubr.msk.f32.vlgmr.msra.gmra.mrb[44].mxu0 %vm221_vm2, %v3049_v7 }
0x1f2e   :  { %5420 = vmatprep.mubr.msk.f32.mxu0 %vm5769_vm1, %v5768_v37  ;;  %5419 = vmatpush3.msra.mxu0 %v6412_v27 }
0x1f2f   :  { %5428 = vmatprep.subr.mxu0 %v5768_v37 }
0x1ffc   :  { %v2971_v40 = vpop.f32.mrb[42].mxu0 }
0x1ffd   :  { %v3045_v8 = vadd.f32 %v3044_v57, %v2971_v40  ;;  %v5402_v9 = vpop.f32.mrb[43].mxu0 }
0x2000   :  { %v3122_v6 = vpop.f32.mrb[44].mxu0 }
0x2001   :  { %v3126_v11 = vmul.f32 0.35355338, %v3122_v6  ;;  %v5412_v12 = vpop.f32.mrb[45].mxu0 }
0x2003   :  { %v3127_v13 = vsel %vm5961_vm3, %v3126_v11, -1e+09 }
0x2004   :  { %v3128_v42 = vadd.f32 %v3127_v13, %v5966_v51 }
0x2006   :  { %v3129_v14 = vsel %vm221_vm2, %v3128_v42, -inf }
0x2007   :  { %3130 = vmax.xlane.f32.xlu1 %v3129_v14 }
0x2094   :  { %v3131_v16 = vpop.xlane.xlu1 %3130 }
0x2095   :  { %v3132_v18 = vsub.f32 %v3128_v42, %v3131_v16 }
0x2097   :  { %v3133_v19 = vmul.f32 1.442695, %v3132_v18 }
0x2099   :  { %5713 = vpow2.f32 %v3133_v19 }
0x20a3   :  { %v5714_v2 = vpop.eup %5713 }
0x20a4   :  { %v3135_v59 = vsel %vm221_vm2, %v5714_v2, 0.0 }
0x20a5   :  { %3136 = vadd.xlane.f32.xlu0 %v3135_v59 }
0x20bb   :  { %3290 = vrot.lane.b32.xlu0 %v6319_v17, %s6709_s12 }
0x2132   :  { %v3137_v22 = vpop.xlane.xlu0 %3136 }
0x2133   :  { %5715 = vrcp.f32 %v3137_v22 }
0x2136   :  { %v3291_v25 = vpop.permute.xlu0 %3290 }
0x213d   :  { %v5716_v23 = vpop.eup %5715 }
0x213e   :  { %v3139_v24 = vmul.f32 %v5716_v23, %v5714_v2 }
0x2140   :  { %5416 = vmatmul.mubr.msk.f32.vlgmr.msra.gmra.mrb[24].mxu1 %vm221_vm2, %v3139_v24 }
0x2141   :  { %5424 = vmatpush3.xpose.msk.msra.mxu1 %vm221_vm2, %v3293_v20  ;;  %5425 = vmatprep.mubr.msk.f32.mxu1 %vm5769_vm1, %v5768_v37 }
0x2142   :  { %5433 = vmatprep.subr.mxu1 %v5768_v37 }
0x2144   :  { %5426 = vmatmul.mubr.msk.f32.vlgmr.msra.gmra.mrb[26].mxu1 %vm221_vm2, %v3291_v25 }
0x2145   :  { %5435 = vmatprep.mubr.msk.f32.mxu1 %vm5769_vm1, %v5768_v37  ;;  %5434 = vmatpush3.msra.mxu1 %v6454_v56 }
0x2146   :  { %5443 = vmatprep.subr.mxu1 %v5768_v37 }
0x2213   :  { %v3212_v28 = vpop.f32.mrb[24].mxu1 }
0x2214   :  { %v5417_v29 = vpop.f32.mrb[25].mxu1  ;;  %5421 = vmatmul.mubr.msk.f32.vlgmr.msra.gmra.mrb[46].mxu0 %vm221_vm2, %v3212_v28 }
0x2215   :  { %5430 = vmatprep.mubr.msk.f32.mxu0 %vm5769_vm1, %v5768_v37 }
0x2217   :  { %v3364_v30 = vpop.f32.mrb[26].mxu1 }
0x2218   :  { %v3368_v31 = vmul.f32 0.35355338, %v3364_v30  ;;  %v5427_v32 = vpop.f32.mrb[27].mxu1 }
0x221a   :  { %v3369_v33 = vsel %vm5961_vm3, %v3368_v31, -1e+09 }
0x221b   :  { %v3370_v34 = vadd.f32 %v3369_v33, %v5966_v51 }
0x221d   :  { %v3371_v48 = vsel %vm221_vm2, %v3370_v34, -inf }
0x221e   :  { %3372 = vmax.xlane.f32.xlu1 %v3371_v48 }
0x222f   :  { %3382 = vrot.lane.b32.xlu1 %v6319_v17, %s6710_s0 }
0x2233   :  { %3533 = vrot.lane.b32.xlu1 %v6317_v15, %s5770_s18 }
0x2237   :  { %3701 = vrot.lane.b32.xlu1 %v6317_v15, %s5771_s3 }
0x223b   :  { %3699 = vrot.lane.b32.xlu1 %v6317_v15, %s5773_s29 }
0x22ab   :  { %v3373_v39 = vpop.xlane.xlu1 %3372 }
0x22ac   :  { %v3374_v21 = vsub.f32 %v3370_v34, %v3373_v39 }
0x22ae   :  { %v3375_v41 = vmul.f32 1.442695, %v3374_v21 }
0x22af   :  { %v3383_v44 = vpop.permute.xlu1 %3382 }
0x22b0   :  { %5717 = vpow2.f32 %v3375_v41  ;;  %5429 = vmatpush3.msra.mxu0 %v3383_v44 }
0x22b1   :  { %5438 = vmatprep.subr.mxu0 %v5768_v37 }
0x22b3   :  { %v3534_v52 = vpop.permute.xlu1 %3533 }
0x22b7   :  { %v3702_v55 = vpop.permute.xlu1 %3701 }
0x22ba   :  { %v5718_v51 = vpop.eup %5717 }
0x22bb   :  { %v3377_v17 = vsel %vm221_vm2, %v5718_v51, 0.0  ;;  %v3700_v1 = vpop.permute.xlu1 %3699 }
0x22bc   :  { %3378 = vadd.xlane.f32.xlu0 %v3377_v17 }
0x22e7   :  { %v3285_v47 = vpop.f32.mrb[46].mxu0 }
0x22e8   :  { %v6433_v10 = vadd.f32 %v3285_v47, %v3045_v8  ;;  %v5422_v50 = vpop.f32.mrb[47].mxu0 }
0x2349   :  { %v3379_v43 = vpop.xlane.xlu0 %3378 }
0x234a   :  { %5719 = vrcp.f32 %v3379_v43 }
0x2354   :  { %v5720_v53 = vpop.eup %5719 }
0x2355   :  { %v3381_v54 = vmul.f32 %v5720_v53, %v5718_v51 }
0x2357   :  { %5431 = vmatmul.mubr.msk.f32.vlgmr.msra.gmra.mrb[48].mxu0 %vm221_vm2, %v3381_v54 }
0x2358   :  { %5439 = vmatpush3.xpose.msk.msra.mxu0 %vm221_vm2, %v3534_v52  ;;  %5440 = vmatprep.mubr.msk.f32.mxu0 %vm5769_vm1, %v5768_v37 }
0x2359   :  { %5448 = vmatprep.subr.mxu0 %v5768_v37 }
0x235b   :  { %5441 = vmatmul.mubr.msk.f32.vlgmr.msra.gmra.mrb[50].mxu0 %vm221_vm2, %v6317_v15 }
0x235c   :  { %5449 = vmatpush3.xpose.msk.msra.mxu0 %vm221_vm2, %v3702_v55  ;;  %5450 = vmatprep.mubr.msk.f32.mxu0 %vm5769_vm1, %v5768_v37 }
0x235d   :  { %5458 = vmatprep.subr.mxu0 %v5768_v37 }
0x235f   :  { %5451 = vmatmul.mubr.msk.f32.vlgmr.msra.gmra.mrb[52].mxu0 %vm221_vm2, %v3700_v1 }
0x2360   :  { %5459 = vmatpush3.msra.mxu0 %v6379_v0  ;;  %5460 = vmatprep.mubr.msk.f32.mxu0 %vm5769_vm1, %v5768_v37 }
0x2361   :  { %5468 = vmatprep.subr.mxu0 %v5768_v37 }
0x242a   :  { %v3454_v57 = vpop.f32.mrb[48].mxu0 }
0x242b   :  { %v5432_v58 = vpop.f32.mrb[49].mxu0  ;;  %5436 = vmatmul.mubr.msk.f32.vlgmr.msra.gmra.mrb[28].mxu1 %vm221_vm2, %v3454_v57 }
0x242c   :  { %5445 = vmatprep.mubr.msk.f32.mxu1 %vm5769_vm1, %v5768_v37 }
0x242e   :  { %v3605_v60 = vpop.f32.mrb[50].mxu0 }
0x242f   :  { %v3609_v61 = vmul.f32 0.35355338, %v3605_v60  ;;  %v5442_v62 = vpop.f32.mrb[51].mxu0 }
0x2431   :  { %v3610_v63 = vsel %vm5961_vm3, %v3609_v61, -1e+09 }
0x2432   :  { %v3773_v0 = vpop.f32.mrb[52].mxu0  ;;  %v3611_v3 = vadd.f32 %v3610_v63, %v6103_v26 }
0x2433   :  { %v3777_v4 = vmul.f32 0.35355338, %v3773_v0  ;;  %v5452_v5 = vpop.f32.mrb[53].mxu0 }
0x2434   :  { %v3612_v7 = vsel %vm221_vm2, %v3611_v3, -inf }
0x2435   :  { %v3778_v40 = vsel %vm5961_vm3, %v3777_v4, -1e+09  ;;  %3613 = vmax.xlane.f32.xlu0 %v3612_v7 }
0x2436   :  { %v3779_v8 = vadd.f32 %v3778_v40, %v6103_v26 }
0x2438   :  { %v3780_v9 = vsel %vm221_vm2, %v3779_v8, -inf }
0x2439   :  { %3781 = vmax.xlane.f32.xlu1 %v3780_v9 }
0x244a   :  { %4015 = vrot.lane.b32.xlu1 %v6317_v15, %s5776_s1 }
0x244b   :  { %3623 = vrot.lane.b32.xlu0 %v6317_v15, %s5772_s28 }
0x24c2   :  { %v3614_v6 = vpop.xlane.xlu0 %3613 }
0x24c3   :  { %v3615_v11 = vsub.f32 %v3611_v3, %v3614_v6 }
0x24c5   :  { %v3616_v12 = vmul.f32 1.442695, %v3615_v11 }
0x24c6   :  { %v3624_v13 = vpop.permute.xlu0 %3623  ;;  %v3782_v42 = vpop.xlane.xlu1 %3781 }
0x24c7   :  { %5721 = vpow2.f32 %v3616_v12  ;;  %v3783_v14 = vsub.f32 %v3779_v8, %v3782_v42  ;;  %5444 = vmatpush3.msra.mxu1 %v3624_v13 }
0x24c8   :  { %5453 = vmatprep.subr.mxu1 %v5768_v37 }
0x24c9   :  { %v3784_v16 = vmul.f32 1.442695, %v3783_v14  ;;  %v4993_v14 = vld [vmem:[%s6669_s8 + $0x1] ss:$0 sm:$0xff] }
0x24ca   :  { %v4016_v39 = vpop.permute.xlu1 %4015 }
0x24cb   :  { %5723 = vpow2.f32 %v3784_v16 }
0x24d1   :  { %v5722_v18 = vpop.eup %5721 }
0x24d2   :  { %v3618_v19 = vsel %vm221_vm2, %v5722_v18, 0.0 }
0x24d3   :  { %3619 = vadd.xlane.f32.xlu0 %v3618_v19 }
0x24d5   :  { %v5724_v2 = vpop.eup %5723 }
0x24d6   :  { %v3786_v59 = vsel %vm221_vm2, %v5724_v2, 0.0 }
0x24d7   :  { %3787 = vadd.xlane.f32.xlu0 %v3786_v59 }
0x24ed   :  { %3791 = vrot.lane.b32.xlu0 %v6317_v15, %s5774_s20 }
0x24f1   :  { %4013 = vrot.lane.b32.xlu0 %v6317_v15, %s6706_s24 }
0x24fe   :  { %v3527_v20 = vpop.f32.mrb[28].mxu1 }
0x24ff   :  { %v6481_v22 = vadd.f32 %v3527_v20, %v6433_v10  ;;  %v5437_v23 = vpop.f32.mrb[29].mxu1 }
0x2501   :  { %v4505_v49 = vadd.f32 %v4993_v14, %v6481_v22 }
0x2560   :  { %v3620_v24 = vpop.xlane.xlu0 %3619 }
0x2561   :  { %5725 = vrcp.f32 %v3620_v24 }
0x2564   :  { %v3788_v25 = vpop.xlane.xlu0 %3787 }
0x2565   :  { %5727 = vrcp.f32 %v3788_v25 }
0x2568   :  { %v3792_v30 = vpop.permute.xlu0 %3791 }
0x256b   :  { %v5726_v28 = vpop.eup %5725 }
0x256c   :  { %v3622_v29 = vmul.f32 %v5726_v28, %v5722_v18 }
0x256e   :  { %5446 = vmatmul.mubr.msk.f32.vlgmr.msra.gmra.mrb[30].mxu1 %vm221_vm2, %v3622_v29 }
0x256f   :  { %v5728_v31 = vpop.eup %5727  ;;  %5454 = vmatpush3.msra.mxu1 %v3792_v30  ;;  %5455 = vmatprep.mubr.msk.f32.mxu1 %vm5769_vm1, %v5768_v37 }
0x2570   :  { %v3790_v32 = vmul.f32 %v5728_v31, %v5724_v2  ;;  %5463 = vmatprep.subr.mxu1 %v5768_v37 }
0x2572   :  { %5456 = vmatmul.mubr.msk.f32.vlgmr.msra.gmra.mrb[32].mxu1 %vm221_vm2, %v3790_v32 }
0x2573   :  { %5464 = vmatpush3.msra.mxu1 %v6352_v38  ;;  %5465 = vmatprep.mubr.msk.f32.mxu1 %vm5769_vm1, %v5768_v37  ;;  %v4014_v38 = vpop.permute.xlu0 %4013 }
0x2574   :  { %5473 = vmatprep.subr.mxu1 %v5768_v37 }
0x2641   :  { %v3695_v33 = vpop.f32.mrb[30].mxu1 }
0x2642   :  { %v5447_v34 = vpop.f32.mrb[31].mxu1  ;;  %5466 = vmatmul.mubr.msk.f32.vlgmr.msra.gmra.mrb[34].mxu1 %vm221_vm2, %v3695_v33 }
0x2643   :  { %5475 = vmatprep.mubr.msk.f32.mxu1 %vm5769_vm1, %v5768_v37 }
0x2645   :  { %v3863_v48 = vpop.f32.mrb[32].mxu1 }
0x2646   :  { %v5457_v21 = vpop.f32.mrb[33].mxu1  ;;  %5461 = vmatmul.mubr.msk.f32.vlgmr.msra.gmra.mrb[54].mxu0 %vm221_vm2, %v3863_v48 }
0x2647   :  { %5469 = vmatpush3.xpose.msk.msra.mxu0 %vm221_vm2, %v4016_v39  ;;  %5470 = vmatprep.mubr.msk.f32.mxu0 %vm5769_vm1, %v5768_v37 }
0x2648   :  { %5478 = vmatprep.subr.mxu0 %v5768_v37 }
0x264a   :  { %5471 = vmatmul.mubr.msk.f32.vlgmr.msra.gmra.mrb[56].mxu0 %vm221_vm2, %v4014_v38 }
0x264b   :  { %5479 = vmatpush3.msra.mxu0 %v6412_v27  ;;  %5480 = vmatprep.mubr.msk.f32.mxu0 %vm5769_vm1, %v5768_v37 }
0x264c   :  { %5488 = vmatprep.subr.mxu0 %v5768_v37 }
0x2715   :  { %v4009_v41 = vpop.f32.mrb[34].mxu1 }
0x2716   :  { %v5467_v44 = vpop.f32.mrb[35].mxu1 }
0x2719   :  { %v3936_v51 = vpop.f32.mrb[54].mxu0 }
0x271a   :  { %v4010_v17 = vadd.f32 %v4009_v41, %v3936_v51  ;;  %v5462_v47 = vpop.f32.mrb[55].mxu0 }
0x271d   :  { %v4087_v10 = vpop.f32.mrb[56].mxu0 }
0x271e   :  { %v4091_v50 = vmul.f32 0.35355338, %v4087_v10  ;;  %v5472_v43 = vpop.f32.mrb[57].mxu0 }
0x271f   :  { %v4996_v43 = vld [vmem:[%s6670_s9 + $0x1] ss:$0 sm:$0xff] }
0x2720   :  { %v4092_v52 = vsel %vm5961_vm3, %v4091_v50, -1e+09 }
0x2721   :  { %v4093_v53 = vadd.f32 %v4092_v52, %v6103_v26 }
0x2723   :  { %v4094_v27 = vsel %vm221_vm2, %v4093_v53, -inf }
0x2724   :  { %4095 = vmax.xlane.f32.xlu0 %v4094_v27 }
0x273a   :  { %4105 = vrot.lane.b32.xlu0 %v6317_v15, %s6707_s25 }
0x273e   :  { %4255 = vrot.lane.b32.xlu0 %v6317_v15, %s6709_s12 }
0x27b1   :  { %v4096_v54 = vpop.xlane.xlu0 %4095 }
0x27b2   :  { %v4097_v55 = vsub.f32 %v4093_v53, %v4096_v54  ;;  %v4997_v53 = vld [vmem:[%s6671_s10 + $0x1] ss:$0 sm:$0xff] }
0x27b4   :  { %v4098_v1 = vmul.f32 1.442695, %v4097_v55  ;;  %v4998_v55 = vld [vmem:[%s6672_s11 + $0x20] sm:$0xff] }
0x27b5   :  { %v4106_v57 = vpop.permute.xlu0 %4105 }
0x27b6   :  { %5729 = vpow2.f32 %v4098_v1  ;;  %5474 = vmatpush3.msra.mxu1 %v4106_v57  ;;  %v4999_v1 = vld [vmem:[%s6672_s11 + $0x28] sm:$0xff] }
0x27b7   :  { %5483 = vmatprep.subr.mxu1 %v5768_v37  ;;  %v5600_v57 = vpack.c.bf16 %v4999_v1, %v4998_v55  ;;  %v5023_v1 = vld [vmem:[%s6675_s14 + $0x1] ss:$0 sm:$0xff]  ;;  %s5028_s14 = sld [smem:[#allocation3 + $0x1]] }
0x27b9   :  { %v4256_v3 = vpop.permute.xlu0 %4255 }
0x27bd   :  { %s4834_s28 = sadd.s32 8, %s5028_s14 }
0x27c0   :  { %v5730_v58 = vpop.eup %5729 }
0x27c1   :  { %v4100_v60 = vsel %vm221_vm2, %v5730_v58, 0.0 }
0x27c2   :  { %4101 = vadd.xlane.f32.xlu1 %v4100_v60  ;;  %v5001_v60 = vld [vmem:[%s6672_s11 + $0x38] sm:$0xff] }
0x27d3   :  { %4257 = vrot.lane.b32.xlu1 %v6317_v15, %s6708_s27 }
0x284f   :  { %v4102_v61 = vpop.xlane.xlu1 %4101 }
0x2850   :  { %5731 = vrcp.f32 %v4102_v61 }
0x2853   :  { %v4258_v0 = vpop.permute.xlu1 %4257 }
0x285a   :  { %v5732_v62 = vpop.eup %5731 }
0x285b   :  { %v4104_v63 = vmul.f32 %v5732_v62, %v5730_v58  ;;  %v5000_v58 = vld [vmem:[%s6672_s11 + $0x30] sm:$0xff]  ;;  %v5006_v62 = vld [vmem:[%s6674_s13 + $0x80] sm:$0xff] }
0x285c   :  { %v5604_v61 = vpack.c.bf16 %v5001_v60, %v5000_v58 }
0x285d   :  { %5476 = vmatmul.mubr.msk.f32.vlgmr.msra.gmra.mrb[36].mxu1 %vm221_vm2, %v4104_v63  ;;  %v5007_v63 = vld [vmem:[%s6674_s13 + $0x88] sm:$0xff] }
0x285e   :  { %5484 = vmatpush3.xpose.msk.msra.mxu1 %vm221_vm2, %v4258_v0  ;;  %5485 = vmatprep.mubr.msk.f32.mxu1 %vm5769_vm1, %v5768_v37  ;;  %v5608_v0 = vpack.c.bf16 %v5007_v63, %v5006_v62 }
0x285f   :  { %5493 = vmatprep.subr.mxu1 %v5768_v37 }
0x2861   :  { %5486 = vmatmul.mubr.msk.f32.vlgmr.msra.gmra.mrb[38].mxu1 %vm221_vm2, %v4256_v3 }
0x2862   :  { %5494 = vmatpush3.msra.mxu1 %v6454_v56  ;;  %5495 = vmatprep.mubr.msk.f32.mxu1 %vm5769_vm1, %v5768_v37 }
0x2863   :  { %5609 = vmatprep.subr.bf16.mxu1 %v5608_v0 }
0x2930   :  { %v4177_v4 = vpop.f32.mrb[36].mxu1 }
0x2931   :  { %v5477_v5 = vpop.f32.mrb[37].mxu1  ;;  %5481 = vmatmul.mubr.msk.f32.vlgmr.msra.gmra.mrb[58].mxu0 %vm221_vm2, %v4177_v4 }
0x2932   :  { %5490 = vmatprep.mubr.msk.f32.mxu0 %vm5769_vm1, %v5768_v37 }
0x2934   :  { %v4329_v7 = vpop.f32.mrb[38].mxu1 }
0x2935   :  { %v4333_v40 = vmul.f32 0.35355338, %v4329_v7  ;;  %v5487_v8 = vpop.f32.mrb[39].mxu1 }
0x2937   :  { %v4334_v9 = vsel %vm5961_vm3, %v4333_v40, -1e+09 }
0x2938   :  { %v4335_v6 = vadd.f32 %v4334_v9, %v6103_v26  ;;  %v6540_v26 = vadd.f32 %v4505_v49, %v6281_v36  ;;  %v5013_v49 = vld [vmem:[%s6674_s13 + $0xb8] sm:$0xff] }
0x293a   :  { %v4336_v56 = vsel %vm221_vm2, %v4335_v6, -inf }
0x293b   :  { %4337 = vmax.xlane.f32.xlu0 %v4336_v56  ;;  %v5009_v56 = vld [vmem:[%s6674_s13 + $0x98] sm:$0xff] }
0x2951   :  { %4347 = vrot.lane.b32.xlu0 %v6317_v15, %s6710_s0  ;;  %v4513_v15 = vsel %vm78_vm0, %v6540_v26, 0.0 }
0x29c8   :  { %v4338_v11 = vpop.xlane.xlu0 %4337 }
0x29c9   :  { %v4339_v12 = vsub.f32 %v4335_v6, %v4338_v11  ;;  %v5008_v6 = vld [vmem:[%s6674_s13 + $0x90] sm:$0xff] }
0x29ca   :  { %v5612_v11 = vpack.c.bf16 %v5009_v56, %v5008_v6 }
0x29cb   :  { %v4340_v13 = vmul.f32 1.442695, %v4339_v12  ;;  %v5010_v12 = vld [vmem:[%s6674_s13 + $0xa0] sm:$0xff] }
0x29cc   :  { %v4348_v42 = vpop.permute.xlu0 %4347 }
0x29cd   :  { %5733 = vpow2.f32 %v4340_v13  ;;  %5489 = vmatpush3.msra.mxu0 %v4348_v42  ;;  %v5011_v13 = vld [vmem:[%s6674_s13 + $0xa8] sm:$0xff] }
0x29ce   :  { %5601 = vmatprep.subr.bf16.mxu0 %v5600_v57  ;;  %v5616_v42 = vpack.c.bf16 %v5011_v13, %v5010_v12 }
0x29d7   :  { %v5734_v16 = vpop.eup %5733 }
0x29d8   :  { %v4342_v18 = vsel %vm221_vm2, %v5734_v16, 0.0 }
0x29d9   :  { %4343 = vadd.xlane.f32.xlu1 %v4342_v18  ;;  %v5014_v18 = vld [vmem:[%s6674_s13 + $0xc0] sm:$0xff] }
0x29dd   :  { %4514 = vadd.xlane.f32.xlu1 %v4513_v15  ;;  %v5015_v15 = vld [vmem:[%s6674_s13 + $0xc8] sm:$0xff] }
0x2a04   :  { %v4250_v19 = vpop.f32.mrb[58].mxu0 }
0x2a05   :  { %v4254_v2 = vadd.f32 %v4250_v19, %v4010_v17  ;;  %v5482_v59 = vpop.f32.mrb[59].mxu0  ;;  %v5624_v19 = vpack.c.bf16 %v5015_v15, %v5014_v18  ;;  %v5024_v18 = vld [vmem:[%s6676_s15] ss:$0 sm:$0xff]  ;;  %v4815_v15 = vstv %s4814_s7 }
0x2a06   :  { %v5017_v59 = vld [vmem:[%s6674_s13 + $0xd8] sm:$0xff]  ;;  %vm4816_vm4 = vcmp.eq.s32.totalorder %v5949_v45, %v4815_v15 }
0x2a66   :  { %v4344_v20 = vpop.xlane.xlu1 %4343 }
0x2a67   :  { %5735 = vrcp.f32 %v4344_v20 }
0x2a6a   :  { %v4515_v36 = vpop.xlane.xlu1 %4514 }
0x2a6b   :  { %v4519_v28 = vmul.f32 0.03125, %v4515_v36  ;;  %v5021_v36 = vld [vmem:[%s6674_s13 + $0xf8] sm:$0xff] }
0x2a6d   :  { %v4521_v32 = vsub.f32 %v6540_v26, %v4519_v28 }
0x2a6f   :  { %v4523_v39 = vmul.f32 %v4521_v32, %v4521_v32 }
0x2a71   :  { %v5736_v23 = vpop.eup %5735  ;;  %v4525_v21 = vsel %vm78_vm0, %v4523_v39, 0.0 }
0x2a72   :  { %v4346_v24 = vmul.f32 %v5736_v23, %v5734_v16  ;;  %v5018_v23 = vld [vmem:[%s6674_s13 + $0xe0] sm:$0xff] }
0x2a74   :  { %5491 = vmatmul.mubr.msk.f32.vlgmr.msra.gmra.mrb[60].mxu0 %vm221_vm2, %v4346_v24  ;;  %v5019_v24 = vld [vmem:[%s6674_s13 + $0xe8] sm:$0xff] }
0x2a75   :  { %5603 = vmatpush3.bf16.msra.mxu0 %v5600_v57 }
0x2a76   :  { %5605 = vmatprep.subr.bf16.mxu0 %v5604_v61 }
0x2a79   :  { %5607 = vmatpush3.bf16.msra.mxu0 %v5604_v61 }
0x2b47   :  { %v4419_v22 = vpop.f32.mrb[60].mxu0 }
0x2b48   :  { %v5492_v25 = vpop.f32.mrb[61].mxu0  ;;  %5496 = vmatmul.mubr.msk.f32.vlgmr.msra.gmra.mrb[40].mxu1 %vm221_vm2, %v4419_v22  ;;  %v5632_v22 = vpack.c.bf16 %v5019_v24, %v5018_v23 }
0x2b49   :  { %5611 = vmatpush3.bf16.msra.mxu1 %v5608_v0  ;;  %v5020_v25 = vld [vmem:[%s6674_s13 + $0xf0] sm:$0xff] }
0x2b4a   :  { %5613 = vmatprep.subr.bf16.mxu1 %v5612_v11  ;;  %v5636_v28 = vpack.c.bf16 %v5021_v36, %v5020_v25  ;;  %v5026_v36 = vsel %vm4816_vm4, 1.0, %v5768_v37 }
0x2b4d   :  { %5615 = vmatpush3.bf16.msra.mxu1 %v5612_v11 }
0x2b4e   :  { %5617 = vmatprep.subr.bf16.mxu1 %v5616_v42 }
0x2b51   :  { %5619 = vmatpush3.bf16.msra.mxu1 %v5616_v42 }
0x2c1b   :  { %v4492_v29 = vpop.f32.mrb[40].mxu1 }
0x2c1c   :  { %v4496_v30 = vadd.f32 %v4492_v29, %v4254_v2  ;;  %v5497_v31 = vpop.f32.mrb[41].mxu1  ;;  %v5016_v2 = vld [vmem:[%s6674_s13 + $0xd0] sm:$0xff]  ;;  %v5003_v29 = vld [vmem:[%s6705_s2 + $0x1] ss:$0 sm:$0xff] }
0x2c1d   :  { %v5628_v20 = vpack.c.bf16 %v5017_v59, %v5016_v2  ;;  %v4813_v59 = vadd.s32 8, %v5949_v45 }
0x2c1e   :  { %v4506_v33 = vadd.f32 %v4993_v14, %v4496_v30  ;;  %v5012_v14 = vld [vmem:[%s6674_s13 + $0xb0] sm:$0xff] }
0x2c1f   :  { %v5620_v16 = vpack.c.bf16 %v5013_v49, %v5012_v14  ;;  %vm4817_vm6 = vcmp.eq.s32.totalorder %v4813_v59, %v4815_v15 }
0x2c20   :  { %v6549_v34 = vadd.f32 %v4506_v33, %v6278_v35 }
0x2c21   :  { %5621 = vmatprep.subr.bf16.mxu1 %v5620_v16 }
0x2c22   :  { %v4516_v48 = vsel %vm78_vm0, %v6549_v34, 0.0  ;;  %5623 = vmatpush3.bf16.msra.mxu1 %v5620_v16 }
0x2c23   :  { %4517 = vadd.xlane.f32.xlu1 %v4516_v48  ;;  %5625 = vmatprep.subr.bf16.mxu1 %v5624_v19 }
0x2c26   :  { %5627 = vmatpush3.bf16.msra.mxu1 %v5624_v19  ;;  %v4835_v19 = vstv %s4834_s28 }
0x2c27   :  { %4526 = vadd.xlane.f32.xlu1 %v4525_v21  ;;  %5629 = vmatprep.subr.bf16.mxu1 %v5628_v20  ;;  %vm4836_vm5 = vcmp.eq.s32.totalorder %v5949_v45, %v4835_v19  ;;  %vm4837_vm7 = vcmp.eq.s32.totalorder %v4813_v59, %v4835_v19 }
0x2c2a   :  { %5631 = vmatpush3.bf16.msra.mxu1 %v5628_v20  ;;  %v5025_v20 = vld [vmem:[%s6677_s16] ss:$0 sm:$0xff] }
0x2c2b   :  { %5633 = vmatprep.subr.bf16.mxu1 %v5632_v22 }
0x2c2e   :  { %5635 = vmatpush3.bf16.msra.mxu1 %v5632_v22 }
0x2c2f   :  { %5637 = vmatprep.subr.bf16.mxu1 %v5636_v28 }
0x2c32   :  { %5639 = vmatpush3.bf16.msra.mxu1 %v5636_v28  ;;  %v5029_v28 = vsel %vm4836_vm5, 1.0, %v5768_v37 }
0x2cb0   :  { %v4518_v38 = vpop.xlane.xlu1 %4517 }
0x2cb1   :  { %v4520_v41 = vmul.f32 0.03125, %v4518_v38 }
0x2cb3   :  { %v4522_v44 = vsub.f32 %v6549_v34, %v4520_v41 }
0x2cb4   :  { %v4527_v51 = vpop.xlane.xlu1 %4526 }
0x2cb5   :  { %v4531_v17 = vmul.f32 0.03125, %v4527_v51  ;;  %v4524_v47 = vmul.f32 %v4522_v44, %v4522_v44 }
0x2cb7   :  { %v4533_v10 = vadd.f32 1e-05, %v4531_v17  ;;  %v4528_v50 = vsel %vm78_vm0, %v4524_v47, 0.0 }
0x2cb8   :  { %4529 = vadd.xlane.f32.xlu0 %v4528_v50 }
0x2cb9   :  { %5737 = vrsqrt.f32 %v4533_v10 }
0x2cc3   :  { %v5738_v35 = vpop.eup %5737 }
0x2cc4   :  { %v4537_v52 = vmul.f32 %v5738_v35, %v4521_v32 }
0x2cc6   :  { %v4545_v27 = vmul.f32 %v4996_v43, %v4537_v52 }
0x2cc8   :  { %v4553_v54 = vadd.f32 %v4997_v53, %v4545_v27 }
0x2cca   :  { %5506 = vmatprep.mubr.msk.f32.mxu0 %vm78_vm0, %v4553_v54 }
0x2d45   :  { %v4530_v3 = vpop.xlane.xlu0 %4529 }
0x2d46   :  { %v4532_v4 = vmul.f32 0.03125, %v4530_v3 }
0x2d48   :  { %v4534_v5 = vadd.f32 1e-05, %v4532_v4 }
0x2d4a   :  { %5739 = vrsqrt.f32 %v4534_v5 }
0x2d54   :  { %v5740_v7 = vpop.eup %5739 }
0x2d55   :  { %v4538_v40 = vmul.f32 %v5740_v7, %v4522_v44 }
0x2d57   :  { %v4546_v8 = vmul.f32 %v4996_v43, %v4538_v40 }
0x2d59   :  { %v4554_v9 = vadd.f32 %v4997_v53, %v4546_v8 }
0x2d5b   :  { %5507 = vmatmul.mubr.msk.f32.vlgmr.msra.gmra.mrb[62].mxu0 %vm78_vm0, %v4554_v9 }
0x2e2e   :  { %v5508_v30 = vpop.f32.mrb[62].mxu0 }
0x2e2f   :  { %v4646_v31 = vadd.f32 %v5508_v30, %v5003_v29  ;;  %v4640_v32 = vpop.f32.mrb[63].mxu0  ;;  %v5027_v30 = vsel %vm4817_vm6, 1.0, %v5768_v37 }
0x2e30   :  { %v4641_v33 = vadd.f32 %v5003_v29, %v4640_v32 }
0x2e31   :  { %v4652_v48 = vmul.f32 0.044715, %v4646_v31  ;;  %v4650_v27 = vmul.f32 0.5, %v4646_v31 }
0x2e32   :  { %v4651_v39 = vmul.f32 0.044715, %v4641_v33  ;;  %v4649_v52 = vmul.f32 0.5, %v4641_v33 }
0x2e33   :  { %v4654_v21 = vmul.f32 %v4652_v48, %v4646_v31 }
0x2e34   :  { %v4653_v38 = vmul.f32 %v4651_v39, %v4641_v33 }
0x2e35   :  { %v4656_v41 = vmul.f32 %v4654_v21, %v4646_v31 }
0x2e36   :  { %v4655_v44 = vmul.f32 %v4653_v38, %v4641_v33 }
0x2e37   :  { %v4658_v51 = vadd.f32 %v4656_v41, %v4646_v31  ;;  %v5030_v31 = vsel %vm4837_vm7, 1.0, %v5768_v37 }
0x2e38   :  { %v4657_v17 = vadd.f32 %v4655_v44, %v4641_v33 }
0x2e39   :  { %v4660_v47 = vmul.f32 0.7978846, %v4658_v51 }
0x2e3a   :  { %v4659_v10 = vmul.f32 0.7978846, %v4657_v17 }
0x2e3b   :  { %5741 = vtanh.f32 %v4660_v47 }
0x2e3c   :  { %5743 = vtanh.f32 %v4659_v10 }
0x2e45   :  { %v5742_v50 = vpop.eup %5741 }
0x2e46   :  { %v5744_v35 = vpop.eup %5743  ;;  %v4664_v43 = vadd.f32 1.0, %v5742_v50 }
0x2e47   :  { %v4663_v53 = vadd.f32 1.0, %v5744_v35 }
0x2e48   :  { %v4666_v55 = vmul.f32 %v4664_v43, %v4650_v27 }
0x2e49   :  { %v4665_v54 = vmul.f32 %v4663_v53, %v4649_v52 }
0x2e4b   :  { %5541 = vmatprep.mubr.f32.mxu1 %v4665_v54 }
0x2e4c   :  { %5542 = vmatmul.mubr.f32.vlgmr.msra.gmra.mrb[42].mxu1 %v4666_v55 }
0x2f1f   :  { %v5543_v57 = vpop.f32.mrb[42].mxu1 }
0x2f20   :  { %v4758_v58 = vpop.f32.mrb[43].mxu1  ;;  %v4764_v60 = vadd.f32 %v5543_v57, %v5023_v1  ;;  %v5031_v57 = vld [vmem:[%s6678_s17] ss:$0 sm:$0xff] }
0x2f21   :  { %v4759_v61 = vadd.f32 %v5023_v1, %v4758_v58 }
0x2f22   :  { %v4768_v63 = vadd.f32 %v4764_v60, %v6549_v34 }
0x2f23   :  { %v4767_v62 = vadd.f32 %v4759_v61, %v6540_v26 }
0x2f24   :  { %v4774_v3 = vsel %vm78_vm0, %v4768_v63, 0.0 }
0x2f25   :  { %v4771_v0 = vsel %vm78_vm0, %v4767_v62, 0.0 }
0x2f26   :  { %4772 = vadd.xlane.f32.xlu1 %v4771_v0 }
0x2f2a   :  { %4775 = vadd.xlane.f32.xlu1 %v4774_v3 }
0x2fb3   :  { %v4773_v4 = vpop.xlane.xlu1 %4772 }
0x2fb4   :  { %v4777_v5 = vmul.f32 0.03125, %v4773_v4 }
0x2fb6   :  { %v4779_v7 = vsub.f32 %v4767_v62, %v4777_v5  ;;  %v5781_v62 = vmov 0  }
0x2fb7   :  { %v4776_v40 = vpop.xlane.xlu1 %4775  ;;  %5656 = vset.pattern.permute.xlu0 %v5781_v62  ;;  %5655 = vset.pattern.permute.xlu1 %v5781_v62 }
0x2fb8   :  { %v4778_v8 = vmul.f32 0.03125, %v4776_v40  ;;  %v4781_v9 = vmul.f32 %v4779_v7, %v4779_v7 }
0x2fba   :  { %v4780_v6 = vsub.f32 %v4768_v63, %v4778_v8  ;;  %v4783_v56 = vsel %vm78_vm0, %v4781_v9, 0.0  ;;  %v5032_v63 = vld [vmem:[#allocation4] ss:$0 sm:$0xff] }
0x2fbb   :  { %4784 = vadd.xlane.f32.xlu1 %v4783_v56 }
0x2fbc   :  { %v4782_v11 = vmul.f32 %v4780_v6, %v4780_v6 }
0x2fbe   :  { %v4786_v26 = vsel %vm78_vm0, %v4782_v11, 0.0 }
0x2fbf   :  { %4787 = vadd.xlane.f32.xlu1 %v4786_v26 }
0x3048   :  { %v4785_v34 = vpop.xlane.xlu1 %4784 }
0x3049   :  { %v4789_v12 = vmul.f32 0.03125, %v4785_v34 }
0x304b   :  { %v4791_v13 = vadd.f32 1e-05, %v4789_v12 }
0x304c   :  { %v4788_v42 = vpop.xlane.xlu1 %4787 }
0x304d   :  { %5745 = vrsqrt.f32 %v4791_v13  ;;  %v4790_v14 = vmul.f32 0.03125, %v4788_v42 }
0x304f   :  { %v4792_v49 = vadd.f32 1e-05, %v4790_v14 }
0x3051   :  { %5747 = vrsqrt.f32 %v4792_v49 }
0x3057   :  { %v5746_v16 = vpop.eup %5745 }
0x3058   :  { %v4795_v2 = vmul.f32 %v5746_v16, %v4779_v7 }
0x305a   :  { %v4803_v23 = vmul.f32 %v5024_v18, %v4795_v2 }
0x305b   :  { %v5748_v24 = vpop.eup %5747 }
0x305c   :  { %v4811_v22 = vadd.f32 %v5025_v20, %v4803_v23  ;;  %v4796_v25 = vmul.f32 %v5748_v24, %v4780_v6 }
0x305e   :  { %v4804_v29 = vmul.f32 %v5024_v18, %v4796_v25  ;;  %v4822_v33 = vmul.f32 %v5026_v36, %v4811_v22  ;;  %v4842_v48 = vmul.f32 %v5029_v28, %v4811_v22 }
0x3060   :  { %v4812_v32 = vadd.f32 %v5025_v20, %v4804_v29  ;;  %v4824_v45 = vsel %vm78_vm0, %v4822_v33, 0.0  ;;  %v4844_v41 = vsel %vm78_vm0, %v4842_v48, 0.0 }
0x3062   :  { %v4823_v39 = vmul.f32 %v5027_v30, %v4812_v32  ;;  %v4843_v21 = vmul.f32 %v5030_v31, %v4812_v32 }
0x3064   :  { %v4825_v38 = vsel %vm78_vm0, %v4823_v39, 0.0  ;;  %v4845_v44 = vsel %vm78_vm0, %v4843_v21, 0.0 }
0x3065   :  { %v4826_v51 = vadd.f32 %v4825_v38, %v4824_v45  ;;  %v4846_v17 = vadd.f32 %v4845_v44, %v4844_v41 }
0x3067   :  { %v4827_v47 = vrot.slane %v4826_v51, 4  ;;  %v4847_v10 = vrot.slane %v4846_v17, 4 }
0x3069   :  { %v4828_v50 = vadd.f32 %v4827_v47, %v4826_v51  ;;  %v4848_v35 = vadd.f32 %v4847_v10, %v4846_v17 }
0x306b   :  { %v4829_v37 = vrot.slane %v4828_v50, 2  ;;  %v4849_v43 = vrot.slane %v4848_v35, 2 }
0x306d   :  { %v4830_v52 = vadd.f32 %v4829_v37, %v4828_v50  ;;  %v4850_v53 = vadd.f32 %v4849_v43, %v4848_v35 }
0x306f   :  { %v4831_v27 = vrot.slane %v4830_v52, 1  ;;  %v4851_v54 = vrot.slane %v4850_v53, 1 }
0x3071   :  { %v4832_v55 = vadd.f32 %v4831_v27, %v4830_v52  ;;  %v4852_v1 = vadd.f32 %v4851_v54, %v4850_v53 }
0x3073   :  { %v4854_v58 = vsel %vm4853_vm8, %v4832_v55, %v4852_v1 }
0x3074   :  { %v4862_v60 = vmul.f32 %v5031_v57, %v4854_v58 }
0x3076   :  { %v4864_v61 = vsel %vm4863_vm9, %v4862_v60, 0.0 }
0x3077   :  { %4865 = vadd.xlane.f32.xlu1 %v4864_v61 }
0x3104   :  { %v4866_v0 = vpop.xlane.xlu1 %4865 }
0x3105   :  { %v4874_v3 = vadd.f32 %v5032_v63, %v4866_v0 }
0x3107   :  { %v5033_v4 = vmul.f32 -1.442695, %v4874_v3  ;;  %4891 = vperm.xlu0 %5656, %v4874_v3  }
0x3109   :  { %5749 = vpow2.f32 %v5033_v4 }
0x3113   :  { %v5750_v5 = vpop.eup %5749 }
0x3114   :  { %v4878_v7 = vadd.f32 1.0, %v5750_v5 }
0x3116   :  { %5751 = vrcp.f32 %v4878_v7 }
0x3120   :  { %v5752_v40 = vpop.eup %5751 }
0x3121   :  { %4885 = vperm.xlu1 %5655, %v5752_v40  }
0x3186   :  { %v4892_v9 = vpop.permute.xlu0 %4891 }
0x31a0   :  { %v4886_v8 = vpop.permute.xlu1 %4885 }
0x31a1   :  { %v4888_v6 = vsel %vm4882_vm10, %v4886_v8, 0.0 }
0x31a2   :  { %v4894_v56 = vsel %vm4881_vm11, %v4892_v9, %v4888_v6 }
0x31a3   :  { %4895 = vst [vmem:[%s6679_s19] sm:$0x3] %v4894_v56 }

</bundles_post_ra>
